<compile_context>
chip_gen: v5e
topology: v5e:2x2
jax: 0.10.0
libtpu: 0.0.40
codegen_flags: <defaults>
</compile_context>

<pallas_src>
import functools

import numpy as np
import jax
import jax.numpy as jnp
from jax import lax
from jax.experimental import pallas as pl
from jax.experimental.pallas import tpu as pltpu

_EPS = 1e-5
_PREC = lax.Precision.HIGHEST     # used only by the pure-JAX reference


def _round_up(x, m):
    return (x + m - 1) // m * m


def _vmem_limit(block_bytes):
    """Raise the scoped VMEM limit only when needed; never exceed physical VMEM."""
    if block_bytes <= 8 * 1024 * 1024:
        return None
    try:
        cap = int(pltpu.get_tpu_info().vmem_capacity_bytes)
    except Exception:
        cap = 64 * 1024 * 1024          # conservative (v7x) fallback
    return min(int(block_bytes * 1.25) + (4 << 20), cap - (8 << 20))


def _conv_bn_relu_rowpool_kernel(w_ref, scale_ref, shift_ref, x_ref, out_ref,
                                 xs_ref, act_ref, *, H, rt, cin, co_blk):
    """conv3x3(pad=1) + folded BN + ReLU + row direction of the 3x3/stride-3 max-pool.

    One grid step = (one image, one block of output channels).

    w_ref     : (Cout*Cin*9,) f32 SMEM   flat conv weights, index ((co*Cin+ci)*3+dy)*3+dx
    scale_ref : (Cout,)       f32 SMEM   folded BN scale
    shift_ref : (Cout,)       f32 SMEM   folded BN shift (includes conv bias)
    x_ref     : (1, Cin, H+2, Wl)        zero-padded image (lane-dense width Wl)
    out_ref   : (1, co_blk, H//3, Wl)    row-pooled output (columns still unpooled)
    xs_ref    : (2*Cin, rt+2, Wl) f32    per-chunk dx-rolled planes (VMEM scratch)
    act_ref   : (rt, Wl) f32             per-channel activation staging (VMEM scratch)
    """
    cb = pl.program_id(1)
    Wl = x_ref.shape[-1]
    rt_o = rt // 3
    n_chunks = H // rt

    for chunk in range(n_chunks):
        r0 = chunk * rt

        # dx in {1,2} column shifts for this row chunk: done ONCE on the XLU and cached
        # in VMEM so every output channel reuses them (dx = 0 reads x_ref directly).
        for dx in (1, 2):
            for ci in range(cin):
                rows = x_ref[0, ci, r0:r0 + rt + 2, :]                     # (rt+2, Wl)
                # jnp.roll semantics: shift = Wl - dx  ==>  out[:, j] = rows[:, j + dx].
                xs_ref[(dx - 1) * cin + ci, :, :] = pltpu.roll(rows, Wl - dx, axis=1)

        @pl.loop(0, co_blk)
        def _(co):
            cg = cb * co_blk + co
            # Direct VPU conv with the accumulator kept in vregs (no per-FMA vst).
            acc = None
            for dy in range(3):
                for dx in range(3):
                    for ci in range(cin):
                        if dx == 0:
                            plane = x_ref[0, ci, r0 + dy:r0 + dy + rt, :]   # (rt, Wl)
                        else:
                            plane = xs_ref[(dx - 1) * cin + ci, dy:dy + rt, :]
                        w = w_ref[(cg * cin + ci) * 9 + dy * 3 + dx]
                        term = w * plane
                        acc = term if acc is None else acc + term

            # Folded BatchNorm + ReLU, one dense store of the activation chunk.
            act_ref[...] = jnp.maximum(acc * scale_ref[cg] + shift_ref[cg], 0.0)

            # Row direction of the 3x3/stride-3 max-pool: three stride-3 sublane loads,
            # then ONE dense (rt_o, Wl) store per output channel.
            p0 = act_ref[pl.ds(0, rt_o, stride=3), :]
            p1 = act_ref[pl.ds(1, rt_o, stride=3), :]
            p2 = act_ref[pl.ds(2, rt_o, stride=3), :]
            out_ref[0, co, chunk * rt_o:(chunk + 1) * rt_o, :] = (
                jnp.maximum(jnp.maximum(p0, p1), p2))


def conv_bn_relu_pool(x_nchw, w_oihw, conv_b, gamma, beta, mean, var,
                      *, co_blk=None, max_row_tile=48):
    """Fused conv3x3(pad1) + BN(eval) + ReLU + maxpool3x3/3.  NCHW in, NCHW out."""
    B, Cin, H, W = x_nchw.shape
    Cout = w_oihw.shape[0]
    if co_blk is None:
        co_blk = Cout                       # 8 for layer 1, 16 for layer 2
    assert H % 3 == 0 and W % 3 == 0 and Cout % co_blk == 0
    Ho = H // 3
    Hp = H + 2
    Wl = _round_up(W + 2, 128)              # lane-dense width (multiple of 128)

    # Row-chunk size (multiple of 3, divides H): bounds the vreg accumulator & unroll.
    rt = 3
    for cand in range(min(H, max_row_tile), 2, -1):
        if cand % 3 == 0 and H % cand == 0:
            rt = cand
            break

    # Single zero-padded copy (spatial pad 1 + lane padding); no dx pre-shifted copies.
    xw = jnp.pad(x_nchw.astype(jnp.float32),
                 ((0, 0), (0, 0), (1, 1), (1, Wl - 1 - W)))       # (B, Cin, Hp, Wl)

    wf = w_oihw.astype(jnp.float32).reshape(-1)                   # (Cout*Cin*9,)
    scale = (gamma / jnp.sqrt(var + _EPS)).astype(jnp.float32)
    shift = (beta + (conv_b - mean) * scale).astype(jnp.float32)

    kernel = functools.partial(_conv_bn_relu_rowpool_kernel,
                               H=H, rt=rt, cin=Cin, co_blk=co_blk)
    block_bytes = 4 * (2 * Cin * Hp * Wl            # double-buffered input block
                       + 2 * co_blk * Ho * Wl       # double-buffered output block
                       + 2 * Cin * (rt + 2) * Wl    # rolled-plane scratch
                       + rt * Wl)                   # activation scratch

    out = pl.pallas_call(
        kernel,
        grid=(B, Cout // co_blk),
        in_specs=[
            pl.BlockSpec(memory_space=pltpu.MemorySpace.SMEM),            # weights
            pl.BlockSpec(memory_space=pltpu.MemorySpace.SMEM),            # BN scale
            pl.BlockSpec(memory_space=pltpu.MemorySpace.SMEM),            # BN shift
            pl.BlockSpec((1, Cin, Hp, Wl), lambda b, cb: (b, 0, 0, 0)),
        ],
        out_specs=pl.BlockSpec((1, co_blk, Ho, Wl), lambda b, cb: (b, cb, 0, 0)),
        out_shape=jax.ShapeDtypeStruct((B, Cout, Ho, Wl), jnp.float32),
        scratch_shapes=[pltpu.VMEM((2 * Cin, rt + 2, Wl), jnp.float32),
                        pltpu.VMEM((rt, Wl), jnp.float32)],
        compiler_params=pltpu.CompilerParams(
            dimension_semantics=("parallel", "parallel"),
            vmem_limit_bytes=_vmem_limit(block_bytes)),
    )(wf, scale, shift, xw)

    # Column direction of the 3x3/stride-3 max-pool: strided slices + max on the
    # row-reduced kernel output (cheap XLA ops); only lanes [0, W) are meaningful.
    return jnp.maximum(jnp.maximum(out[..., 0:W:3], out[..., 1:W:3]), out[..., 2:W:3])


def _fc_relu_kernel(x_ref, w_ref, b_ref, o_ref, acc_ref):
    k = pl.program_id(1)

    @pl.when(k == 0)
    def _():
        acc_ref[...] = jnp.zeros_like(acc_ref)

    acc_ref[...] += jnp.dot(x_ref[...], w_ref[...],
                            preferred_element_type=jnp.float32)

    @pl.when(k == pl.num_programs(1) - 1)
    def _():
        o_ref[...] = jnp.maximum(acc_ref[...] + b_ref[...], 0.0)


def fc_relu(x, w_t, b, *, max_tk=8192, tn=256):
    """K-tiled, N-parallel (B,K)@(K,N) + bias + ReLU; bf16 streams, f32 accumulation."""
    B, K = x.shape
    N = w_t.shape[1]
    assert K % 128 == 0, "FC in-features must be a multiple of 128"
    tk = 128
    for cand in range(min(K, max_tk), 127, -128):   # largest multiple-of-128 divisor
        if K % cand == 0:
            tk = cand
            break
    if N % tn != 0:
        tn = N
    return pl.pallas_call(
        _fc_relu_kernel,
        grid=(N // tn, K // tk),
        in_specs=[
            pl.BlockSpec((B, tk), lambda n, k: (0, k)),
            pl.BlockSpec((tk, tn), lambda n, k: (k, n)),
            pl.BlockSpec((1, tn), lambda n, k: (0, n)),
        ],
        out_specs=pl.BlockSpec((B, tn), lambda n, k: (0, n)),
        out_shape=jax.ShapeDtypeStruct((B, N), jnp.float32),
        scratch_shapes=[pltpu.VMEM((B, tn), jnp.float32)],
        compiler_params=pltpu.CompilerParams(
            dimension_semantics=("parallel", "arbitrary")),
    )(x, w_t, b.reshape(1, N).astype(jnp.float32))


def attention_cnn_forward(x_nchw, p):
    B = x_nchw.shape[0]
    y = conv_bn_relu_pool(x_nchw, p["w1"], p["b1"], p["g1"], p["beta1"], p["m1"], p["v1"])
    y = conv_bn_relu_pool(y, p["w2"], p["b2"], p["g2"], p["beta2"], p["m2"], p["v2"])
    flat = y.reshape(B, -1)          # kernels emit NCHW, so this matches torch's reshape
    # Dropout (p=0.4) is the identity in eval mode.
    # bf16 streams for the HBM-bandwidth-bound FC; accumulation stays f32 in-kernel.
    return fc_relu(flat.astype(jnp.bfloat16),
                   p["wfc_t"].astype(jnp.bfloat16), p["bfc"])


def init_params(key, num_heads, seq_len):
    hf = seq_len // 9
    # Original module hard-codes fc in-features = 16*56*56 (i.e. seq_len = 504);
    # generalised here to 16*(seq_len//9)^2 so a small spatial size can be used.
    fc_in = 16 * hf * hf
    ks = jax.random.split(key, 14)
    n = lambda k, s, sc: sc * jax.random.normal(k, s, jnp.float32)
    return {
        "w1": n(ks[0], (8, num_heads, 3, 3), 0.2),
        "b1": n(ks[1], (8,), 0.1),
        "g1": 1.0 + n(ks[2], (8,), 0.1),
        "beta1": n(ks[3], (8,), 0.1),
        "m1": n(ks[4], (8,), 0.1),
        "v1": jax.random.uniform(ks[5], (8,), jnp.float32, 0.5, 1.5),
        "w2": n(ks[6], (16, 8, 3, 3), 0.2),
        "b2": n(ks[7], (16,), 0.1),
        "g2": 1.0 + n(ks[8], (16,), 0.1),
        "beta2": n(ks[9], (16,), 0.1),
        "m2": n(ks[10], (16,), 0.1),
        "v2": jax.random.uniform(ks[11], (16,), jnp.float32, 0.5, 1.5),
        "wfc_t": n(ks[12], (fc_in, 512), 0.05),   # = torch fc1.weight.T
        "bfc": n(ks[13], (512,), 0.05),
    }


def reference_forward(x, p):
    """Pure-JAX (XLA) reference reproducing the PyTorch forward in eval mode."""
    def block(x, w, b, g, beta, m, v):
        y = lax.conv_general_dilated(
            x, w, (1, 1), ((1, 1), (1, 1)),
            dimension_numbers=("NCHW", "OIHW", "NCHW"), precision=_PREC)
        y = y + b[None, :, None, None]
        y = (y - m[None, :, None, None]) / jnp.sqrt(v[None, :, None, None] + _EPS)
        y = y * g[None, :, None, None] + beta[None, :, None, None]
        y = jnp.maximum(y, 0.0)
        return lax.reduce_window(y, -jnp.inf, lax.max,
                                 (1, 1, 3, 3), (1, 1, 3, 3), "VALID")
    y = block(x, p["w1"], p["b1"], p["g1"], p["beta1"], p["m1"], p["v1"])
    y = block(y, p["w2"], p["b2"], p["g2"], p["beta2"], p["m2"], p["v2"])
    flat = y.reshape(y.shape[0], -1)
    return jnp.maximum(jnp.dot(flat, p["wfc_t"], precision=_PREC) + p["bfc"], 0.0)


if __name__ == "__main__":
    B, NUM_HEADS, SEQ = 2, 4, 36     # small shapes; original module implies SEQ = 504
    key = jax.random.PRNGKey(0)
    kp, kx = jax.random.split(key)
    params = init_params(kp, NUM_HEADS, SEQ)
    # Multi-head self-attention weights: each row is a softmax distribution.
    x = jax.nn.softmax(
        jax.random.normal(kx, (B, NUM_HEADS, SEQ, SEQ), jnp.float32), axis=-1)

    out = jax.jit(attention_cnn_forward)(x, params)
    out = jax.block_until_ready(out)
    assert out.shape == (B, 512) and out.dtype == jnp.float32

    ref = reference_forward(x, params)
    np.testing.assert_allclose(np.asarray(out), np.asarray(ref), rtol=2e-2, atol=2e-2)
    print("KERNEL_OK")
</pallas_src>

<mosaic_0001>
module attributes {stable_mosaic.version = 11 : i64} {
  func.func @_conv_bn_relu_rowpool_kernel(%arg0: i32, %arg1: i32, %arg2: memref<288xf32, #tpu.memory_space<smem>>, %arg3: memref<8xf32, #tpu.memory_space<smem>>, %arg4: memref<8xf32, #tpu.memory_space<smem>>, %arg5: memref<1x4x38x128xf32, #tpu.memory_space<vmem>>, %arg6: memref<1x8x12x128xf32, #tpu.memory_space<vmem>>, %arg7: memref<8x38x128xf32, #tpu.memory_space<vmem>>, %arg8: memref<36x128xf32, #tpu.memory_space<vmem>>) attributes {dimension_semantics = [#tpu.dimension_semantics<parallel>, #tpu.dimension_semantics<parallel>], iteration_bounds = array<i64: 2, 1>, scalar_prefetch = 0 : i64, scratch_operands = 2 : i64, tpu.core_type = #tpu.core_type<tc>, window_params = [{transform_indices = @transform_0, window_bounds = array<i64: 288>}, {transform_indices = @transform_1, window_bounds = array<i64: 8>}, {transform_indices = @transform_2, window_bounds = array<i64: 8>}, {transform_indices = @transform_3, window_bounds = array<i64: 1, 4, 38, 128>}, {transform_indices = @transform_4, window_bounds = array<i64: 1, 8, 12, 128>}]} {
    %c0 = arith.constant 0 : index
    %c0_0 = arith.constant 0 : index
    %c0_1 = arith.constant 0 : index
    %c0_2 = arith.constant 0 : index
    %0 = vector.load %arg5[%c0, %c0_0, %c0_1, %c0_2] : memref<1x4x38x128xf32, #tpu.memory_space<vmem>>, vector<1x1x38x128xf32>
    %1 = vector.shape_cast %0 : vector<1x1x38x128xf32> to vector<38x128xf32>
    %c127_i32 = arith.constant 127 : i32
    %2 = tpu.dynamic_rotate %1 by %c127_i32 dim 1 : vector<38x128xf32>, i32 -> vector<38x128xf32>
    %c0_3 = arith.constant 0 : index
    %c0_4 = arith.constant 0 : index
    %c0_5 = arith.constant 0 : index
    %3 = vector.load %arg7[%c0_3, %c0_4, %c0_5] : memref<8x38x128xf32, #tpu.memory_space<vmem>>, vector<1x38x128xf32>
    %4 = vector.shape_cast %3 : vector<1x38x128xf32> to vector<38x128xf32>
    %5 = vector.shape_cast %2 : vector<38x128xf32> to vector<1x38x128xf32>
    tpu.vector_store %arg7[%c0_3, %c0_4, %c0_5], %5 {strides = array<i32>} : memref<8x38x128xf32, #tpu.memory_space<vmem>>, vector<1x38x128xf32>,
    %c0_6 = arith.constant 0 : index
    %c1 = arith.constant 1 : index
    %c0_7 = arith.constant 0 : index
    %c0_8 = arith.constant 0 : index
    %6 = vector.load %arg5[%c0_6, %c1, %c0_7, %c0_8] : memref<1x4x38x128xf32, #tpu.memory_space<vmem>>, vector<1x1x38x128xf32>
    %7 = vector.shape_cast %6 : vector<1x1x38x128xf32> to vector<38x128xf32>
    %c127_i32_9 = arith.constant 127 : i32
    %8 = tpu.dynamic_rotate %7 by %c127_i32_9 dim 1 : vector<38x128xf32>, i32 -> vector<38x128xf32>
    %c1_10 = arith.constant 1 : index
    %c0_11 = arith.constant 0 : index
    %c0_12 = arith.constant 0 : index
    %9 = vector.load %arg7[%c1_10, %c0_11, %c0_12] : memref<8x38x128xf32, #tpu.memory_space<vmem>>, vector<1x38x128xf32>
    %10 = vector.shape_cast %9 : vector<1x38x128xf32> to vector<38x128xf32>
    %11 = vector.shape_cast %8 : vector<38x128xf32> to vector<1x38x128xf32>
    tpu.vector_store %arg7[%c1_10, %c0_11, %c0_12], %11 {strides = array<i32>} : memref<8x38x128xf32, #tpu.memory_space<vmem>>, vector<1x38x128xf32>,
    %c0_13 = arith.constant 0 : index
    %c2 = arith.constant 2 : index
    %c0_14 = arith.constant 0 : index
    %c0_15 = arith.constant 0 : index
    %12 = vector.load %arg5[%c0_13, %c2, %c0_14, %c0_15] : memref<1x4x38x128xf32, #tpu.memory_space<vmem>>, vector<1x1x38x128xf32>
    %13 = vector.shape_cast %12 : vector<1x1x38x128xf32> to vector<38x128xf32>
    %c127_i32_16 = arith.constant 127 : i32
    %14 = tpu.dynamic_rotate %13 by %c127_i32_16 dim 1 : vector<38x128xf32>, i32 -> vector<38x128xf32>
    %c2_17 = arith.constant 2 : index
    %c0_18 = arith.constant 0 : index
    %c0_19 = arith.constant 0 : index
    %15 = vector.load %arg7[%c2_17, %c0_18, %c0_19] : memref<8x38x128xf32, #tpu.memory_space<vmem>>, vector<1x38x128xf32>
    %16 = vector.shape_cast %15 : vector<1x38x128xf32> to vector<38x128xf32>
    %17 = vector.shape_cast %14 : vector<38x128xf32> to vector<1x38x128xf32>
    tpu.vector_store %arg7[%c2_17, %c0_18, %c0_19], %17 {strides = array<i32>} : memref<8x38x128xf32, #tpu.memory_space<vmem>>, vector<1x38x128xf32>,
    %c0_20 = arith.constant 0 : index
    %c3 = arith.constant 3 : index
    %c0_21 = arith.constant 0 : index
    %c0_22 = arith.constant 0 : index
    %18 = vector.load %arg5[%c0_20, %c3, %c0_21, %c0_22] : memref<1x4x38x128xf32, #tpu.memory_space<vmem>>, vector<1x1x38x128xf32>
    %19 = vector.shape_cast %18 : vector<1x1x38x128xf32> to vector<38x128xf32>
    %c127_i32_23 = arith.constant 127 : i32
    %20 = tpu.dynamic_rotate %19 by %c127_i32_23 dim 1 : vector<38x128xf32>, i32 -> vector<38x128xf32>
    %c3_24 = arith.constant 3 : index
    %c0_25 = arith.constant 0 : index
    %c0_26 = arith.constant 0 : index
    %21 = vector.load %arg7[%c3_24, %c0_25, %c0_26] : memref<8x38x128xf32, #tpu.memory_space<vmem>>, vector<1x38x128xf32>
    %22 = vector.shape_cast %21 : vector<1x38x128xf32> to vector<38x128xf32>
    %23 = vector.shape_cast %20 : vector<38x128xf32> to vector<1x38x128xf32>
    tpu.vector_store %arg7[%c3_24, %c0_25, %c0_26], %23 {strides = array<i32>} : memref<8x38x128xf32, #tpu.memory_space<vmem>>, vector<1x38x128xf32>,
    %c0_27 = arith.constant 0 : index
    %c0_28 = arith.constant 0 : index
    %c0_29 = arith.constant 0 : index
    %c0_30 = arith.constant 0 : index
    %24 = vector.load %arg5[%c0_27, %c0_28, %c0_29, %c0_30] : memref<1x4x38x128xf32, #tpu.memory_space<vmem>>, vector<1x1x38x128xf32>
    %25 = vector.shape_cast %24 : vector<1x1x38x128xf32> to vector<38x128xf32>
    %c126_i32 = arith.constant 126 : i32
    %26 = tpu.dynamic_rotate %25 by %c126_i32 dim 1 : vector<38x128xf32>, i32 -> vector<38x128xf32>
    %c4 = arith.constant 4 : index
    %c0_31 = arith.constant 0 : index
    %c0_32 = arith.constant 0 : index
    %27 = vector.load %arg7[%c4, %c0_31, %c0_32] : memref<8x38x128xf32, #tpu.memory_space<vmem>>, vector<1x38x128xf32>
    %28 = vector.shape_cast %27 : vector<1x38x128xf32> to vector<38x128xf32>
    %29 = vector.shape_cast %26 : vector<38x128xf32> to vector<1x38x128xf32>
    tpu.vector_store %arg7[%c4, %c0_31, %c0_32], %29 {strides = array<i32>} : memref<8x38x128xf32, #tpu.memory_space<vmem>>, vector<1x38x128xf32>,
    %c0_33 = arith.constant 0 : index
    %c1_34 = arith.constant 1 : index
    %c0_35 = arith.constant 0 : index
    %c0_36 = arith.constant 0 : index
    %30 = vector.load %arg5[%c0_33, %c1_34, %c0_35, %c0_36] : memref<1x4x38x128xf32, #tpu.memory_space<vmem>>, vector<1x1x38x128xf32>
    %31 = vector.shape_cast %30 : vector<1x1x38x128xf32> to vector<38x128xf32>
    %c126_i32_37 = arith.constant 126 : i32
    %32 = tpu.dynamic_rotate %31 by %c126_i32_37 dim 1 : vector<38x128xf32>, i32 -> vector<38x128xf32>
    %c5 = arith.constant 5 : index
    %c0_38 = arith.constant 0 : index
    %c0_39 = arith.constant 0 : index
    %33 = vector.load %arg7[%c5, %c0_38, %c0_39] : memref<8x38x128xf32, #tpu.memory_space<vmem>>, vector<1x38x128xf32>
    %34 = vector.shape_cast %33 : vector<1x38x128xf32> to vector<38x128xf32>
    %35 = vector.shape_cast %32 : vector<38x128xf32> to vector<1x38x128xf32>
    tpu.vector_store %arg7[%c5, %c0_38, %c0_39], %35 {strides = array<i32>} : memref<8x38x128xf32, #tpu.memory_space<vmem>>, vector<1x38x128xf32>,
    %c0_40 = arith.constant 0 : index
    %c2_41 = arith.constant 2 : index
    %c0_42 = arith.constant 0 : index
    %c0_43 = arith.constant 0 : index
    %36 = vector.load %arg5[%c0_40, %c2_41, %c0_42, %c0_43] : memref<1x4x38x128xf32, #tpu.memory_space<vmem>>, vector<1x1x38x128xf32>
    %37 = vector.shape_cast %36 : vector<1x1x38x128xf32> to vector<38x128xf32>
    %c126_i32_44 = arith.constant 126 : i32
    %38 = tpu.dynamic_rotate %37 by %c126_i32_44 dim 1 : vector<38x128xf32>, i32 -> vector<38x128xf32>
    %c6 = arith.constant 6 : index
    %c0_45 = arith.constant 0 : index
    %c0_46 = arith.constant 0 : index
    %39 = vector.load %arg7[%c6, %c0_45, %c0_46] : memref<8x38x128xf32, #tpu.memory_space<vmem>>, vector<1x38x128xf32>
    %40 = vector.shape_cast %39 : vector<1x38x128xf32> to vector<38x128xf32>
    %41 = vector.shape_cast %38 : vector<38x128xf32> to vector<1x38x128xf32>
    tpu.vector_store %arg7[%c6, %c0_45, %c0_46], %41 {strides = array<i32>} : memref<8x38x128xf32, #tpu.memory_space<vmem>>, vector<1x38x128xf32>,
    %c0_47 = arith.constant 0 : index
    %c3_48 = arith.constant 3 : index
    %c0_49 = arith.constant 0 : index
    %c0_50 = arith.constant 0 : index
    %42 = vector.load %arg5[%c0_47, %c3_48, %c0_49, %c0_50] : memref<1x4x38x128xf32, #tpu.memory_space<vmem>>, vector<1x1x38x128xf32>
    %43 = vector.shape_cast %42 : vector<1x1x38x128xf32> to vector<38x128xf32>
    %c126_i32_51 = arith.constant 126 : i32
    %44 = tpu.dynamic_rotate %43 by %c126_i32_51 dim 1 : vector<38x128xf32>, i32 -> vector<38x128xf32>
    %c7 = arith.constant 7 : index
    %c0_52 = arith.constant 0 : index
    %c0_53 = arith.constant 0 : index
    %45 = vector.load %arg7[%c7, %c0_52, %c0_53] : memref<8x38x128xf32, #tpu.memory_space<vmem>>, vector<1x38x128xf32>
    %46 = vector.shape_cast %45 : vector<1x38x128xf32> to vector<38x128xf32>
    %47 = vector.shape_cast %44 : vector<38x128xf32> to vector<1x38x128xf32>
    tpu.vector_store %arg7[%c7, %c0_52, %c0_53], %47 {strides = array<i32>} : memref<8x38x128xf32, #tpu.memory_space<vmem>>, vector<1x38x128xf32>,
    %c0_i32 = arith.constant 0 : i32
    %c8_i32 = arith.constant 8 : i32
    %48 = arith.addi %c0_i32, %c8_i32 : i32
    %c1_i32 = arith.constant 1 : i32
    scf.for %arg9 = %c0_i32 to %48 step %c1_i32  : i32 {
      %c1_i32_55 = arith.constant 1 : i32
      %49 = arith.muli %arg9, %c1_i32_55 : i32
      %c0_i32_56 = arith.constant 0 : i32
      %50 = arith.addi %c0_i32_56, %49 : i32
      %c8_i32_57 = arith.constant 8 : i32
      %51 = arith.muli %arg1, %c8_i32_57 : i32
      %52 = arith.addi %51, %50 : i32
      %c0_58 = arith.constant 0 : index
      %c0_59 = arith.constant 0 : index
      %c0_60 = arith.constant 0 : index
      %c0_61 = arith.constant 0 : index
      %53 = vector.load %arg5[%c0_58, %c0_59, %c0_60, %c0_61] : memref<1x4x38x128xf32, #tpu.memory_space<vmem>>, vector<1x1x36x128xf32>
      %54 = vector.shape_cast %53 : vector<1x1x36x128xf32> to vector<36x128xf32>
      %c4_i32 = arith.constant 4 : i32
      %55 = arith.muli %52, %c4_i32 : i32
      %c0_i32_62 = arith.constant 0 : i32
      %56 = arith.addi %55, %c0_i32_62 : i32
      %c9_i32 = arith.constant 9 : i32
      %57 = arith.muli %56, %c9_i32 : i32
      %c0_i32_63 = arith.constant 0 : i32
      %58 = arith.addi %57, %c0_i32_63 : i32
      %c0_i32_64 = arith.constant 0 : i32
      %59 = arith.addi %58, %c0_i32_64 : i32
      %60 = arith.index_cast %59 : i32 to index
      %61 = memref.load %arg2[%60] : memref<288xf32, #tpu.memory_space<smem>>
      %62 = vector.broadcast %61 : f32 to vector<36x128xf32>
      %63 = arith.mulf %62, %54 : vector<36x128xf32>
      %c0_65 = arith.constant 0 : index
      %c1_66 = arith.constant 1 : index
      %c0_67 = arith.constant 0 : index
      %c0_68 = arith.constant 0 : index
      %64 = vector.load %arg5[%c0_65, %c1_66, %c0_67, %c0_68] : memref<1x4x38x128xf32, #tpu.memory_space<vmem>>, vector<1x1x36x128xf32>
      %65 = vector.shape_cast %64 : vector<1x1x36x128xf32> to vector<36x128xf32>
      %c4_i32_69 = arith.constant 4 : i32
      %66 = arith.muli %52, %c4_i32_69 : i32
      %c1_i32_70 = arith.constant 1 : i32
      %67 = arith.addi %66, %c1_i32_70 : i32
      %c9_i32_71 = arith.constant 9 : i32
      %68 = arith.muli %67, %c9_i32_71 : i32
      %c0_i32_72 = arith.constant 0 : i32
      %69 = arith.addi %68, %c0_i32_72 : i32
      %c0_i32_73 = arith.constant 0 : i32
      %70 = arith.addi %69, %c0_i32_73 : i32
      %71 = arith.index_cast %70 : i32 to index
      %72 = memref.load %arg2[%71] : memref<288xf32, #tpu.memory_space<smem>>
      %73 = vector.broadcast %72 : f32 to vector<36x128xf32>
      %74 = arith.mulf %73, %65 : vector<36x128xf32>
      %75 = arith.addf %63, %74 : vector<36x128xf32>
      %c0_74 = arith.constant 0 : index
      %c2_75 = arith.constant 2 : index
      %c0_76 = arith.constant 0 : index
      %c0_77 = arith.constant 0 : index
      %76 = vector.load %arg5[%c0_74, %c2_75, %c0_76, %c0_77] : memref<1x4x38x128xf32, #tpu.memory_space<vmem>>, vector<1x1x36x128xf32>
      %77 = vector.shape_cast %76 : vector<1x1x36x128xf32> to vector<36x128xf32>
      %c4_i32_78 = arith.constant 4 : i32
      %78 = arith.muli %52, %c4_i32_78 : i32
      %c2_i32 = arith.constant 2 : i32
      %79 = arith.addi %78, %c2_i32 : i32
      %c9_i32_79 = arith.constant 9 : i32
      %80 = arith.muli %79, %c9_i32_79 : i32
      %c0_i32_80 = arith.constant 0 : i32
      %81 = arith.addi %80, %c0_i32_80 : i32
      %c0_i32_81 = arith.constant 0 : i32
      %82 = arith.addi %81, %c0_i32_81 : i32
      %83 = arith.index_cast %82 : i32 to index
      %84 = memref.load %arg2[%83] : memref<288xf32, #tpu.memory_space<smem>>
      %85 = vector.broadcast %84 : f32 to vector<36x128xf32>
      %86 = arith.mulf %85, %77 : vector<36x128xf32>
      %87 = arith.addf %75, %86 : vector<36x128xf32>
      %c0_82 = arith.constant 0 : index
      %c3_83 = arith.constant 3 : index
      %c0_84 = arith.constant 0 : index
      %c0_85 = arith.constant 0 : index
      %88 = vector.load %arg5[%c0_82, %c3_83, %c0_84, %c0_85] : memref<1x4x38x128xf32, #tpu.memory_space<vmem>>, vector<1x1x36x128xf32>
      %89 = vector.shape_cast %88 : vector<1x1x36x128xf32> to vector<36x128xf32>
      %c4_i32_86 = arith.constant 4 : i32
      %90 = arith.muli %52, %c4_i32_86 : i32
      %c3_i32 = arith.constant 3 : i32
      %91 = arith.addi %90, %c3_i32 : i32
      %c9_i32_87 = arith.constant 9 : i32
      %92 = arith.muli %91, %c9_i32_87 : i32
      %c0_i32_88 = arith.constant 0 : i32
      %93 = arith.addi %92, %c0_i32_88 : i32
      %c0_i32_89 = arith.constant 0 : i32
      %94 = arith.addi %93, %c0_i32_89 : i32
      %95 = arith.index_cast %94 : i32 to index
      %96 = memref.load %arg2[%95] : memref<288xf32, #tpu.memory_space<smem>>
      %97 = vector.broadcast %96 : f32 to vector<36x128xf32>
      %98 = arith.mulf %97, %89 : vector<36x128xf32>
      %99 = arith.addf %87, %98 : vector<36x128xf32>
      %c0_90 = arith.constant 0 : index
      %c0_91 = arith.constant 0 : index
      %c0_92 = arith.constant 0 : index
      %100 = vector.load %arg7[%c0_90, %c0_91, %c0_92] : memref<8x38x128xf32, #tpu.memory_space<vmem>>, vector<1x36x128xf32>
      %101 = vector.shape_cast %100 : vector<1x36x128xf32> to vector<36x128xf32>
      %c4_i32_93 = arith.constant 4 : i32
      %102 = arith.muli %52, %c4_i32_93 : i32
      %c0_i32_94 = arith.constant 0 : i32
      %103 = arith.addi %102, %c0_i32_94 : i32
      %c9_i32_95 = arith.constant 9 : i32
      %104 = arith.muli %103, %c9_i32_95 : i32
      %c0_i32_96 = arith.constant 0 : i32
      %105 = arith.addi %104, %c0_i32_96 : i32
      %c1_i32_97 = arith.constant 1 : i32
      %106 = arith.addi %105, %c1_i32_97 : i32
      %107 = arith.index_cast %106 : i32 to index
      %108 = memref.load %arg2[%107] : memref<288xf32, #tpu.memory_space<smem>>
      %109 = vector.broadcast %108 : f32 to vector<36x128xf32>
      %110 = arith.mulf %109, %101 : vector<36x128xf32>
      %111 = arith.addf %99, %110 : vector<36x128xf32>
      %c1_98 = arith.constant 1 : index
      %c0_99 = arith.constant 0 : index
      %c0_100 = arith.constant 0 : index
      %112 = vector.load %arg7[%c1_98, %c0_99, %c0_100] : memref<8x38x128xf32, #tpu.memory_space<vmem>>, vector<1x36x128xf32>
      %113 = vector.shape_cast %112 : vector<1x36x128xf32> to vector<36x128xf32>
      %c4_i32_101 = arith.constant 4 : i32
      %114 = arith.muli %52, %c4_i32_101 : i32
      %c1_i32_102 = arith.constant 1 : i32
      %115 = arith.addi %114, %c1_i32_102 : i32
      %c9_i32_103 = arith.constant 9 : i32
      %116 = arith.muli %115, %c9_i32_103 : i32
      %c0_i32_104 = arith.constant 0 : i32
      %117 = arith.addi %116, %c0_i32_104 : i32
      %c1_i32_105 = arith.constant 1 : i32
      %118 = arith.addi %117, %c1_i32_105 : i32
      %119 = arith.index_cast %118 : i32 to index
      %120 = memref.load %arg2[%119] : memref<288xf32, #tpu.memory_space<smem>>
      %121 = vector.broadcast %120 : f32 to vector<36x128xf32>
      %122 = arith.mulf %121, %113 : vector<36x128xf32>
      %123 = arith.addf %111, %122 : vector<36x128xf32>
      %c2_106 = arith.constant 2 : index
      %c0_107 = arith.constant 0 : index
      %c0_108 = arith.constant 0 : index
      %124 = vector.load %arg7[%c2_106, %c0_107, %c0_108] : memref<8x38x128xf32, #tpu.memory_space<vmem>>, vector<1x36x128xf32>
      %125 = vector.shape_cast %124 : vector<1x36x128xf32> to vector<36x128xf32>
      %c4_i32_109 = arith.constant 4 : i32
      %126 = arith.muli %52, %c4_i32_109 : i32
      %c2_i32_110 = arith.constant 2 : i32
      %127 = arith.addi %126, %c2_i32_110 : i32
      %c9_i32_111 = arith.constant 9 : i32
      %128 = arith.muli %127, %c9_i32_111 : i32
      %c0_i32_112 = arith.constant 0 : i32
      %129 = arith.addi %128, %c0_i32_112 : i32
      %c1_i32_113 = arith.constant 1 : i32
      %130 = arith.addi %129, %c1_i32_113 : i32
      %131 = arith.index_cast %130 : i32 to index
      %132 = memref.load %arg2[%131] : memref<288xf32, #tpu.memory_space<smem>>
      %133 = vector.broadcast %132 : f32 to vector<36x128xf32>
      %134 = arith.mulf %133, %125 : vector<36x128xf32>
      %135 = arith.addf %123, %134 : vector<36x128xf32>
      %c3_114 = arith.constant 3 : index
      %c0_115 = arith.constant 0 : index
      %c0_116 = arith.constant 0 : index
      %136 = vector.load %arg7[%c3_114, %c0_115, %c0_116] : memref<8x38x128xf32, #tpu.memory_space<vmem>>, vector<1x36x128xf32>
      %137 = vector.shape_cast %136 : vector<1x36x128xf32> to vector<36x128xf32>
      %c4_i32_117 = arith.constant 4 : i32
      %138 = arith.muli %52, %c4_i32_117 : i32
      %c3_i32_118 = arith.constant 3 : i32
      %139 = arith.addi %138, %c3_i32_118 : i32
      %c9_i32_119 = arith.constant 9 : i32
      %140 = arith.muli %139, %c9_i32_119 : i32
      %c0_i32_120 = arith.constant 0 : i32
      %141 = arith.addi %140, %c0_i32_120 : i32
      %c1_i32_121 = arith.constant 1 : i32
      %142 = arith.addi %141, %c1_i32_121 : i32
      %143 = arith.index_cast %142 : i32 to index
      %144 = memref.load %arg2[%143] : memref<288xf32, #tpu.memory_space<smem>>
      %145 = vector.broadcast %144 : f32 to vector<36x128xf32>
      %146 = arith.mulf %145, %137 : vector<36x128xf32>
      %147 = arith.addf %135, %146 : vector<36x128xf32>
      %c4_122 = arith.constant 4 : index
      %c0_123 = arith.constant 0 : index
      %c0_124 = arith.constant 0 : index
      %148 = vector.load %arg7[%c4_122, %c0_123, %c0_124] : memref<8x38x128xf32, #tpu.memory_space<vmem>>, vector<1x36x128xf32>
      %149 = vector.shape_cast %148 : vector<1x36x128xf32> to vector<36x128xf32>
      %c4_i32_125 = arith.constant 4 : i32
      %150 = arith.muli %52, %c4_i32_125 : i32
      %c0_i32_126 = arith.constant 0 : i32
      %151 = arith.addi %150, %c0_i32_126 : i32
      %c9_i32_127 = arith.constant 9 : i32
      %152 = arith.muli %151, %c9_i32_127 : i32
      %c0_i32_128 = arith.constant 0 : i32
      %153 = arith.addi %152, %c0_i32_128 : i32
      %c2_i32_129 = arith.constant 2 : i32
      %154 = arith.addi %153, %c2_i32_129 : i32
      %155 = arith.index_cast %154 : i32 to index
      %156 = memref.load %arg2[%155] : memref<288xf32, #tpu.memory_space<smem>>
      %157 = vector.broadcast %156 : f32 to vector<36x128xf32>
      %158 = arith.mulf %157, %149 : vector<36x128xf32>
      %159 = arith.addf %147, %158 : vector<36x128xf32>
      %c5_130 = arith.constant 5 : index
      %c0_131 = arith.constant 0 : index
      %c0_132 = arith.constant 0 : index
      %160 = vector.load %arg7[%c5_130, %c0_131, %c0_132] : memref<8x38x128xf32, #tpu.memory_space<vmem>>, vector<1x36x128xf32>
      %161 = vector.shape_cast %160 : vector<1x36x128xf32> to vector<36x128xf32>
      %c4_i32_133 = arith.constant 4 : i32
      %162 = arith.muli %52, %c4_i32_133 : i32
      %c1_i32_134 = arith.constant 1 : i32
      %163 = arith.addi %162, %c1_i32_134 : i32
      %c9_i32_135 = arith.constant 9 : i32
      %164 = arith.muli %163, %c9_i32_135 : i32
      %c0_i32_136 = arith.constant 0 : i32
      %165 = arith.addi %164, %c0_i32_136 : i32
      %c2_i32_137 = arith.constant 2 : i32
      %166 = arith.addi %165, %c2_i32_137 : i32
      %167 = arith.index_cast %166 : i32 to index
      %168 = memref.load %arg2[%167] : memref<288xf32, #tpu.memory_space<smem>>
      %169 = vector.broadcast %168 : f32 to vector<36x128xf32>
      %170 = arith.mulf %169, %161 : vector<36x128xf32>
      %171 = arith.addf %159, %170 : vector<36x128xf32>
      %c6_138 = arith.constant 6 : index
      %c0_139 = arith.constant 0 : index
      %c0_140 = arith.constant 0 : index
      %172 = vector.load %arg7[%c6_138, %c0_139, %c0_140] : memref<8x38x128xf32, #tpu.memory_space<vmem>>, vector<1x36x128xf32>
      %173 = vector.shape_cast %172 : vector<1x36x128xf32> to vector<36x128xf32>
      %c4_i32_141 = arith.constant 4 : i32
      %174 = arith.muli %52, %c4_i32_141 : i32
      %c2_i32_142 = arith.constant 2 : i32
      %175 = arith.addi %174, %c2_i32_142 : i32
      %c9_i32_143 = arith.constant 9 : i32
      %176 = arith.muli %175, %c9_i32_143 : i32
      %c0_i32_144 = arith.constant 0 : i32
      %177 = arith.addi %176, %c0_i32_144 : i32
      %c2_i32_145 = arith.constant 2 : i32
      %178 = arith.addi %177, %c2_i32_145 : i32
      %179 = arith.index_cast %178 : i32 to index
      %180 = memref.load %arg2[%179] : memref<288xf32, #tpu.memory_space<smem>>
      %181 = vector.broadcast %180 : f32 to vector<36x128xf32>
      %182 = arith.mulf %181, %173 : vector<36x128xf32>
      %183 = arith.addf %171, %182 : vector<36x128xf32>
      %c7_146 = arith.constant 7 : index
      %c0_147 = arith.constant 0 : index
      %c0_148 = arith.constant 0 : index
      %184 = vector.load %arg7[%c7_146, %c0_147, %c0_148] : memref<8x38x128xf32, #tpu.memory_space<vmem>>, vector<1x36x128xf32>
      %185 = vector.shape_cast %184 : vector<1x36x128xf32> to vector<36x128xf32>
      %c4_i32_149 = arith.constant 4 : i32
      %186 = arith.muli %52, %c4_i32_149 : i32
      %c3_i32_150 = arith.constant 3 : i32
      %187 = arith.addi %186, %c3_i32_150 : i32
      %c9_i32_151 = arith.constant 9 : i32
      %188 = arith.muli %187, %c9_i32_151 : i32
      %c0_i32_152 = arith.constant 0 : i32
      %189 = arith.addi %188, %c0_i32_152 : i32
      %c2_i32_153 = arith.constant 2 : i32
      %190 = arith.addi %189, %c2_i32_153 : i32
      %191 = arith.index_cast %190 : i32 to index
      %192 = memref.load %arg2[%191] : memref<288xf32, #tpu.memory_space<smem>>
      %193 = vector.broadcast %192 : f32 to vector<36x128xf32>
      %194 = arith.mulf %193, %185 : vector<36x128xf32>
      %195 = arith.addf %183, %194 : vector<36x128xf32>
      %c0_154 = arith.constant 0 : index
      %c0_155 = arith.constant 0 : index
      %c1_156 = arith.constant 1 : index
      %c0_157 = arith.constant 0 : index
      %196 = vector.load %arg5[%c0_154, %c0_155, %c1_156, %c0_157] : memref<1x4x38x128xf32, #tpu.memory_space<vmem>>, vector<1x1x36x128xf32>
      %197 = vector.shape_cast %196 : vector<1x1x36x128xf32> to vector<36x128xf32>
      %c4_i32_158 = arith.constant 4 : i32
      %198 = arith.muli %52, %c4_i32_158 : i32
      %c0_i32_159 = arith.constant 0 : i32
      %199 = arith.addi %198, %c0_i32_159 : i32
      %c9_i32_160 = arith.constant 9 : i32
      %200 = arith.muli %199, %c9_i32_160 : i32
      %c3_i32_161 = arith.constant 3 : i32
      %201 = arith.addi %200, %c3_i32_161 : i32
      %c0_i32_162 = arith.constant 0 : i32
      %202 = arith.addi %201, %c0_i32_162 : i32
      %203 = arith.index_cast %202 : i32 to index
      %204 = memref.load %arg2[%203] : memref<288xf32, #tpu.memory_space<smem>>
      %205 = vector.broadcast %204 : f32 to vector<36x128xf32>
      %206 = arith.mulf %205, %197 : vector<36x128xf32>
      %207 = arith.addf %195, %206 : vector<36x128xf32>
      %c0_163 = arith.constant 0 : index
      %c1_164 = arith.constant 1 : index
      %c1_165 = arith.constant 1 : index
      %c0_166 = arith.constant 0 : index
      %208 = vector.load %arg5[%c0_163, %c1_164, %c1_165, %c0_166] : memref<1x4x38x128xf32, #tpu.memory_space<vmem>>, vector<1x1x36x128xf32>
      %209 = vector.shape_cast %208 : vector<1x1x36x128xf32> to vector<36x128xf32>
      %c4_i32_167 = arith.constant 4 : i32
      %210 = arith.muli %52, %c4_i32_167 : i32
      %c1_i32_168 = arith.constant 1 : i32
      %211 = arith.addi %210, %c1_i32_168 : i32
      %c9_i32_169 = arith.constant 9 : i32
      %212 = arith.muli %211, %c9_i32_169 : i32
      %c3_i32_170 = arith.constant 3 : i32
      %213 = arith.addi %212, %c3_i32_170 : i32
      %c0_i32_171 = arith.constant 0 : i32
      %214 = arith.addi %213, %c0_i32_171 : i32
      %215 = arith.index_cast %214 : i32 to index
      %216 = memref.load %arg2[%215] : memref<288xf32, #tpu.memory_space<smem>>
      %217 = vector.broadcast %216 : f32 to vector<36x128xf32>
      %218 = arith.mulf %217, %209 : vector<36x128xf32>
      %219 = arith.addf %207, %218 : vector<36x128xf32>
      %c0_172 = arith.constant 0 : index
      %c2_173 = arith.constant 2 : index
      %c1_174 = arith.constant 1 : index
      %c0_175 = arith.constant 0 : index
      %220 = vector.load %arg5[%c0_172, %c2_173, %c1_174, %c0_175] : memref<1x4x38x128xf32, #tpu.memory_space<vmem>>, vector<1x1x36x128xf32>
      %221 = vector.shape_cast %220 : vector<1x1x36x128xf32> to vector<36x128xf32>
      %c4_i32_176 = arith.constant 4 : i32
      %222 = arith.muli %52, %c4_i32_176 : i32
      %c2_i32_177 = arith.constant 2 : i32
      %223 = arith.addi %222, %c2_i32_177 : i32
      %c9_i32_178 = arith.constant 9 : i32
      %224 = arith.muli %223, %c9_i32_178 : i32
      %c3_i32_179 = arith.constant 3 : i32
      %225 = arith.addi %224, %c3_i32_179 : i32
      %c0_i32_180 = arith.constant 0 : i32
      %226 = arith.addi %225, %c0_i32_180 : i32
      %227 = arith.index_cast %226 : i32 to index
      %228 = memref.load %arg2[%227] : memref<288xf32, #tpu.memory_space<smem>>
      %229 = vector.broadcast %228 : f32 to vector<36x128xf32>
      %230 = arith.mulf %229, %221 : vector<36x128xf32>
      %231 = arith.addf %219, %230 : vector<36x128xf32>
      %c0_181 = arith.constant 0 : index
      %c3_182 = arith.constant 3 : index
      %c1_183 = arith.constant 1 : index
      %c0_184 = arith.constant 0 : index
      %232 = vector.load %arg5[%c0_181, %c3_182, %c1_183, %c0_184] : memref<1x4x38x128xf32, #tpu.memory_space<vmem>>, vector<1x1x36x128xf32>
      %233 = vector.shape_cast %232 : vector<1x1x36x128xf32> to vector<36x128xf32>
      %c4_i32_185 = arith.constant 4 : i32
      %234 = arith.muli %52, %c4_i32_185 : i32
      %c3_i32_186 = arith.constant 3 : i32
      %235 = arith.addi %234, %c3_i32_186 : i32
      %c9_i32_187 = arith.constant 9 : i32
      %236 = arith.muli %235, %c9_i32_187 : i32
      %c3_i32_188 = arith.constant 3 : i32
      %237 = arith.addi %236, %c3_i32_188 : i32
      %c0_i32_189 = arith.constant 0 : i32
      %238 = arith.addi %237, %c0_i32_189 : i32
      %239 = arith.index_cast %238 : i32 to index
      %240 = memref.load %arg2[%239] : memref<288xf32, #tpu.memory_space<smem>>
      %241 = vector.broadcast %240 : f32 to vector<36x128xf32>
      %242 = arith.mulf %241, %233 : vector<36x128xf32>
      %243 = arith.addf %231, %242 : vector<36x128xf32>
      %c0_190 = arith.constant 0 : index
      %c1_191 = arith.constant 1 : index
      %c0_192 = arith.constant 0 : index
      %244 = vector.load %arg7[%c0_190, %c1_191, %c0_192] : memref<8x38x128xf32, #tpu.memory_space<vmem>>, vector<1x36x128xf32>
      %245 = vector.shape_cast %244 : vector<1x36x128xf32> to vector<36x128xf32>
      %c4_i32_193 = arith.constant 4 : i32
      %246 = arith.muli %52, %c4_i32_193 : i32
      %c0_i32_194 = arith.constant 0 : i32
      %247 = arith.addi %246, %c0_i32_194 : i32
      %c9_i32_195 = arith.constant 9 : i32
      %248 = arith.muli %247, %c9_i32_195 : i32
      %c3_i32_196 = arith.constant 3 : i32
      %249 = arith.addi %248, %c3_i32_196 : i32
      %c1_i32_197 = arith.constant 1 : i32
      %250 = arith.addi %249, %c1_i32_197 : i32
      %251 = arith.index_cast %250 : i32 to index
      %252 = memref.load %arg2[%251] : memref<288xf32, #tpu.memory_space<smem>>
      %253 = vector.broadcast %252 : f32 to vector<36x128xf32>
      %254 = arith.mulf %253, %245 : vector<36x128xf32>
      %255 = arith.addf %243, %254 : vector<36x128xf32>
      %c1_198 = arith.constant 1 : index
      %c1_199 = arith.constant 1 : index
      %c0_200 = arith.constant 0 : index
      %256 = vector.load %arg7[%c1_198, %c1_199, %c0_200] : memref<8x38x128xf32, #tpu.memory_space<vmem>>, vector<1x36x128xf32>
      %257 = vector.shape_cast %256 : vector<1x36x128xf32> to vector<36x128xf32>
      %c4_i32_201 = arith.constant 4 : i32
      %258 = arith.muli %52, %c4_i32_201 : i32
      %c1_i32_202 = arith.constant 1 : i32
      %259 = arith.addi %258, %c1_i32_202 : i32
      %c9_i32_203 = arith.constant 9 : i32
      %260 = arith.muli %259, %c9_i32_203 : i32
      %c3_i32_204 = arith.constant 3 : i32
      %261 = arith.addi %260, %c3_i32_204 : i32
      %c1_i32_205 = arith.constant 1 : i32
      %262 = arith.addi %261, %c1_i32_205 : i32
      %263 = arith.index_cast %262 : i32 to index
      %264 = memref.load %arg2[%263] : memref<288xf32, #tpu.memory_space<smem>>
      %265 = vector.broadcast %264 : f32 to vector<36x128xf32>
      %266 = arith.mulf %265, %257 : vector<36x128xf32>
      %267 = arith.addf %255, %266 : vector<36x128xf32>
      %c2_206 = arith.constant 2 : index
      %c1_207 = arith.constant 1 : index
      %c0_208 = arith.constant 0 : index
      %268 = vector.load %arg7[%c2_206, %c1_207, %c0_208] : memref<8x38x128xf32, #tpu.memory_space<vmem>>, vector<1x36x128xf32>
      %269 = vector.shape_cast %268 : vector<1x36x128xf32> to vector<36x128xf32>
      %c4_i32_209 = arith.constant 4 : i32
      %270 = arith.muli %52, %c4_i32_209 : i32
      %c2_i32_210 = arith.constant 2 : i32
      %271 = arith.addi %270, %c2_i32_210 : i32
      %c9_i32_211 = arith.constant 9 : i32
      %272 = arith.muli %271, %c9_i32_211 : i32
      %c3_i32_212 = arith.constant 3 : i32
      %273 = arith.addi %272, %c3_i32_212 : i32
      %c1_i32_213 = arith.constant 1 : i32
      %274 = arith.addi %273, %c1_i32_213 : i32
      %275 = arith.index_cast %274 : i32 to index
      %276 = memref.load %arg2[%275] : memref<288xf32, #tpu.memory_space<smem>>
      %277 = vector.broadcast %276 : f32 to vector<36x128xf32>
      %278 = arith.mulf %277, %269 : vector<36x128xf32>
      %279 = arith.addf %267, %278 : vector<36x128xf32>
      %c3_214 = arith.constant 3 : index
      %c1_215 = arith.constant 1 : index
      %c0_216 = arith.constant 0 : index
      %280 = vector.load %arg7[%c3_214, %c1_215, %c0_216] : memref<8x38x128xf32, #tpu.memory_space<vmem>>, vector<1x36x128xf32>
      %281 = vector.shape_cast %280 : vector<1x36x128xf32> to vector<36x128xf32>
      %c4_i32_217 = arith.constant 4 : i32
      %282 = arith.muli %52, %c4_i32_217 : i32
      %c3_i32_218 = arith.constant 3 : i32
      %283 = arith.addi %282, %c3_i32_218 : i32
      %c9_i32_219 = arith.constant 9 : i32
      %284 = arith.muli %283, %c9_i32_219 : i32
      %c3_i32_220 = arith.constant 3 : i32
      %285 = arith.addi %284, %c3_i32_220 : i32
      %c1_i32_221 = arith.constant 1 : i32
      %286 = arith.addi %285, %c1_i32_221 : i32
      %287 = arith.index_cast %286 : i32 to index
      %288 = memref.load %arg2[%287] : memref<288xf32, #tpu.memory_space<smem>>
      %289 = vector.broadcast %288 : f32 to vector<36x128xf32>
      %290 = arith.mulf %289, %281 : vector<36x128xf32>
      %291 = arith.addf %279, %290 : vector<36x128xf32>
      %c4_222 = arith.constant 4 : index
      %c1_223 = arith.constant 1 : index
      %c0_224 = arith.constant 0 : index
      %292 = vector.load %arg7[%c4_222, %c1_223, %c0_224] : memref<8x38x128xf32, #tpu.memory_space<vmem>>, vector<1x36x128xf32>
      %293 = vector.shape_cast %292 : vector<1x36x128xf32> to vector<36x128xf32>
      %c4_i32_225 = arith.constant 4 : i32
      %294 = arith.muli %52, %c4_i32_225 : i32
      %c0_i32_226 = arith.constant 0 : i32
      %295 = arith.addi %294, %c0_i32_226 : i32
      %c9_i32_227 = arith.constant 9 : i32
      %296 = arith.muli %295, %c9_i32_227 : i32
      %c3_i32_228 = arith.constant 3 : i32
      %297 = arith.addi %296, %c3_i32_228 : i32
      %c2_i32_229 = arith.constant 2 : i32
      %298 = arith.addi %297, %c2_i32_229 : i32
      %299 = arith.index_cast %298 : i32 to index
      %300 = memref.load %arg2[%299] : memref<288xf32, #tpu.memory_space<smem>>
      %301 = vector.broadcast %300 : f32 to vector<36x128xf32>
      %302 = arith.mulf %301, %293 : vector<36x128xf32>
      %303 = arith.addf %291, %302 : vector<36x128xf32>
      %c5_230 = arith.constant 5 : index
      %c1_231 = arith.constant 1 : index
      %c0_232 = arith.constant 0 : index
      %304 = vector.load %arg7[%c5_230, %c1_231, %c0_232] : memref<8x38x128xf32, #tpu.memory_space<vmem>>, vector<1x36x128xf32>
      %305 = vector.shape_cast %304 : vector<1x36x128xf32> to vector<36x128xf32>
      %c4_i32_233 = arith.constant 4 : i32
      %306 = arith.muli %52, %c4_i32_233 : i32
      %c1_i32_234 = arith.constant 1 : i32
      %307 = arith.addi %306, %c1_i32_234 : i32
      %c9_i32_235 = arith.constant 9 : i32
      %308 = arith.muli %307, %c9_i32_235 : i32
      %c3_i32_236 = arith.constant 3 : i32
      %309 = arith.addi %308, %c3_i32_236 : i32
      %c2_i32_237 = arith.constant 2 : i32
      %310 = arith.addi %309, %c2_i32_237 : i32
      %311 = arith.index_cast %310 : i32 to index
      %312 = memref.load %arg2[%311] : memref<288xf32, #tpu.memory_space<smem>>
      %313 = vector.broadcast %312 : f32 to vector<36x128xf32>
      %314 = arith.mulf %313, %305 : vector<36x128xf32>
      %315 = arith.addf %303, %314 : vector<36x128xf32>
      %c6_238 = arith.constant 6 : index
      %c1_239 = arith.constant 1 : index
      %c0_240 = arith.constant 0 : index
      %316 = vector.load %arg7[%c6_238, %c1_239, %c0_240] : memref<8x38x128xf32, #tpu.memory_space<vmem>>, vector<1x36x128xf32>
      %317 = vector.shape_cast %316 : vector<1x36x128xf32> to vector<36x128xf32>
      %c4_i32_241 = arith.constant 4 : i32
      %318 = arith.muli %52, %c4_i32_241 : i32
      %c2_i32_242 = arith.constant 2 : i32
      %319 = arith.addi %318, %c2_i32_242 : i32
      %c9_i32_243 = arith.constant 9 : i32
      %320 = arith.muli %319, %c9_i32_243 : i32
      %c3_i32_244 = arith.constant 3 : i32
      %321 = arith.addi %320, %c3_i32_244 : i32
      %c2_i32_245 = arith.constant 2 : i32
      %322 = arith.addi %321, %c2_i32_245 : i32
      %323 = arith.index_cast %322 : i32 to index
      %324 = memref.load %arg2[%323] : memref<288xf32, #tpu.memory_space<smem>>
      %325 = vector.broadcast %324 : f32 to vector<36x128xf32>
      %326 = arith.mulf %325, %317 : vector<36x128xf32>
      %327 = arith.addf %315, %326 : vector<36x128xf32>
      %c7_246 = arith.constant 7 : index
      %c1_247 = arith.constant 1 : index
      %c0_248 = arith.constant 0 : index
      %328 = vector.load %arg7[%c7_246, %c1_247, %c0_248] : memref<8x38x128xf32, #tpu.memory_space<vmem>>, vector<1x36x128xf32>
      %329 = vector.shape_cast %328 : vector<1x36x128xf32> to vector<36x128xf32>
      %c4_i32_249 = arith.constant 4 : i32
      %330 = arith.muli %52, %c4_i32_249 : i32
      %c3_i32_250 = arith.constant 3 : i32
      %331 = arith.addi %330, %c3_i32_250 : i32
      %c9_i32_251 = arith.constant 9 : i32
      %332 = arith.muli %331, %c9_i32_251 : i32
      %c3_i32_252 = arith.constant 3 : i32
      %333 = arith.addi %332, %c3_i32_252 : i32
      %c2_i32_253 = arith.constant 2 : i32
      %334 = arith.addi %333, %c2_i32_253 : i32
      %335 = arith.index_cast %334 : i32 to index
      %336 = memref.load %arg2[%335] : memref<288xf32, #tpu.memory_space<smem>>
      %337 = vector.broadcast %336 : f32 to vector<36x128xf32>
      %338 = arith.mulf %337, %329 : vector<36x128xf32>
      %339 = arith.addf %327, %338 : vector<36x128xf32>
      %c0_254 = arith.constant 0 : index
      %c0_255 = arith.constant 0 : index
      %c2_256 = arith.constant 2 : index
      %c0_257 = arith.constant 0 : index
      %340 = vector.load %arg5[%c0_254, %c0_255, %c2_256, %c0_257] : memref<1x4x38x128xf32, #tpu.memory_space<vmem>>, vector<1x1x36x128xf32>
      %341 = vector.shape_cast %340 : vector<1x1x36x128xf32> to vector<36x128xf32>
      %c4_i32_258 = arith.constant 4 : i32
      %342 = arith.muli %52, %c4_i32_258 : i32
      %c0_i32_259 = arith.constant 0 : i32
      %343 = arith.addi %342, %c0_i32_259 : i32
      %c9_i32_260 = arith.constant 9 : i32
      %344 = arith.muli %343, %c9_i32_260 : i32
      %c6_i32 = arith.constant 6 : i32
      %345 = arith.addi %344, %c6_i32 : i32
      %c0_i32_261 = arith.constant 0 : i32
      %346 = arith.addi %345, %c0_i32_261 : i32
      %347 = arith.index_cast %346 : i32 to index
      %348 = memref.load %arg2[%347] : memref<288xf32, #tpu.memory_space<smem>>
      %349 = vector.broadcast %348 : f32 to vector<36x128xf32>
      %350 = arith.mulf %349, %341 : vector<36x128xf32>
      %351 = arith.addf %339, %350 : vector<36x128xf32>
      %c0_262 = arith.constant 0 : index
      %c1_263 = arith.constant 1 : index
      %c2_264 = arith.constant 2 : index
      %c0_265 = arith.constant 0 : index
      %352 = vector.load %arg5[%c0_262, %c1_263, %c2_264, %c0_265] : memref<1x4x38x128xf32, #tpu.memory_space<vmem>>, vector<1x1x36x128xf32>
      %353 = vector.shape_cast %352 : vector<1x1x36x128xf32> to vector<36x128xf32>
      %c4_i32_266 = arith.constant 4 : i32
      %354 = arith.muli %52, %c4_i32_266 : i32
      %c1_i32_267 = arith.constant 1 : i32
      %355 = arith.addi %354, %c1_i32_267 : i32
      %c9_i32_268 = arith.constant 9 : i32
      %356 = arith.muli %355, %c9_i32_268 : i32
      %c6_i32_269 = arith.constant 6 : i32
      %357 = arith.addi %356, %c6_i32_269 : i32
      %c0_i32_270 = arith.constant 0 : i32
      %358 = arith.addi %357, %c0_i32_270 : i32
      %359 = arith.index_cast %358 : i32 to index
      %360 = memref.load %arg2[%359] : memref<288xf32, #tpu.memory_space<smem>>
      %361 = vector.broadcast %360 : f32 to vector<36x128xf32>
      %362 = arith.mulf %361, %353 : vector<36x128xf32>
      %363 = arith.addf %351, %362 : vector<36x128xf32>
      %c0_271 = arith.constant 0 : index
      %c2_272 = arith.constant 2 : index
      %c2_273 = arith.constant 2 : index
      %c0_274 = arith.constant 0 : index
      %364 = vector.load %arg5[%c0_271, %c2_272, %c2_273, %c0_274] : memref<1x4x38x128xf32, #tpu.memory_space<vmem>>, vector<1x1x36x128xf32>
      %365 = vector.shape_cast %364 : vector<1x1x36x128xf32> to vector<36x128xf32>
      %c4_i32_275 = arith.constant 4 : i32
      %366 = arith.muli %52, %c4_i32_275 : i32
      %c2_i32_276 = arith.constant 2 : i32
      %367 = arith.addi %366, %c2_i32_276 : i32
      %c9_i32_277 = arith.constant 9 : i32
      %368 = arith.muli %367, %c9_i32_277 : i32
      %c6_i32_278 = arith.constant 6 : i32
      %369 = arith.addi %368, %c6_i32_278 : i32
      %c0_i32_279 = arith.constant 0 : i32
      %370 = arith.addi %369, %c0_i32_279 : i32
      %371 = arith.index_cast %370 : i32 to index
      %372 = memref.load %arg2[%371] : memref<288xf32, #tpu.memory_space<smem>>
      %373 = vector.broadcast %372 : f32 to vector<36x128xf32>
      %374 = arith.mulf %373, %365 : vector<36x128xf32>
      %375 = arith.addf %363, %374 : vector<36x128xf32>
      %c0_280 = arith.constant 0 : index
      %c3_281 = arith.constant 3 : index
      %c2_282 = arith.constant 2 : index
      %c0_283 = arith.constant 0 : index
      %376 = vector.load %arg5[%c0_280, %c3_281, %c2_282, %c0_283] : memref<1x4x38x128xf32, #tpu.memory_space<vmem>>, vector<1x1x36x128xf32>
      %377 = vector.shape_cast %376 : vector<1x1x36x128xf32> to vector<36x128xf32>
      %c4_i32_284 = arith.constant 4 : i32
      %378 = arith.muli %52, %c4_i32_284 : i32
      %c3_i32_285 = arith.constant 3 : i32
      %379 = arith.addi %378, %c3_i32_285 : i32
      %c9_i32_286 = arith.constant 9 : i32
      %380 = arith.muli %379, %c9_i32_286 : i32
      %c6_i32_287 = arith.constant 6 : i32
      %381 = arith.addi %380, %c6_i32_287 : i32
      %c0_i32_288 = arith.constant 0 : i32
      %382 = arith.addi %381, %c0_i32_288 : i32
      %383 = arith.index_cast %382 : i32 to index
      %384 = memref.load %arg2[%383] : memref<288xf32, #tpu.memory_space<smem>>
      %385 = vector.broadcast %384 : f32 to vector<36x128xf32>
      %386 = arith.mulf %385, %377 : vector<36x128xf32>
      %387 = arith.addf %375, %386 : vector<36x128xf32>
      %c0_289 = arith.constant 0 : index
      %c2_290 = arith.constant 2 : index
      %c0_291 = arith.constant 0 : index
      %388 = vector.load %arg7[%c0_289, %c2_290, %c0_291] : memref<8x38x128xf32, #tpu.memory_space<vmem>>, vector<1x36x128xf32>
      %389 = vector.shape_cast %388 : vector<1x36x128xf32> to vector<36x128xf32>
      %c4_i32_292 = arith.constant 4 : i32
      %390 = arith.muli %52, %c4_i32_292 : i32
      %c0_i32_293 = arith.constant 0 : i32
      %391 = arith.addi %390, %c0_i32_293 : i32
      %c9_i32_294 = arith.constant 9 : i32
      %392 = arith.muli %391, %c9_i32_294 : i32
      %c6_i32_295 = arith.constant 6 : i32
      %393 = arith.addi %392, %c6_i32_295 : i32
      %c1_i32_296 = arith.constant 1 : i32
      %394 = arith.addi %393, %c1_i32_296 : i32
      %395 = arith.index_cast %394 : i32 to index
      %396 = memref.load %arg2[%395] : memref<288xf32, #tpu.memory_space<smem>>
      %397 = vector.broadcast %396 : f32 to vector<36x128xf32>
      %398 = arith.mulf %397, %389 : vector<36x128xf32>
      %399 = arith.addf %387, %398 : vector<36x128xf32>
      %c1_297 = arith.constant 1 : index
      %c2_298 = arith.constant 2 : index
      %c0_299 = arith.constant 0 : index
      %400 = vector.load %arg7[%c1_297, %c2_298, %c0_299] : memref<8x38x128xf32, #tpu.memory_space<vmem>>, vector<1x36x128xf32>
      %401 = vector.shape_cast %400 : vector<1x36x128xf32> to vector<36x128xf32>
      %c4_i32_300 = arith.constant 4 : i32
      %402 = arith.muli %52, %c4_i32_300 : i32
      %c1_i32_301 = arith.constant 1 : i32
      %403 = arith.addi %402, %c1_i32_301 : i32
      %c9_i32_302 = arith.constant 9 : i32
      %404 = arith.muli %403, %c9_i32_302 : i32
      %c6_i32_303 = arith.constant 6 : i32
      %405 = arith.addi %404, %c6_i32_303 : i32
      %c1_i32_304 = arith.constant 1 : i32
      %406 = arith.addi %405, %c1_i32_304 : i32
      %407 = arith.index_cast %406 : i32 to index
      %408 = memref.load %arg2[%407] : memref<288xf32, #tpu.memory_space<smem>>
      %409 = vector.broadcast %408 : f32 to vector<36x128xf32>
      %410 = arith.mulf %409, %401 : vector<36x128xf32>
      %411 = arith.addf %399, %410 : vector<36x128xf32>
      %c2_305 = arith.constant 2 : index
      %c2_306 = arith.constant 2 : index
      %c0_307 = arith.constant 0 : index
      %412 = vector.load %arg7[%c2_305, %c2_306, %c0_307] : memref<8x38x128xf32, #tpu.memory_space<vmem>>, vector<1x36x128xf32>
      %413 = vector.shape_cast %412 : vector<1x36x128xf32> to vector<36x128xf32>
      %c4_i32_308 = arith.constant 4 : i32
      %414 = arith.muli %52, %c4_i32_308 : i32
      %c2_i32_309 = arith.constant 2 : i32
      %415 = arith.addi %414, %c2_i32_309 : i32
      %c9_i32_310 = arith.constant 9 : i32
      %416 = arith.muli %415, %c9_i32_310 : i32
      %c6_i32_311 = arith.constant 6 : i32
      %417 = arith.addi %416, %c6_i32_311 : i32
      %c1_i32_312 = arith.constant 1 : i32
      %418 = arith.addi %417, %c1_i32_312 : i32
      %419 = arith.index_cast %418 : i32 to index
      %420 = memref.load %arg2[%419] : memref<288xf32, #tpu.memory_space<smem>>
      %421 = vector.broadcast %420 : f32 to vector<36x128xf32>
      %422 = arith.mulf %421, %413 : vector<36x128xf32>
      %423 = arith.addf %411, %422 : vector<36x128xf32>
      %c3_313 = arith.constant 3 : index
      %c2_314 = arith.constant 2 : index
      %c0_315 = arith.constant 0 : index
      %424 = vector.load %arg7[%c3_313, %c2_314, %c0_315] : memref<8x38x128xf32, #tpu.memory_space<vmem>>, vector<1x36x128xf32>
      %425 = vector.shape_cast %424 : vector<1x36x128xf32> to vector<36x128xf32>
      %c4_i32_316 = arith.constant 4 : i32
      %426 = arith.muli %52, %c4_i32_316 : i32
      %c3_i32_317 = arith.constant 3 : i32
      %427 = arith.addi %426, %c3_i32_317 : i32
      %c9_i32_318 = arith.constant 9 : i32
      %428 = arith.muli %427, %c9_i32_318 : i32
      %c6_i32_319 = arith.constant 6 : i32
      %429 = arith.addi %428, %c6_i32_319 : i32
      %c1_i32_320 = arith.constant 1 : i32
      %430 = arith.addi %429, %c1_i32_320 : i32
      %431 = arith.index_cast %430 : i32 to index
      %432 = memref.load %arg2[%431] : memref<288xf32, #tpu.memory_space<smem>>
      %433 = vector.broadcast %432 : f32 to vector<36x128xf32>
      %434 = arith.mulf %433, %425 : vector<36x128xf32>
      %435 = arith.addf %423, %434 : vector<36x128xf32>
      %c4_321 = arith.constant 4 : index
      %c2_322 = arith.constant 2 : index
      %c0_323 = arith.constant 0 : index
      %436 = vector.load %arg7[%c4_321, %c2_322, %c0_323] : memref<8x38x128xf32, #tpu.memory_space<vmem>>, vector<1x36x128xf32>
      %437 = vector.shape_cast %436 : vector<1x36x128xf32> to vector<36x128xf32>
      %c4_i32_324 = arith.constant 4 : i32
      %438 = arith.muli %52, %c4_i32_324 : i32
      %c0_i32_325 = arith.constant 0 : i32
      %439 = arith.addi %438, %c0_i32_325 : i32
      %c9_i32_326 = arith.constant 9 : i32
      %440 = arith.muli %439, %c9_i32_326 : i32
      %c6_i32_327 = arith.constant 6 : i32
      %441 = arith.addi %440, %c6_i32_327 : i32
      %c2_i32_328 = arith.constant 2 : i32
      %442 = arith.addi %441, %c2_i32_328 : i32
      %443 = arith.index_cast %442 : i32 to index
      %444 = memref.load %arg2[%443] : memref<288xf32, #tpu.memory_space<smem>>
      %445 = vector.broadcast %444 : f32 to vector<36x128xf32>
      %446 = arith.mulf %445, %437 : vector<36x128xf32>
      %447 = arith.addf %435, %446 : vector<36x128xf32>
      %c5_329 = arith.constant 5 : index
      %c2_330 = arith.constant 2 : index
      %c0_331 = arith.constant 0 : index
      %448 = vector.load %arg7[%c5_329, %c2_330, %c0_331] : memref<8x38x128xf32, #tpu.memory_space<vmem>>, vector<1x36x128xf32>
      %449 = vector.shape_cast %448 : vector<1x36x128xf32> to vector<36x128xf32>
      %c4_i32_332 = arith.constant 4 : i32
      %450 = arith.muli %52, %c4_i32_332 : i32
      %c1_i32_333 = arith.constant 1 : i32
      %451 = arith.addi %450, %c1_i32_333 : i32
      %c9_i32_334 = arith.constant 9 : i32
      %452 = arith.muli %451, %c9_i32_334 : i32
      %c6_i32_335 = arith.constant 6 : i32
      %453 = arith.addi %452, %c6_i32_335 : i32
      %c2_i32_336 = arith.constant 2 : i32
      %454 = arith.addi %453, %c2_i32_336 : i32
      %455 = arith.index_cast %454 : i32 to index
      %456 = memref.load %arg2[%455] : memref<288xf32, #tpu.memory_space<smem>>
      %457 = vector.broadcast %456 : f32 to vector<36x128xf32>
      %458 = arith.mulf %457, %449 : vector<36x128xf32>
      %459 = arith.addf %447, %458 : vector<36x128xf32>
      %c6_337 = arith.constant 6 : index
      %c2_338 = arith.constant 2 : index
      %c0_339 = arith.constant 0 : index
      %460 = vector.load %arg7[%c6_337, %c2_338, %c0_339] : memref<8x38x128xf32, #tpu.memory_space<vmem>>, vector<1x36x128xf32>
      %461 = vector.shape_cast %460 : vector<1x36x128xf32> to vector<36x128xf32>
      %c4_i32_340 = arith.constant 4 : i32
      %462 = arith.muli %52, %c4_i32_340 : i32
      %c2_i32_341 = arith.constant 2 : i32
      %463 = arith.addi %462, %c2_i32_341 : i32
      %c9_i32_342 = arith.constant 9 : i32
      %464 = arith.muli %463, %c9_i32_342 : i32
      %c6_i32_343 = arith.constant 6 : i32
      %465 = arith.addi %464, %c6_i32_343 : i32
      %c2_i32_344 = arith.constant 2 : i32
      %466 = arith.addi %465, %c2_i32_344 : i32
      %467 = arith.index_cast %466 : i32 to index
      %468 = memref.load %arg2[%467] : memref<288xf32, #tpu.memory_space<smem>>
      %469 = vector.broadcast %468 : f32 to vector<36x128xf32>
      %470 = arith.mulf %469, %461 : vector<36x128xf32>
      %471 = arith.addf %459, %470 : vector<36x128xf32>
      %c7_345 = arith.constant 7 : index
      %c2_346 = arith.constant 2 : index
      %c0_347 = arith.constant 0 : index
      %472 = vector.load %arg7[%c7_345, %c2_346, %c0_347] : memref<8x38x128xf32, #tpu.memory_space<vmem>>, vector<1x36x128xf32>
      %473 = vector.shape_cast %472 : vector<1x36x128xf32> to vector<36x128xf32>
      %c4_i32_348 = arith.constant 4 : i32
      %474 = arith.muli %52, %c4_i32_348 : i32
      %c3_i32_349 = arith.constant 3 : i32
      %475 = arith.addi %474, %c3_i32_349 : i32
      %c9_i32_350 = arith.constant 9 : i32
      %476 = arith.muli %475, %c9_i32_350 : i32
      %c6_i32_351 = arith.constant 6 : i32
      %477 = arith.addi %476, %c6_i32_351 : i32
      %c2_i32_352 = arith.constant 2 : i32
      %478 = arith.addi %477, %c2_i32_352 : i32
      %479 = arith.index_cast %478 : i32 to index
      %480 = memref.load %arg2[%479] : memref<288xf32, #tpu.memory_space<smem>>
      %481 = vector.broadcast %480 : f32 to vector<36x128xf32>
      %482 = arith.mulf %481, %473 : vector<36x128xf32>
      %483 = arith.addf %471, %482 : vector<36x128xf32>
      %484 = arith.index_cast %52 : i32 to index
      %485 = memref.load %arg3[%484] : memref<8xf32, #tpu.memory_space<smem>>
      %486 = vector.broadcast %485 : f32 to vector<36x128xf32>
      %487 = arith.mulf %483, %486 : vector<36x128xf32>
      %488 = arith.index_cast %52 : i32 to index
      %489 = memref.load %arg4[%488] : memref<8xf32, #tpu.memory_space<smem>>
      %490 = vector.broadcast %489 : f32 to vector<36x128xf32>
      %491 = arith.addf %487, %490 : vector<36x128xf32>
      %cst = arith.constant 0.000000e+00 : f32
      %492 = vector.broadcast %cst : f32 to vector<36x128xf32>
      %493 = arith.maximumf %491, %492 : vector<36x128xf32>
      %c0_353 = arith.constant 0 : index
      %c0_354 = arith.constant 0 : index
      %494 = vector.load %arg8[%c0_353, %c0_354] : memref<36x128xf32, #tpu.memory_space<vmem>>, vector<36x128xf32>
      tpu.vector_store %arg8[%c0_353, %c0_354], %493 {strides = array<i32>} : memref<36x128xf32, #tpu.memory_space<vmem>>, vector<36x128xf32>,
      %c0_355 = arith.constant 0 : index
      %c0_356 = arith.constant 0 : index
      %495 = tpu.strided_load %arg8[%c0_355, %c0_356] {strides = array<i32: 3, 1>} : memref<36x128xf32, #tpu.memory_space<vmem>>, vector<12x128xf32>
      %c1_357 = arith.constant 1 : index
      %c0_358 = arith.constant 0 : index
      %496 = tpu.strided_load %arg8[%c1_357, %c0_358] {strides = array<i32: 3, 1>} : memref<36x128xf32, #tpu.memory_space<vmem>>, vector<12x128xf32>
      %c2_359 = arith.constant 2 : index
      %c0_360 = arith.constant 0 : index
      %497 = tpu.strided_load %arg8[%c2_359, %c0_360] {strides = array<i32: 3, 1>} : memref<36x128xf32, #tpu.memory_space<vmem>>, vector<12x128xf32>
      %498 = arith.maximumf %495, %496 : vector<12x128xf32>
      %499 = arith.maximumf %498, %497 : vector<12x128xf32>
      %c0_361 = arith.constant 0 : index
      %500 = arith.index_cast %50 : i32 to index
      %c0_362 = arith.constant 0 : index
      %c0_363 = arith.constant 0 : index
      %501 = vector.load %arg6[%c0_361, %500, %c0_362, %c0_363] : memref<1x8x12x128xf32, #tpu.memory_space<vmem>>, vector<1x1x12x128xf32>
      %502 = vector.shape_cast %501 : vector<1x1x12x128xf32> to vector<12x128xf32>
      %503 = vector.shape_cast %499 : vector<12x128xf32> to vector<1x1x12x128xf32>
      tpu.vector_store %arg6[%c0_361, %500, %c0_362, %c0_363], %503 {strides = array<i32>} : memref<1x8x12x128xf32, #tpu.memory_space<vmem>>, vector<1x1x12x128xf32>,
    }
    %c8_i32_54 = arith.constant 8 : i32
    return
  }
  func.func @transform_0(%arg0: i32, %arg1: i32) -> i32 {
    %c0_i32 = arith.constant 0 : i32
    %c0_i32_0 = arith.constant 0 : i32
    return %c0_i32 : i32
  }
  func.func @transform_1(%arg0: i32, %arg1: i32) -> i32 {
    %c0_i32 = arith.constant 0 : i32
    %c0_i32_0 = arith.constant 0 : i32
    return %c0_i32 : i32
  }
  func.func @transform_2(%arg0: i32, %arg1: i32) -> i32 {
    %c0_i32 = arith.constant 0 : i32
    %c0_i32_0 = arith.constant 0 : i32
    return %c0_i32 : i32
  }
  func.func @transform_3(%arg0: i32, %arg1: i32) -> (i32, i32, i32, i32) {
    %c0_i32 = arith.constant 0 : i32
    %c0_i32_0 = arith.constant 0 : i32
    %c0_i32_1 = arith.constant 0 : i32
    %c0_i32_2 = arith.constant 0 : i32
    return %arg0, %c0_i32, %c0_i32_0, %c0_i32_1 : i32, i32, i32, i32
  }
  func.func @transform_4(%arg0: i32, %arg1: i32) -> (i32, i32, i32, i32) {
    %c0_i32 = arith.constant 0 : i32
    %c0_i32_0 = arith.constant 0 : i32
    %c0_i32_1 = arith.constant 0 : i32
    return %arg0, %arg1, %c0_i32, %c0_i32_0 : i32, i32, i32, i32
  }
}

module attributes {stable_mosaic.version = 11 : i64} {
  func.func @_conv_bn_relu_rowpool_kernel(%arg0: i32, %arg1: i32, %arg2: memref<1152xf32, #tpu.memory_space<smem>>, %arg3: memref<16xf32, #tpu.memory_space<smem>>, %arg4: memref<16xf32, #tpu.memory_space<smem>>, %arg5: memref<1x8x14x128xf32, #tpu.memory_space<vmem>>, %arg6: memref<1x16x4x128xf32, #tpu.memory_space<vmem>>, %arg7: memref<16x14x128xf32, #tpu.memory_space<vmem>>, %arg8: memref<12x128xf32, #tpu.memory_space<vmem>>) attributes {dimension_semantics = [#tpu.dimension_semantics<parallel>, #tpu.dimension_semantics<parallel>], iteration_bounds = array<i64: 2, 1>, scalar_prefetch = 0 : i64, scratch_operands = 2 : i64, tpu.core_type = #tpu.core_type<tc>, window_params = [{transform_indices = @transform_0, window_bounds = array<i64: 1152>}, {transform_indices = @transform_1, window_bounds = array<i64: 16>}, {transform_indices = @transform_2, window_bounds = array<i64: 16>}, {transform_indices = @transform_3, window_bounds = array<i64: 1, 8, 14, 128>}, {transform_indices = @transform_4, window_bounds = array<i64: 1, 16, 4, 128>}]} {
    %c0 = arith.constant 0 : index
    %c0_0 = arith.constant 0 : index
    %c0_1 = arith.constant 0 : index
    %c0_2 = arith.constant 0 : index
    %0 = vector.load %arg5[%c0, %c0_0, %c0_1, %c0_2] : memref<1x8x14x128xf32, #tpu.memory_space<vmem>>, vector<1x1x14x128xf32>
    %1 = vector.shape_cast %0 : vector<1x1x14x128xf32> to vector<14x128xf32>
    %c127_i32 = arith.constant 127 : i32
    %2 = tpu.dynamic_rotate %1 by %c127_i32 dim 1 : vector<14x128xf32>, i32 -> vector<14x128xf32>
    %c0_3 = arith.constant 0 : index
    %c0_4 = arith.constant 0 : index
    %c0_5 = arith.constant 0 : index
    %3 = vector.load %arg7[%c0_3, %c0_4, %c0_5] : memref<16x14x128xf32, #tpu.memory_space<vmem>>, vector<1x14x128xf32>
    %4 = vector.shape_cast %3 : vector<1x14x128xf32> to vector<14x128xf32>
    %5 = vector.shape_cast %2 : vector<14x128xf32> to vector<1x14x128xf32>
    tpu.vector_store %arg7[%c0_3, %c0_4, %c0_5], %5 {strides = array<i32>} : memref<16x14x128xf32, #tpu.memory_space<vmem>>, vector<1x14x128xf32>,
    %c0_6 = arith.constant 0 : index
    %c1 = arith.constant 1 : index
    %c0_7 = arith.constant 0 : index
    %c0_8 = arith.constant 0 : index
    %6 = vector.load %arg5[%c0_6, %c1, %c0_7, %c0_8] : memref<1x8x14x128xf32, #tpu.memory_space<vmem>>, vector<1x1x14x128xf32>
    %7 = vector.shape_cast %6 : vector<1x1x14x128xf32> to vector<14x128xf32>
    %c127_i32_9 = arith.constant 127 : i32
    %8 = tpu.dynamic_rotate %7 by %c127_i32_9 dim 1 : vector<14x128xf32>, i32 -> vector<14x128xf32>
    %c1_10 = arith.constant 1 : index
    %c0_11 = arith.constant 0 : index
    %c0_12 = arith.constant 0 : index
    %9 = vector.load %arg7[%c1_10, %c0_11, %c0_12] : memref<16x14x128xf32, #tpu.memory_space<vmem>>, vector<1x14x128xf32>
    %10 = vector.shape_cast %9 : vector<1x14x128xf32> to vector<14x128xf32>
    %11 = vector.shape_cast %8 : vector<14x128xf32> to vector<1x14x128xf32>
    tpu.vector_store %arg7[%c1_10, %c0_11, %c0_12], %11 {strides = array<i32>} : memref<16x14x128xf32, #tpu.memory_space<vmem>>, vector<1x14x128xf32>,
    %c0_13 = arith.constant 0 : index
    %c2 = arith.constant 2 : index
    %c0_14 = arith.constant 0 : index
    %c0_15 = arith.constant 0 : index
    %12 = vector.load %arg5[%c0_13, %c2, %c0_14, %c0_15] : memref<1x8x14x128xf32, #tpu.memory_space<vmem>>, vector<1x1x14x128xf32>
    %13 = vector.shape_cast %12 : vector<1x1x14x128xf32> to vector<14x128xf32>
    %c127_i32_16 = arith.constant 127 : i32
    %14 = tpu.dynamic_rotate %13 by %c127_i32_16 dim 1 : vector<14x128xf32>, i32 -> vector<14x128xf32>
    %c2_17 = arith.constant 2 : index
    %c0_18 = arith.constant 0 : index
    %c0_19 = arith.constant 0 : index
    %15 = vector.load %arg7[%c2_17, %c0_18, %c0_19] : memref<16x14x128xf32, #tpu.memory_space<vmem>>, vector<1x14x128xf32>
    %16 = vector.shape_cast %15 : vector<1x14x128xf32> to vector<14x128xf32>
    %17 = vector.shape_cast %14 : vector<14x128xf32> to vector<1x14x128xf32>
    tpu.vector_store %arg7[%c2_17, %c0_18, %c0_19], %17 {strides = array<i32>} : memref<16x14x128xf32, #tpu.memory_space<vmem>>, vector<1x14x128xf32>,
    %c0_20 = arith.constant 0 : index
    %c3 = arith.constant 3 : index
    %c0_21 = arith.constant 0 : index
    %c0_22 = arith.constant 0 : index
    %18 = vector.load %arg5[%c0_20, %c3, %c0_21, %c0_22] : memref<1x8x14x128xf32, #tpu.memory_space<vmem>>, vector<1x1x14x128xf32>
    %19 = vector.shape_cast %18 : vector<1x1x14x128xf32> to vector<14x128xf32>
    %c127_i32_23 = arith.constant 127 : i32
    %20 = tpu.dynamic_rotate %19 by %c127_i32_23 dim 1 : vector<14x128xf32>, i32 -> vector<14x128xf32>
    %c3_24 = arith.constant 3 : index
    %c0_25 = arith.constant 0 : index
    %c0_26 = arith.constant 0 : index
    %21 = vector.load %arg7[%c3_24, %c0_25, %c0_26] : memref<16x14x128xf32, #tpu.memory_space<vmem>>, vector<1x14x128xf32>
    %22 = vector.shape_cast %21 : vector<1x14x128xf32> to vector<14x128xf32>
    %23 = vector.shape_cast %20 : vector<14x128xf32> to vector<1x14x128xf32>
    tpu.vector_store %arg7[%c3_24, %c0_25, %c0_26], %23 {strides = array<i32>} : memref<16x14x128xf32, #tpu.memory_space<vmem>>, vector<1x14x128xf32>,
    %c0_27 = arith.constant 0 : index
    %c4 = arith.constant 4 : index
    %c0_28 = arith.constant 0 : index
    %c0_29 = arith.constant 0 : index
    %24 = vector.load %arg5[%c0_27, %c4, %c0_28, %c0_29] : memref<1x8x14x128xf32, #tpu.memory_space<vmem>>, vector<1x1x14x128xf32>
    %25 = vector.shape_cast %24 : vector<1x1x14x128xf32> to vector<14x128xf32>
    %c127_i32_30 = arith.constant 127 : i32
    %26 = tpu.dynamic_rotate %25 by %c127_i32_30 dim 1 : vector<14x128xf32>, i32 -> vector<14x128xf32>
    %c4_31 = arith.constant 4 : index
    %c0_32 = arith.constant 0 : index
    %c0_33 = arith.constant 0 : index
    %27 = vector.load %arg7[%c4_31, %c0_32, %c0_33] : memref<16x14x128xf32, #tpu.memory_space<vmem>>, vector<1x14x128xf32>
    %28 = vector.shape_cast %27 : vector<1x14x128xf32> to vector<14x128xf32>
    %29 = vector.shape_cast %26 : vector<14x128xf32> to vector<1x14x128xf32>
    tpu.vector_store %arg7[%c4_31, %c0_32, %c0_33], %29 {strides = array<i32>} : memref<16x14x128xf32, #tpu.memory_space<vmem>>, vector<1x14x128xf32>,
    %c0_34 = arith.constant 0 : index
    %c5 = arith.constant 5 : index
    %c0_35 = arith.constant 0 : index
    %c0_36 = arith.constant 0 : index
    %30 = vector.load %arg5[%c0_34, %c5, %c0_35, %c0_36] : memref<1x8x14x128xf32, #tpu.memory_space<vmem>>, vector<1x1x14x128xf32>
    %31 = vector.shape_cast %30 : vector<1x1x14x128xf32> to vector<14x128xf32>
    %c127_i32_37 = arith.constant 127 : i32
    %32 = tpu.dynamic_rotate %31 by %c127_i32_37 dim 1 : vector<14x128xf32>, i32 -> vector<14x128xf32>
    %c5_38 = arith.constant 5 : index
    %c0_39 = arith.constant 0 : index
    %c0_40 = arith.constant 0 : index
    %33 = vector.load %arg7[%c5_38, %c0_39, %c0_40] : memref<16x14x128xf32, #tpu.memory_space<vmem>>, vector<1x14x128xf32>
    %34 = vector.shape_cast %33 : vector<1x14x128xf32> to vector<14x128xf32>
    %35 = vector.shape_cast %32 : vector<14x128xf32> to vector<1x14x128xf32>
    tpu.vector_store %arg7[%c5_38, %c0_39, %c0_40], %35 {strides = array<i32>} : memref<16x14x128xf32, #tpu.memory_space<vmem>>, vector<1x14x128xf32>,
    %c0_41 = arith.constant 0 : index
    %c6 = arith.constant 6 : index
    %c0_42 = arith.constant 0 : index
    %c0_43 = arith.constant 0 : index
    %36 = vector.load %arg5[%c0_41, %c6, %c0_42, %c0_43] : memref<1x8x14x128xf32, #tpu.memory_space<vmem>>, vector<1x1x14x128xf32>
    %37 = vector.shape_cast %36 : vector<1x1x14x128xf32> to vector<14x128xf32>
    %c127_i32_44 = arith.constant 127 : i32
    %38 = tpu.dynamic_rotate %37 by %c127_i32_44 dim 1 : vector<14x128xf32>, i32 -> vector<14x128xf32>
    %c6_45 = arith.constant 6 : index
    %c0_46 = arith.constant 0 : index
    %c0_47 = arith.constant 0 : index
    %39 = vector.load %arg7[%c6_45, %c0_46, %c0_47] : memref<16x14x128xf32, #tpu.memory_space<vmem>>, vector<1x14x128xf32>
    %40 = vector.shape_cast %39 : vector<1x14x128xf32> to vector<14x128xf32>
    %41 = vector.shape_cast %38 : vector<14x128xf32> to vector<1x14x128xf32>
    tpu.vector_store %arg7[%c6_45, %c0_46, %c0_47], %41 {strides = array<i32>} : memref<16x14x128xf32, #tpu.memory_space<vmem>>, vector<1x14x128xf32>,
    %c0_48 = arith.constant 0 : index
    %c7 = arith.constant 7 : index
    %c0_49 = arith.constant 0 : index
    %c0_50 = arith.constant 0 : index
    %42 = vector.load %arg5[%c0_48, %c7, %c0_49, %c0_50] : memref<1x8x14x128xf32, #tpu.memory_space<vmem>>, vector<1x1x14x128xf32>
    %43 = vector.shape_cast %42 : vector<1x1x14x128xf32> to vector<14x128xf32>
    %c127_i32_51 = arith.constant 127 : i32
    %44 = tpu.dynamic_rotate %43 by %c127_i32_51 dim 1 : vector<14x128xf32>, i32 -> vector<14x128xf32>
    %c7_52 = arith.constant 7 : index
    %c0_53 = arith.constant 0 : index
    %c0_54 = arith.constant 0 : index
    %45 = vector.load %arg7[%c7_52, %c0_53, %c0_54] : memref<16x14x128xf32, #tpu.memory_space<vmem>>, vector<1x14x128xf32>
    %46 = vector.shape_cast %45 : vector<1x14x128xf32> to vector<14x128xf32>
    %47 = vector.shape_cast %44 : vector<14x128xf32> to vector<1x14x128xf32>
    tpu.vector_store %arg7[%c7_52, %c0_53, %c0_54], %47 {strides = array<i32>} : memref<16x14x128xf32, #tpu.memory_space<vmem>>, vector<1x14x128xf32>,
    %c0_55 = arith.constant 0 : index
    %c0_56 = arith.constant 0 : index
    %c0_57 = arith.constant 0 : index
    %c0_58 = arith.constant 0 : index
    %48 = vector.load %arg5[%c0_55, %c0_56, %c0_57, %c0_58] : memref<1x8x14x128xf32, #tpu.memory_space<vmem>>, vector<1x1x14x128xf32>
    %49 = vector.shape_cast %48 : vector<1x1x14x128xf32> to vector<14x128xf32>
    %c126_i32 = arith.constant 126 : i32
    %50 = tpu.dynamic_rotate %49 by %c126_i32 dim 1 : vector<14x128xf32>, i32 -> vector<14x128xf32>
    %c8 = arith.constant 8 : index
    %c0_59 = arith.constant 0 : index
    %c0_60 = arith.constant 0 : index
    %51 = vector.load %arg7[%c8, %c0_59, %c0_60] : memref<16x14x128xf32, #tpu.memory_space<vmem>>, vector<1x14x128xf32>
    %52 = vector.shape_cast %51 : vector<1x14x128xf32> to vector<14x128xf32>
    %53 = vector.shape_cast %50 : vector<14x128xf32> to vector<1x14x128xf32>
    tpu.vector_store %arg7[%c8, %c0_59, %c0_60], %53 {strides = array<i32>} : memref<16x14x128xf32, #tpu.memory_space<vmem>>, vector<1x14x128xf32>,
    %c0_61 = arith.constant 0 : index
    %c1_62 = arith.constant 1 : index
    %c0_63 = arith.constant 0 : index
    %c0_64 = arith.constant 0 : index
    %54 = vector.load %arg5[%c0_61, %c1_62, %c0_63, %c0_64] : memref<1x8x14x128xf32, #tpu.memory_space<vmem>>, vector<1x1x14x128xf32>
    %55 = vector.shape_cast %54 : vector<1x1x14x128xf32> to vector<14x128xf32>
    %c126_i32_65 = arith.constant 126 : i32
    %56 = tpu.dynamic_rotate %55 by %c126_i32_65 dim 1 : vector<14x128xf32>, i32 -> vector<14x128xf32>
    %c9 = arith.constant 9 : index
    %c0_66 = arith.constant 0 : index
    %c0_67 = arith.constant 0 : index
    %57 = vector.load %arg7[%c9, %c0_66, %c0_67] : memref<16x14x128xf32, #tpu.memory_space<vmem>>, vector<1x14x128xf32>
    %58 = vector.shape_cast %57 : vector<1x14x128xf32> to vector<14x128xf32>
    %59 = vector.shape_cast %56 : vector<14x128xf32> to vector<1x14x128xf32>
    tpu.vector_store %arg7[%c9, %c0_66, %c0_67], %59 {strides = array<i32>} : memref<16x14x128xf32, #tpu.memory_space<vmem>>, vector<1x14x128xf32>,
    %c0_68 = arith.constant 0 : index
    %c2_69 = arith.constant 2 : index
    %c0_70 = arith.constant 0 : index
    %c0_71 = arith.constant 0 : index
    %60 = vector.load %arg5[%c0_68, %c2_69, %c0_70, %c0_71] : memref<1x8x14x128xf32, #tpu.memory_space<vmem>>, vector<1x1x14x128xf32>
    %61 = vector.shape_cast %60 : vector<1x1x14x128xf32> to vector<14x128xf32>
    %c126_i32_72 = arith.constant 126 : i32
    %62 = tpu.dynamic_rotate %61 by %c126_i32_72 dim 1 : vector<14x128xf32>, i32 -> vector<14x128xf32>
    %c10 = arith.constant 10 : index
    %c0_73 = arith.constant 0 : index
    %c0_74 = arith.constant 0 : index
    %63 = vector.load %arg7[%c10, %c0_73, %c0_74] : memref<16x14x128xf32, #tpu.memory_space<vmem>>, vector<1x14x128xf32>
    %64 = vector.shape_cast %63 : vector<1x14x128xf32> to vector<14x128xf32>
    %65 = vector.shape_cast %62 : vector<14x128xf32> to vector<1x14x128xf32>
    tpu.vector_store %arg7[%c10, %c0_73, %c0_74], %65 {strides = array<i32>} : memref<16x14x128xf32, #tpu.memory_space<vmem>>, vector<1x14x128xf32>,
    %c0_75 = arith.constant 0 : index
    %c3_76 = arith.constant 3 : index
    %c0_77 = arith.constant 0 : index
    %c0_78 = arith.constant 0 : index
    %66 = vector.load %arg5[%c0_75, %c3_76, %c0_77, %c0_78] : memref<1x8x14x128xf32, #tpu.memory_space<vmem>>, vector<1x1x14x128xf32>
    %67 = vector.shape_cast %66 : vector<1x1x14x128xf32> to vector<14x128xf32>
    %c126_i32_79 = arith.constant 126 : i32
    %68 = tpu.dynamic_rotate %67 by %c126_i32_79 dim 1 : vector<14x128xf32>, i32 -> vector<14x128xf32>
    %c11 = arith.constant 11 : index
    %c0_80 = arith.constant 0 : index
    %c0_81 = arith.constant 0 : index
    %69 = vector.load %arg7[%c11, %c0_80, %c0_81] : memref<16x14x128xf32, #tpu.memory_space<vmem>>, vector<1x14x128xf32>
    %70 = vector.shape_cast %69 : vector<1x14x128xf32> to vector<14x128xf32>
    %71 = vector.shape_cast %68 : vector<14x128xf32> to vector<1x14x128xf32>
    tpu.vector_store %arg7[%c11, %c0_80, %c0_81], %71 {strides = array<i32>} : memref<16x14x128xf32, #tpu.memory_space<vmem>>, vector<1x14x128xf32>,
    %c0_82 = arith.constant 0 : index
    %c4_83 = arith.constant 4 : index
    %c0_84 = arith.constant 0 : index
    %c0_85 = arith.constant 0 : index
    %72 = vector.load %arg5[%c0_82, %c4_83, %c0_84, %c0_85] : memref<1x8x14x128xf32, #tpu.memory_space<vmem>>, vector<1x1x14x128xf32>
    %73 = vector.shape_cast %72 : vector<1x1x14x128xf32> to vector<14x128xf32>
    %c126_i32_86 = arith.constant 126 : i32
    %74 = tpu.dynamic_rotate %73 by %c126_i32_86 dim 1 : vector<14x128xf32>, i32 -> vector<14x128xf32>
    %c12 = arith.constant 12 : index
    %c0_87 = arith.constant 0 : index
    %c0_88 = arith.constant 0 : index
    %75 = vector.load %arg7[%c12, %c0_87, %c0_88] : memref<16x14x128xf32, #tpu.memory_space<vmem>>, vector<1x14x128xf32>
    %76 = vector.shape_cast %75 : vector<1x14x128xf32> to vector<14x128xf32>
    %77 = vector.shape_cast %74 : vector<14x128xf32> to vector<1x14x128xf32>
    tpu.vector_store %arg7[%c12, %c0_87, %c0_88], %77 {strides = array<i32>} : memref<16x14x128xf32, #tpu.memory_space<vmem>>, vector<1x14x128xf32>,
    %c0_89 = arith.constant 0 : index
    %c5_90 = arith.constant 5 : index
    %c0_91 = arith.constant 0 : index
    %c0_92 = arith.constant 0 : index
    %78 = vector.load %arg5[%c0_89, %c5_90, %c0_91, %c0_92] : memref<1x8x14x128xf32, #tpu.memory_space<vmem>>, vector<1x1x14x128xf32>
    %79 = vector.shape_cast %78 : vector<1x1x14x128xf32> to vector<14x128xf32>
    %c126_i32_93 = arith.constant 126 : i32
    %80 = tpu.dynamic_rotate %79 by %c126_i32_93 dim 1 : vector<14x128xf32>, i32 -> vector<14x128xf32>
    %c13 = arith.constant 13 : index
    %c0_94 = arith.constant 0 : index
    %c0_95 = arith.constant 0 : index
    %81 = vector.load %arg7[%c13, %c0_94, %c0_95] : memref<16x14x128xf32, #tpu.memory_space<vmem>>, vector<1x14x128xf32>
    %82 = vector.shape_cast %81 : vector<1x14x128xf32> to vector<14x128xf32>
    %83 = vector.shape_cast %80 : vector<14x128xf32> to vector<1x14x128xf32>
    tpu.vector_store %arg7[%c13, %c0_94, %c0_95], %83 {strides = array<i32>} : memref<16x14x128xf32, #tpu.memory_space<vmem>>, vector<1x14x128xf32>,
    %c0_96 = arith.constant 0 : index
    %c6_97 = arith.constant 6 : index
    %c0_98 = arith.constant 0 : index
    %c0_99 = arith.constant 0 : index
    %84 = vector.load %arg5[%c0_96, %c6_97, %c0_98, %c0_99] : memref<1x8x14x128xf32, #tpu.memory_space<vmem>>, vector<1x1x14x128xf32>
    %85 = vector.shape_cast %84 : vector<1x1x14x128xf32> to vector<14x128xf32>
    %c126_i32_100 = arith.constant 126 : i32
    %86 = tpu.dynamic_rotate %85 by %c126_i32_100 dim 1 : vector<14x128xf32>, i32 -> vector<14x128xf32>
    %c14 = arith.constant 14 : index
    %c0_101 = arith.constant 0 : index
    %c0_102 = arith.constant 0 : index
    %87 = vector.load %arg7[%c14, %c0_101, %c0_102] : memref<16x14x128xf32, #tpu.memory_space<vmem>>, vector<1x14x128xf32>
    %88 = vector.shape_cast %87 : vector<1x14x128xf32> to vector<14x128xf32>
    %89 = vector.shape_cast %86 : vector<14x128xf32> to vector<1x14x128xf32>
    tpu.vector_store %arg7[%c14, %c0_101, %c0_102], %89 {strides = array<i32>} : memref<16x14x128xf32, #tpu.memory_space<vmem>>, vector<1x14x128xf32>,
    %c0_103 = arith.constant 0 : index
    %c7_104 = arith.constant 7 : index
    %c0_105 = arith.constant 0 : index
    %c0_106 = arith.constant 0 : index
    %90 = vector.load %arg5[%c0_103, %c7_104, %c0_105, %c0_106] : memref<1x8x14x128xf32, #tpu.memory_space<vmem>>, vector<1x1x14x128xf32>
    %91 = vector.shape_cast %90 : vector<1x1x14x128xf32> to vector<14x128xf32>
    %c126_i32_107 = arith.constant 126 : i32
    %92 = tpu.dynamic_rotate %91 by %c126_i32_107 dim 1 : vector<14x128xf32>, i32 -> vector<14x128xf32>
    %c15 = arith.constant 15 : index
    %c0_108 = arith.constant 0 : index
    %c0_109 = arith.constant 0 : index
    %93 = vector.load %arg7[%c15, %c0_108, %c0_109] : memref<16x14x128xf32, #tpu.memory_space<vmem>>, vector<1x14x128xf32>
    %94 = vector.shape_cast %93 : vector<1x14x128xf32> to vector<14x128xf32>
    %95 = vector.shape_cast %92 : vector<14x128xf32> to vector<1x14x128xf32>
    tpu.vector_store %arg7[%c15, %c0_108, %c0_109], %95 {strides = array<i32>} : memref<16x14x128xf32, #tpu.memory_space<vmem>>, vector<1x14x128xf32>,
    %c0_i32 = arith.constant 0 : i32
    %c16_i32 = arith.constant 16 : i32
    %96 = arith.addi %c0_i32, %c16_i32 : i32
    %c1_i32 = arith.constant 1 : i32
    scf.for %arg9 = %c0_i32 to %96 step %c1_i32  : i32 {
      %c1_i32_111 = arith.constant 1 : i32
      %97 = arith.muli %arg9, %c1_i32_111 : i32
      %c0_i32_112 = arith.constant 0 : i32
      %98 = arith.addi %c0_i32_112, %97 : i32
      %c16_i32_113 = arith.constant 16 : i32
      %99 = arith.muli %arg1, %c16_i32_113 : i32
      %100 = arith.addi %99, %98 : i32
      %c0_114 = arith.constant 0 : index
      %c0_115 = arith.constant 0 : index
      %c0_116 = arith.constant 0 : index
      %c0_117 = arith.constant 0 : index
      %101 = vector.load %arg5[%c0_114, %c0_115, %c0_116, %c0_117] : memref<1x8x14x128xf32, #tpu.memory_space<vmem>>, vector<1x1x12x128xf32>
      %102 = vector.shape_cast %101 : vector<1x1x12x128xf32> to vector<12x128xf32>
      %c8_i32 = arith.constant 8 : i32
      %103 = arith.muli %100, %c8_i32 : i32
      %c0_i32_118 = arith.constant 0 : i32
      %104 = arith.addi %103, %c0_i32_118 : i32
      %c9_i32 = arith.constant 9 : i32
      %105 = arith.muli %104, %c9_i32 : i32
      %c0_i32_119 = arith.constant 0 : i32
      %106 = arith.addi %105, %c0_i32_119 : i32
      %c0_i32_120 = arith.constant 0 : i32
      %107 = arith.addi %106, %c0_i32_120 : i32
      %108 = arith.index_cast %107 : i32 to index
      %109 = memref.load %arg2[%108] : memref<1152xf32, #tpu.memory_space<smem>>
      %110 = vector.broadcast %109 : f32 to vector<12x128xf32>
      %111 = arith.mulf %110, %102 : vector<12x128xf32>
      %c0_121 = arith.constant 0 : index
      %c1_122 = arith.constant 1 : index
      %c0_123 = arith.constant 0 : index
      %c0_124 = arith.constant 0 : index
      %112 = vector.load %arg5[%c0_121, %c1_122, %c0_123, %c0_124] : memref<1x8x14x128xf32, #tpu.memory_space<vmem>>, vector<1x1x12x128xf32>
      %113 = vector.shape_cast %112 : vector<1x1x12x128xf32> to vector<12x128xf32>
      %c8_i32_125 = arith.constant 8 : i32
      %114 = arith.muli %100, %c8_i32_125 : i32
      %c1_i32_126 = arith.constant 1 : i32
      %115 = arith.addi %114, %c1_i32_126 : i32
      %c9_i32_127 = arith.constant 9 : i32
      %116 = arith.muli %115, %c9_i32_127 : i32
      %c0_i32_128 = arith.constant 0 : i32
      %117 = arith.addi %116, %c0_i32_128 : i32
      %c0_i32_129 = arith.constant 0 : i32
      %118 = arith.addi %117, %c0_i32_129 : i32
      %119 = arith.index_cast %118 : i32 to index
      %120 = memref.load %arg2[%119] : memref<1152xf32, #tpu.memory_space<smem>>
      %121 = vector.broadcast %120 : f32 to vector<12x128xf32>
      %122 = arith.mulf %121, %113 : vector<12x128xf32>
      %123 = arith.addf %111, %122 : vector<12x128xf32>
      %c0_130 = arith.constant 0 : index
      %c2_131 = arith.constant 2 : index
      %c0_132 = arith.constant 0 : index
      %c0_133 = arith.constant 0 : index
      %124 = vector.load %arg5[%c0_130, %c2_131, %c0_132, %c0_133] : memref<1x8x14x128xf32, #tpu.memory_space<vmem>>, vector<1x1x12x128xf32>
      %125 = vector.shape_cast %124 : vector<1x1x12x128xf32> to vector<12x128xf32>
      %c8_i32_134 = arith.constant 8 : i32
      %126 = arith.muli %100, %c8_i32_134 : i32
      %c2_i32 = arith.constant 2 : i32
      %127 = arith.addi %126, %c2_i32 : i32
      %c9_i32_135 = arith.constant 9 : i32
      %128 = arith.muli %127, %c9_i32_135 : i32
      %c0_i32_136 = arith.constant 0 : i32
      %129 = arith.addi %128, %c0_i32_136 : i32
      %c0_i32_137 = arith.constant 0 : i32
      %130 = arith.addi %129, %c0_i32_137 : i32
      %131 = arith.index_cast %130 : i32 to index
      %132 = memref.load %arg2[%131] : memref<1152xf32, #tpu.memory_space<smem>>
      %133 = vector.broadcast %132 : f32 to vector<12x128xf32>
      %134 = arith.mulf %133, %125 : vector<12x128xf32>
      %135 = arith.addf %123, %134 : vector<12x128xf32>
      %c0_138 = arith.constant 0 : index
      %c3_139 = arith.constant 3 : index
      %c0_140 = arith.constant 0 : index
      %c0_141 = arith.constant 0 : index
      %136 = vector.load %arg5[%c0_138, %c3_139, %c0_140, %c0_141] : memref<1x8x14x128xf32, #tpu.memory_space<vmem>>, vector<1x1x12x128xf32>
      %137 = vector.shape_cast %136 : vector<1x1x12x128xf32> to vector<12x128xf32>
      %c8_i32_142 = arith.constant 8 : i32
      %138 = arith.muli %100, %c8_i32_142 : i32
      %c3_i32 = arith.constant 3 : i32
      %139 = arith.addi %138, %c3_i32 : i32
      %c9_i32_143 = arith.constant 9 : i32
      %140 = arith.muli %139, %c9_i32_143 : i32
      %c0_i32_144 = arith.constant 0 : i32
      %141 = arith.addi %140, %c0_i32_144 : i32
      %c0_i32_145 = arith.constant 0 : i32
      %142 = arith.addi %141, %c0_i32_145 : i32
      %143 = arith.index_cast %142 : i32 to index
      %144 = memref.load %arg2[%143] : memref<1152xf32, #tpu.memory_space<smem>>
      %145 = vector.broadcast %144 : f32 to vector<12x128xf32>
      %146 = arith.mulf %145, %137 : vector<12x128xf32>
      %147 = arith.addf %135, %146 : vector<12x128xf32>
      %c0_146 = arith.constant 0 : index
      %c4_147 = arith.constant 4 : index
      %c0_148 = arith.constant 0 : index
      %c0_149 = arith.constant 0 : index
      %148 = vector.load %arg5[%c0_146, %c4_147, %c0_148, %c0_149] : memref<1x8x14x128xf32, #tpu.memory_space<vmem>>, vector<1x1x12x128xf32>
      %149 = vector.shape_cast %148 : vector<1x1x12x128xf32> to vector<12x128xf32>
      %c8_i32_150 = arith.constant 8 : i32
      %150 = arith.muli %100, %c8_i32_150 : i32
      %c4_i32 = arith.constant 4 : i32
      %151 = arith.addi %150, %c4_i32 : i32
      %c9_i32_151 = arith.constant 9 : i32
      %152 = arith.muli %151, %c9_i32_151 : i32
      %c0_i32_152 = arith.constant 0 : i32
      %153 = arith.addi %152, %c0_i32_152 : i32
      %c0_i32_153 = arith.constant 0 : i32
      %154 = arith.addi %153, %c0_i32_153 : i32
      %155 = arith.index_cast %154 : i32 to index
      %156 = memref.load %arg2[%155] : memref<1152xf32, #tpu.memory_space<smem>>
      %157 = vector.broadcast %156 : f32 to vector<12x128xf32>
      %158 = arith.mulf %157, %149 : vector<12x128xf32>
      %159 = arith.addf %147, %158 : vector<12x128xf32>
      %c0_154 = arith.constant 0 : index
      %c5_155 = arith.constant 5 : index
      %c0_156 = arith.constant 0 : index
      %c0_157 = arith.constant 0 : index
      %160 = vector.load %arg5[%c0_154, %c5_155, %c0_156, %c0_157] : memref<1x8x14x128xf32, #tpu.memory_space<vmem>>, vector<1x1x12x128xf32>
      %161 = vector.shape_cast %160 : vector<1x1x12x128xf32> to vector<12x128xf32>
      %c8_i32_158 = arith.constant 8 : i32
      %162 = arith.muli %100, %c8_i32_158 : i32
      %c5_i32 = arith.constant 5 : i32
      %163 = arith.addi %162, %c5_i32 : i32
      %c9_i32_159 = arith.constant 9 : i32
      %164 = arith.muli %163, %c9_i32_159 : i32
      %c0_i32_160 = arith.constant 0 : i32
      %165 = arith.addi %164, %c0_i32_160 : i32
      %c0_i32_161 = arith.constant 0 : i32
      %166 = arith.addi %165, %c0_i32_161 : i32
      %167 = arith.index_cast %166 : i32 to index
      %168 = memref.load %arg2[%167] : memref<1152xf32, #tpu.memory_space<smem>>
      %169 = vector.broadcast %168 : f32 to vector<12x128xf32>
      %170 = arith.mulf %169, %161 : vector<12x128xf32>
      %171 = arith.addf %159, %170 : vector<12x128xf32>
      %c0_162 = arith.constant 0 : index
      %c6_163 = arith.constant 6 : index
      %c0_164 = arith.constant 0 : index
      %c0_165 = arith.constant 0 : index
      %172 = vector.load %arg5[%c0_162, %c6_163, %c0_164, %c0_165] : memref<1x8x14x128xf32, #tpu.memory_space<vmem>>, vector<1x1x12x128xf32>
      %173 = vector.shape_cast %172 : vector<1x1x12x128xf32> to vector<12x128xf32>
      %c8_i32_166 = arith.constant 8 : i32
      %174 = arith.muli %100, %c8_i32_166 : i32
      %c6_i32 = arith.constant 6 : i32
      %175 = arith.addi %174, %c6_i32 : i32
      %c9_i32_167 = arith.constant 9 : i32
      %176 = arith.muli %175, %c9_i32_167 : i32
      %c0_i32_168 = arith.constant 0 : i32
      %177 = arith.addi %176, %c0_i32_168 : i32
      %c0_i32_169 = arith.constant 0 : i32
      %178 = arith.addi %177, %c0_i32_169 : i32
      %179 = arith.index_cast %178 : i32 to index
      %180 = memref.load %arg2[%179] : memref<1152xf32, #tpu.memory_space<smem>>
      %181 = vector.broadcast %180 : f32 to vector<12x128xf32>
      %182 = arith.mulf %181, %173 : vector<12x128xf32>
      %183 = arith.addf %171, %182 : vector<12x128xf32>
      %c0_170 = arith.constant 0 : index
      %c7_171 = arith.constant 7 : index
      %c0_172 = arith.constant 0 : index
      %c0_173 = arith.constant 0 : index
      %184 = vector.load %arg5[%c0_170, %c7_171, %c0_172, %c0_173] : memref<1x8x14x128xf32, #tpu.memory_space<vmem>>, vector<1x1x12x128xf32>
      %185 = vector.shape_cast %184 : vector<1x1x12x128xf32> to vector<12x128xf32>
      %c8_i32_174 = arith.constant 8 : i32
      %186 = arith.muli %100, %c8_i32_174 : i32
      %c7_i32 = arith.constant 7 : i32
      %187 = arith.addi %186, %c7_i32 : i32
      %c9_i32_175 = arith.constant 9 : i32
      %188 = arith.muli %187, %c9_i32_175 : i32
      %c0_i32_176 = arith.constant 0 : i32
      %189 = arith.addi %188, %c0_i32_176 : i32
      %c0_i32_177 = arith.constant 0 : i32
      %190 = arith.addi %189, %c0_i32_177 : i32
      %191 = arith.index_cast %190 : i32 to index
      %192 = memref.load %arg2[%191] : memref<1152xf32, #tpu.memory_space<smem>>
      %193 = vector.broadcast %192 : f32 to vector<12x128xf32>
      %194 = arith.mulf %193, %185 : vector<12x128xf32>
      %195 = arith.addf %183, %194 : vector<12x128xf32>
      %c0_178 = arith.constant 0 : index
      %c0_179 = arith.constant 0 : index
      %c0_180 = arith.constant 0 : index
      %196 = vector.load %arg7[%c0_178, %c0_179, %c0_180] : memref<16x14x128xf32, #tpu.memory_space<vmem>>, vector<1x12x128xf32>
      %197 = vector.shape_cast %196 : vector<1x12x128xf32> to vector<12x128xf32>
      %c8_i32_181 = arith.constant 8 : i32
      %198 = arith.muli %100, %c8_i32_181 : i32
      %c0_i32_182 = arith.constant 0 : i32
      %199 = arith.addi %198, %c0_i32_182 : i32
      %c9_i32_183 = arith.constant 9 : i32
      %200 = arith.muli %199, %c9_i32_183 : i32
      %c0_i32_184 = arith.constant 0 : i32
      %201 = arith.addi %200, %c0_i32_184 : i32
      %c1_i32_185 = arith.constant 1 : i32
      %202 = arith.addi %201, %c1_i32_185 : i32
      %203 = arith.index_cast %202 : i32 to index
      %204 = memref.load %arg2[%203] : memref<1152xf32, #tpu.memory_space<smem>>
      %205 = vector.broadcast %204 : f32 to vector<12x128xf32>
      %206 = arith.mulf %205, %197 : vector<12x128xf32>
      %207 = arith.addf %195, %206 : vector<12x128xf32>
      %c1_186 = arith.constant 1 : index
      %c0_187 = arith.constant 0 : index
      %c0_188 = arith.constant 0 : index
      %208 = vector.load %arg7[%c1_186, %c0_187, %c0_188] : memref<16x14x128xf32, #tpu.memory_space<vmem>>, vector<1x12x128xf32>
      %209 = vector.shape_cast %208 : vector<1x12x128xf32> to vector<12x128xf32>
      %c8_i32_189 = arith.constant 8 : i32
      %210 = arith.muli %100, %c8_i32_189 : i32
      %c1_i32_190 = arith.constant 1 : i32
      %211 = arith.addi %210, %c1_i32_190 : i32
      %c9_i32_191 = arith.constant 9 : i32
      %212 = arith.muli %211, %c9_i32_191 : i32
      %c0_i32_192 = arith.constant 0 : i32
      %213 = arith.addi %212, %c0_i32_192 : i32
      %c1_i32_193 = arith.constant 1 : i32
      %214 = arith.addi %213, %c1_i32_193 : i32
      %215 = arith.index_cast %214 : i32 to index
      %216 = memref.load %arg2[%215] : memref<1152xf32, #tpu.memory_space<smem>>
      %217 = vector.broadcast %216 : f32 to vector<12x128xf32>
      %218 = arith.mulf %217, %209 : vector<12x128xf32>
      %219 = arith.addf %207, %218 : vector<12x128xf32>
      %c2_194 = arith.constant 2 : index
      %c0_195 = arith.constant 0 : index
      %c0_196 = arith.constant 0 : index
      %220 = vector.load %arg7[%c2_194, %c0_195, %c0_196] : memref<16x14x128xf32, #tpu.memory_space<vmem>>, vector<1x12x128xf32>
      %221 = vector.shape_cast %220 : vector<1x12x128xf32> to vector<12x128xf32>
      %c8_i32_197 = arith.constant 8 : i32
      %222 = arith.muli %100, %c8_i32_197 : i32
      %c2_i32_198 = arith.constant 2 : i32
      %223 = arith.addi %222, %c2_i32_198 : i32
      %c9_i32_199 = arith.constant 9 : i32
      %224 = arith.muli %223, %c9_i32_199 : i32
      %c0_i32_200 = arith.constant 0 : i32
      %225 = arith.addi %224, %c0_i32_200 : i32
      %c1_i32_201 = arith.constant 1 : i32
      %226 = arith.addi %225, %c1_i32_201 : i32
      %227 = arith.index_cast %226 : i32 to index
      %228 = memref.load %arg2[%227] : memref<1152xf32, #tpu.memory_space<smem>>
      %229 = vector.broadcast %228 : f32 to vector<12x128xf32>
      %230 = arith.mulf %229, %221 : vector<12x128xf32>
      %231 = arith.addf %219, %230 : vector<12x128xf32>
      %c3_202 = arith.constant 3 : index
      %c0_203 = arith.constant 0 : index
      %c0_204 = arith.constant 0 : index
      %232 = vector.load %arg7[%c3_202, %c0_203, %c0_204] : memref<16x14x128xf32, #tpu.memory_space<vmem>>, vector<1x12x128xf32>
      %233 = vector.shape_cast %232 : vector<1x12x128xf32> to vector<12x128xf32>
      %c8_i32_205 = arith.constant 8 : i32
      %234 = arith.muli %100, %c8_i32_205 : i32
      %c3_i32_206 = arith.constant 3 : i32
      %235 = arith.addi %234, %c3_i32_206 : i32
      %c9_i32_207 = arith.constant 9 : i32
      %236 = arith.muli %235, %c9_i32_207 : i32
      %c0_i32_208 = arith.constant 0 : i32
      %237 = arith.addi %236, %c0_i32_208 : i32
      %c1_i32_209 = arith.constant 1 : i32
      %238 = arith.addi %237, %c1_i32_209 : i32
      %239 = arith.index_cast %238 : i32 to index
      %240 = memref.load %arg2[%239] : memref<1152xf32, #tpu.memory_space<smem>>
      %241 = vector.broadcast %240 : f32 to vector<12x128xf32>
      %242 = arith.mulf %241, %233 : vector<12x128xf32>
      %243 = arith.addf %231, %242 : vector<12x128xf32>
      %c4_210 = arith.constant 4 : index
      %c0_211 = arith.constant 0 : index
      %c0_212 = arith.constant 0 : index
      %244 = vector.load %arg7[%c4_210, %c0_211, %c0_212] : memref<16x14x128xf32, #tpu.memory_space<vmem>>, vector<1x12x128xf32>
      %245 = vector.shape_cast %244 : vector<1x12x128xf32> to vector<12x128xf32>
      %c8_i32_213 = arith.constant 8 : i32
      %246 = arith.muli %100, %c8_i32_213 : i32
      %c4_i32_214 = arith.constant 4 : i32
      %247 = arith.addi %246, %c4_i32_214 : i32
      %c9_i32_215 = arith.constant 9 : i32
      %248 = arith.muli %247, %c9_i32_215 : i32
      %c0_i32_216 = arith.constant 0 : i32
      %249 = arith.addi %248, %c0_i32_216 : i32
      %c1_i32_217 = arith.constant 1 : i32
      %250 = arith.addi %249, %c1_i32_217 : i32
      %251 = arith.index_cast %250 : i32 to index
      %252 = memref.load %arg2[%251] : memref<1152xf32, #tpu.memory_space<smem>>
      %253 = vector.broadcast %252 : f32 to vector<12x128xf32>
      %254 = arith.mulf %253, %245 : vector<12x128xf32>
      %255 = arith.addf %243, %254 : vector<12x128xf32>
      %c5_218 = arith.constant 5 : index
      %c0_219 = arith.constant 0 : index
      %c0_220 = arith.constant 0 : index
      %256 = vector.load %arg7[%c5_218, %c0_219, %c0_220] : memref<16x14x128xf32, #tpu.memory_space<vmem>>, vector<1x12x128xf32>
      %257 = vector.shape_cast %256 : vector<1x12x128xf32> to vector<12x128xf32>
      %c8_i32_221 = arith.constant 8 : i32
      %258 = arith.muli %100, %c8_i32_221 : i32
      %c5_i32_222 = arith.constant 5 : i32
      %259 = arith.addi %258, %c5_i32_222 : i32
      %c9_i32_223 = arith.constant 9 : i32
      %260 = arith.muli %259, %c9_i32_223 : i32
      %c0_i32_224 = arith.constant 0 : i32
      %261 = arith.addi %260, %c0_i32_224 : i32
      %c1_i32_225 = arith.constant 1 : i32
      %262 = arith.addi %261, %c1_i32_225 : i32
      %263 = arith.index_cast %262 : i32 to index
      %264 = memref.load %arg2[%263] : memref<1152xf32, #tpu.memory_space<smem>>
      %265 = vector.broadcast %264 : f32 to vector<12x128xf32>
      %266 = arith.mulf %265, %257 : vector<12x128xf32>
      %267 = arith.addf %255, %266 : vector<12x128xf32>
      %c6_226 = arith.constant 6 : index
      %c0_227 = arith.constant 0 : index
      %c0_228 = arith.constant 0 : index
      %268 = vector.load %arg7[%c6_226, %c0_227, %c0_228] : memref<16x14x128xf32, #tpu.memory_space<vmem>>, vector<1x12x128xf32>
      %269 = vector.shape_cast %268 : vector<1x12x128xf32> to vector<12x128xf32>
      %c8_i32_229 = arith.constant 8 : i32
      %270 = arith.muli %100, %c8_i32_229 : i32
      %c6_i32_230 = arith.constant 6 : i32
      %271 = arith.addi %270, %c6_i32_230 : i32
      %c9_i32_231 = arith.constant 9 : i32
      %272 = arith.muli %271, %c9_i32_231 : i32
      %c0_i32_232 = arith.constant 0 : i32
      %273 = arith.addi %272, %c0_i32_232 : i32
      %c1_i32_233 = arith.constant 1 : i32
      %274 = arith.addi %273, %c1_i32_233 : i32
      %275 = arith.index_cast %274 : i32 to index
      %276 = memref.load %arg2[%275] : memref<1152xf32, #tpu.memory_space<smem>>
      %277 = vector.broadcast %276 : f32 to vector<12x128xf32>
      %278 = arith.mulf %277, %269 : vector<12x128xf32>
      %279 = arith.addf %267, %278 : vector<12x128xf32>
      %c7_234 = arith.constant 7 : index
      %c0_235 = arith.constant 0 : index
      %c0_236 = arith.constant 0 : index
      %280 = vector.load %arg7[%c7_234, %c0_235, %c0_236] : memref<16x14x128xf32, #tpu.memory_space<vmem>>, vector<1x12x128xf32>
      %281 = vector.shape_cast %280 : vector<1x12x128xf32> to vector<12x128xf32>
      %c8_i32_237 = arith.constant 8 : i32
      %282 = arith.muli %100, %c8_i32_237 : i32
      %c7_i32_238 = arith.constant 7 : i32
      %283 = arith.addi %282, %c7_i32_238 : i32
      %c9_i32_239 = arith.constant 9 : i32
      %284 = arith.muli %283, %c9_i32_239 : i32
      %c0_i32_240 = arith.constant 0 : i32
      %285 = arith.addi %284, %c0_i32_240 : i32
      %c1_i32_241 = arith.constant 1 : i32
      %286 = arith.addi %285, %c1_i32_241 : i32
      %287 = arith.index_cast %286 : i32 to index
      %288 = memref.load %arg2[%287] : memref<1152xf32, #tpu.memory_space<smem>>
      %289 = vector.broadcast %288 : f32 to vector<12x128xf32>
      %290 = arith.mulf %289, %281 : vector<12x128xf32>
      %291 = arith.addf %279, %290 : vector<12x128xf32>
      %c8_242 = arith.constant 8 : index
      %c0_243 = arith.constant 0 : index
      %c0_244 = arith.constant 0 : index
      %292 = vector.load %arg7[%c8_242, %c0_243, %c0_244] : memref<16x14x128xf32, #tpu.memory_space<vmem>>, vector<1x12x128xf32>
      %293 = vector.shape_cast %292 : vector<1x12x128xf32> to vector<12x128xf32>
      %c8_i32_245 = arith.constant 8 : i32
      %294 = arith.muli %100, %c8_i32_245 : i32
      %c0_i32_246 = arith.constant 0 : i32
      %295 = arith.addi %294, %c0_i32_246 : i32
      %c9_i32_247 = arith.constant 9 : i32
      %296 = arith.muli %295, %c9_i32_247 : i32
      %c0_i32_248 = arith.constant 0 : i32
      %297 = arith.addi %296, %c0_i32_248 : i32
      %c2_i32_249 = arith.constant 2 : i32
      %298 = arith.addi %297, %c2_i32_249 : i32
      %299 = arith.index_cast %298 : i32 to index
      %300 = memref.load %arg2[%299] : memref<1152xf32, #tpu.memory_space<smem>>
      %301 = vector.broadcast %300 : f32 to vector<12x128xf32>
      %302 = arith.mulf %301, %293 : vector<12x128xf32>
      %303 = arith.addf %291, %302 : vector<12x128xf32>
      %c9_250 = arith.constant 9 : index
      %c0_251 = arith.constant 0 : index
      %c0_252 = arith.constant 0 : index
      %304 = vector.load %arg7[%c9_250, %c0_251, %c0_252] : memref<16x14x128xf32, #tpu.memory_space<vmem>>, vector<1x12x128xf32>
      %305 = vector.shape_cast %304 : vector<1x12x128xf32> to vector<12x128xf32>
      %c8_i32_253 = arith.constant 8 : i32
      %306 = arith.muli %100, %c8_i32_253 : i32
      %c1_i32_254 = arith.constant 1 : i32
      %307 = arith.addi %306, %c1_i32_254 : i32
      %c9_i32_255 = arith.constant 9 : i32
      %308 = arith.muli %307, %c9_i32_255 : i32
      %c0_i32_256 = arith.constant 0 : i32
      %309 = arith.addi %308, %c0_i32_256 : i32
      %c2_i32_257 = arith.constant 2 : i32
      %310 = arith.addi %309, %c2_i32_257 : i32
      %311 = arith.index_cast %310 : i32 to index
      %312 = memref.load %arg2[%311] : memref<1152xf32, #tpu.memory_space<smem>>
      %313 = vector.broadcast %312 : f32 to vector<12x128xf32>
      %314 = arith.mulf %313, %305 : vector<12x128xf32>
      %315 = arith.addf %303, %314 : vector<12x128xf32>
      %c10_258 = arith.constant 10 : index
      %c0_259 = arith.constant 0 : index
      %c0_260 = arith.constant 0 : index
      %316 = vector.load %arg7[%c10_258, %c0_259, %c0_260] : memref<16x14x128xf32, #tpu.memory_space<vmem>>, vector<1x12x128xf32>
      %317 = vector.shape_cast %316 : vector<1x12x128xf32> to vector<12x128xf32>
      %c8_i32_261 = arith.constant 8 : i32
      %318 = arith.muli %100, %c8_i32_261 : i32
      %c2_i32_262 = arith.constant 2 : i32
      %319 = arith.addi %318, %c2_i32_262 : i32
      %c9_i32_263 = arith.constant 9 : i32
      %320 = arith.muli %319, %c9_i32_263 : i32
      %c0_i32_264 = arith.constant 0 : i32
      %321 = arith.addi %320, %c0_i32_264 : i32
      %c2_i32_265 = arith.constant 2 : i32
      %322 = arith.addi %321, %c2_i32_265 : i32
      %323 = arith.index_cast %322 : i32 to index
      %324 = memref.load %arg2[%323] : memref<1152xf32, #tpu.memory_space<smem>>
      %325 = vector.broadcast %324 : f32 to vector<12x128xf32>
      %326 = arith.mulf %325, %317 : vector<12x128xf32>
      %327 = arith.addf %315, %326 : vector<12x128xf32>
      %c11_266 = arith.constant 11 : index
      %c0_267 = arith.constant 0 : index
      %c0_268 = arith.constant 0 : index
      %328 = vector.load %arg7[%c11_266, %c0_267, %c0_268] : memref<16x14x128xf32, #tpu.memory_space<vmem>>, vector<1x12x128xf32>
      %329 = vector.shape_cast %328 : vector<1x12x128xf32> to vector<12x128xf32>
      %c8_i32_269 = arith.constant 8 : i32
      %330 = arith.muli %100, %c8_i32_269 : i32
      %c3_i32_270 = arith.constant 3 : i32
      %331 = arith.addi %330, %c3_i32_270 : i32
      %c9_i32_271 = arith.constant 9 : i32
      %332 = arith.muli %331, %c9_i32_271 : i32
      %c0_i32_272 = arith.constant 0 : i32
      %333 = arith.addi %332, %c0_i32_272 : i32
      %c2_i32_273 = arith.constant 2 : i32
      %334 = arith.addi %333, %c2_i32_273 : i32
      %335 = arith.index_cast %334 : i32 to index
      %336 = memref.load %arg2[%335] : memref<1152xf32, #tpu.memory_space<smem>>
      %337 = vector.broadcast %336 : f32 to vector<12x128xf32>
      %338 = arith.mulf %337, %329 : vector<12x128xf32>
      %339 = arith.addf %327, %338 : vector<12x128xf32>
      %c12_274 = arith.constant 12 : index
      %c0_275 = arith.constant 0 : index
      %c0_276 = arith.constant 0 : index
      %340 = vector.load %arg7[%c12_274, %c0_275, %c0_276] : memref<16x14x128xf32, #tpu.memory_space<vmem>>, vector<1x12x128xf32>
      %341 = vector.shape_cast %340 : vector<1x12x128xf32> to vector<12x128xf32>
      %c8_i32_277 = arith.constant 8 : i32
      %342 = arith.muli %100, %c8_i32_277 : i32
      %c4_i32_278 = arith.constant 4 : i32
      %343 = arith.addi %342, %c4_i32_278 : i32
      %c9_i32_279 = arith.constant 9 : i32
      %344 = arith.muli %343, %c9_i32_279 : i32
      %c0_i32_280 = arith.constant 0 : i32
      %345 = arith.addi %344, %c0_i32_280 : i32
      %c2_i32_281 = arith.constant 2 : i32
      %346 = arith.addi %345, %c2_i32_281 : i32
      %347 = arith.index_cast %346 : i32 to index
      %348 = memref.load %arg2[%347] : memref<1152xf32, #tpu.memory_space<smem>>
      %349 = vector.broadcast %348 : f32 to vector<12x128xf32>
      %350 = arith.mulf %349, %341 : vector<12x128xf32>
      %351 = arith.addf %339, %350 : vector<12x128xf32>
      %c13_282 = arith.constant 13 : index
      %c0_283 = arith.constant 0 : index
      %c0_284 = arith.constant 0 : index
      %352 = vector.load %arg7[%c13_282, %c0_283, %c0_284] : memref<16x14x128xf32, #tpu.memory_space<vmem>>, vector<1x12x128xf32>
      %353 = vector.shape_cast %352 : vector<1x12x128xf32> to vector<12x128xf32>
      %c8_i32_285 = arith.constant 8 : i32
      %354 = arith.muli %100, %c8_i32_285 : i32
      %c5_i32_286 = arith.constant 5 : i32
      %355 = arith.addi %354, %c5_i32_286 : i32
      %c9_i32_287 = arith.constant 9 : i32
      %356 = arith.muli %355, %c9_i32_287 : i32
      %c0_i32_288 = arith.constant 0 : i32
      %357 = arith.addi %356, %c0_i32_288 : i32
      %c2_i32_289 = arith.constant 2 : i32
      %358 = arith.addi %357, %c2_i32_289 : i32
      %359 = arith.index_cast %358 : i32 to index
      %360 = memref.load %arg2[%359] : memref<1152xf32, #tpu.memory_space<smem>>
      %361 = vector.broadcast %360 : f32 to vector<12x128xf32>
      %362 = arith.mulf %361, %353 : vector<12x128xf32>
      %363 = arith.addf %351, %362 : vector<12x128xf32>
      %c14_290 = arith.constant 14 : index
      %c0_291 = arith.constant 0 : index
      %c0_292 = arith.constant 0 : index
      %364 = vector.load %arg7[%c14_290, %c0_291, %c0_292] : memref<16x14x128xf32, #tpu.memory_space<vmem>>, vector<1x12x128xf32>
      %365 = vector.shape_cast %364 : vector<1x12x128xf32> to vector<12x128xf32>
      %c8_i32_293 = arith.constant 8 : i32
      %366 = arith.muli %100, %c8_i32_293 : i32
      %c6_i32_294 = arith.constant 6 : i32
      %367 = arith.addi %366, %c6_i32_294 : i32
      %c9_i32_295 = arith.constant 9 : i32
      %368 = arith.muli %367, %c9_i32_295 : i32
      %c0_i32_296 = arith.constant 0 : i32
      %369 = arith.addi %368, %c0_i32_296 : i32
      %c2_i32_297 = arith.constant 2 : i32
      %370 = arith.addi %369, %c2_i32_297 : i32
      %371 = arith.index_cast %370 : i32 to index
      %372 = memref.load %arg2[%371] : memref<1152xf32, #tpu.memory_space<smem>>
      %373 = vector.broadcast %372 : f32 to vector<12x128xf32>
      %374 = arith.mulf %373, %365 : vector<12x128xf32>
      %375 = arith.addf %363, %374 : vector<12x128xf32>
      %c15_298 = arith.constant 15 : index
      %c0_299 = arith.constant 0 : index
      %c0_300 = arith.constant 0 : index
      %376 = vector.load %arg7[%c15_298, %c0_299, %c0_300] : memref<16x14x128xf32, #tpu.memory_space<vmem>>, vector<1x12x128xf32>
      %377 = vector.shape_cast %376 : vector<1x12x128xf32> to vector<12x128xf32>
      %c8_i32_301 = arith.constant 8 : i32
      %378 = arith.muli %100, %c8_i32_301 : i32
      %c7_i32_302 = arith.constant 7 : i32
      %379 = arith.addi %378, %c7_i32_302 : i32
      %c9_i32_303 = arith.constant 9 : i32
      %380 = arith.muli %379, %c9_i32_303 : i32
      %c0_i32_304 = arith.constant 0 : i32
      %381 = arith.addi %380, %c0_i32_304 : i32
      %c2_i32_305 = arith.constant 2 : i32
      %382 = arith.addi %381, %c2_i32_305 : i32
      %383 = arith.index_cast %382 : i32 to index
      %384 = memref.load %arg2[%383] : memref<1152xf32, #tpu.memory_space<smem>>
      %385 = vector.broadcast %384 : f32 to vector<12x128xf32>
      %386 = arith.mulf %385, %377 : vector<12x128xf32>
      %387 = arith.addf %375, %386 : vector<12x128xf32>
      %c0_306 = arith.constant 0 : index
      %c0_307 = arith.constant 0 : index
      %c1_308 = arith.constant 1 : index
      %c0_309 = arith.constant 0 : index
      %388 = vector.load %arg5[%c0_306, %c0_307, %c1_308, %c0_309] : memref<1x8x14x128xf32, #tpu.memory_space<vmem>>, vector<1x1x12x128xf32>
      %389 = vector.shape_cast %388 : vector<1x1x12x128xf32> to vector<12x128xf32>
      %c8_i32_310 = arith.constant 8 : i32
      %390 = arith.muli %100, %c8_i32_310 : i32
      %c0_i32_311 = arith.constant 0 : i32
      %391 = arith.addi %390, %c0_i32_311 : i32
      %c9_i32_312 = arith.constant 9 : i32
      %392 = arith.muli %391, %c9_i32_312 : i32
      %c3_i32_313 = arith.constant 3 : i32
      %393 = arith.addi %392, %c3_i32_313 : i32
      %c0_i32_314 = arith.constant 0 : i32
      %394 = arith.addi %393, %c0_i32_314 : i32
      %395 = arith.index_cast %394 : i32 to index
      %396 = memref.load %arg2[%395] : memref<1152xf32, #tpu.memory_space<smem>>
      %397 = vector.broadcast %396 : f32 to vector<12x128xf32>
      %398 = arith.mulf %397, %389 : vector<12x128xf32>
      %399 = arith.addf %387, %398 : vector<12x128xf32>
      %c0_315 = arith.constant 0 : index
      %c1_316 = arith.constant 1 : index
      %c1_317 = arith.constant 1 : index
      %c0_318 = arith.constant 0 : index
      %400 = vector.load %arg5[%c0_315, %c1_316, %c1_317, %c0_318] : memref<1x8x14x128xf32, #tpu.memory_space<vmem>>, vector<1x1x12x128xf32>
      %401 = vector.shape_cast %400 : vector<1x1x12x128xf32> to vector<12x128xf32>
      %c8_i32_319 = arith.constant 8 : i32
      %402 = arith.muli %100, %c8_i32_319 : i32
      %c1_i32_320 = arith.constant 1 : i32
      %403 = arith.addi %402, %c1_i32_320 : i32
      %c9_i32_321 = arith.constant 9 : i32
      %404 = arith.muli %403, %c9_i32_321 : i32
      %c3_i32_322 = arith.constant 3 : i32
      %405 = arith.addi %404, %c3_i32_322 : i32
      %c0_i32_323 = arith.constant 0 : i32
      %406 = arith.addi %405, %c0_i32_323 : i32
      %407 = arith.index_cast %406 : i32 to index
      %408 = memref.load %arg2[%407] : memref<1152xf32, #tpu.memory_space<smem>>
      %409 = vector.broadcast %408 : f32 to vector<12x128xf32>
      %410 = arith.mulf %409, %401 : vector<12x128xf32>
      %411 = arith.addf %399, %410 : vector<12x128xf32>
      %c0_324 = arith.constant 0 : index
      %c2_325 = arith.constant 2 : index
      %c1_326 = arith.constant 1 : index
      %c0_327 = arith.constant 0 : index
      %412 = vector.load %arg5[%c0_324, %c2_325, %c1_326, %c0_327] : memref<1x8x14x128xf32, #tpu.memory_space<vmem>>, vector<1x1x12x128xf32>
      %413 = vector.shape_cast %412 : vector<1x1x12x128xf32> to vector<12x128xf32>
      %c8_i32_328 = arith.constant 8 : i32
      %414 = arith.muli %100, %c8_i32_328 : i32
      %c2_i32_329 = arith.constant 2 : i32
      %415 = arith.addi %414, %c2_i32_329 : i32
      %c9_i32_330 = arith.constant 9 : i32
      %416 = arith.muli %415, %c9_i32_330 : i32
      %c3_i32_331 = arith.constant 3 : i32
      %417 = arith.addi %416, %c3_i32_331 : i32
      %c0_i32_332 = arith.constant 0 : i32
      %418 = arith.addi %417, %c0_i32_332 : i32
      %419 = arith.index_cast %418 : i32 to index
      %420 = memref.load %arg2[%419] : memref<1152xf32, #tpu.memory_space<smem>>
      %421 = vector.broadcast %420 : f32 to vector<12x128xf32>
      %422 = arith.mulf %421, %413 : vector<12x128xf32>
      %423 = arith.addf %411, %422 : vector<12x128xf32>
      %c0_333 = arith.constant 0 : index
      %c3_334 = arith.constant 3 : index
      %c1_335 = arith.constant 1 : index
      %c0_336 = arith.constant 0 : index
      %424 = vector.load %arg5[%c0_333, %c3_334, %c1_335, %c0_336] : memref<1x8x14x128xf32, #tpu.memory_space<vmem>>, vector<1x1x12x128xf32>
      %425 = vector.shape_cast %424 : vector<1x1x12x128xf32> to vector<12x128xf32>
      %c8_i32_337 = arith.constant 8 : i32
      %426 = arith.muli %100, %c8_i32_337 : i32
      %c3_i32_338 = arith.constant 3 : i32
      %427 = arith.addi %426, %c3_i32_338 : i32
      %c9_i32_339 = arith.constant 9 : i32
      %428 = arith.muli %427, %c9_i32_339 : i32
      %c3_i32_340 = arith.constant 3 : i32
      %429 = arith.addi %428, %c3_i32_340 : i32
      %c0_i32_341 = arith.constant 0 : i32
      %430 = arith.addi %429, %c0_i32_341 : i32
      %431 = arith.index_cast %430 : i32 to index
      %432 = memref.load %arg2[%431] : memref<1152xf32, #tpu.memory_space<smem>>
      %433 = vector.broadcast %432 : f32 to vector<12x128xf32>
      %434 = arith.mulf %433, %425 : vector<12x128xf32>
      %435 = arith.addf %423, %434 : vector<12x128xf32>
      %c0_342 = arith.constant 0 : index
      %c4_343 = arith.constant 4 : index
      %c1_344 = arith.constant 1 : index
      %c0_345 = arith.constant 0 : index
      %436 = vector.load %arg5[%c0_342, %c4_343, %c1_344, %c0_345] : memref<1x8x14x128xf32, #tpu.memory_space<vmem>>, vector<1x1x12x128xf32>
      %437 = vector.shape_cast %436 : vector<1x1x12x128xf32> to vector<12x128xf32>
      %c8_i32_346 = arith.constant 8 : i32
      %438 = arith.muli %100, %c8_i32_346 : i32
      %c4_i32_347 = arith.constant 4 : i32
      %439 = arith.addi %438, %c4_i32_347 : i32
      %c9_i32_348 = arith.constant 9 : i32
      %440 = arith.muli %439, %c9_i32_348 : i32
      %c3_i32_349 = arith.constant 3 : i32
      %441 = arith.addi %440, %c3_i32_349 : i32
      %c0_i32_350 = arith.constant 0 : i32
      %442 = arith.addi %441, %c0_i32_350 : i32
      %443 = arith.index_cast %442 : i32 to index
      %444 = memref.load %arg2[%443] : memref<1152xf32, #tpu.memory_space<smem>>
      %445 = vector.broadcast %444 : f32 to vector<12x128xf32>
      %446 = arith.mulf %445, %437 : vector<12x128xf32>
      %447 = arith.addf %435, %446 : vector<12x128xf32>
      %c0_351 = arith.constant 0 : index
      %c5_352 = arith.constant 5 : index
      %c1_353 = arith.constant 1 : index
      %c0_354 = arith.constant 0 : index
      %448 = vector.load %arg5[%c0_351, %c5_352, %c1_353, %c0_354] : memref<1x8x14x128xf32, #tpu.memory_space<vmem>>, vector<1x1x12x128xf32>
      %449 = vector.shape_cast %448 : vector<1x1x12x128xf32> to vector<12x128xf32>
      %c8_i32_355 = arith.constant 8 : i32
      %450 = arith.muli %100, %c8_i32_355 : i32
      %c5_i32_356 = arith.constant 5 : i32
      %451 = arith.addi %450, %c5_i32_356 : i32
      %c9_i32_357 = arith.constant 9 : i32
      %452 = arith.muli %451, %c9_i32_357 : i32
      %c3_i32_358 = arith.constant 3 : i32
      %453 = arith.addi %452, %c3_i32_358 : i32
      %c0_i32_359 = arith.constant 0 : i32
      %454 = arith.addi %453, %c0_i32_359 : i32
      %455 = arith.index_cast %454 : i32 to index
      %456 = memref.load %arg2[%455] : memref<1152xf32, #tpu.memory_space<smem>>
      %457 = vector.broadcast %456 : f32 to vector<12x128xf32>
      %458 = arith.mulf %457, %449 : vector<12x128xf32>
      %459 = arith.addf %447, %458 : vector<12x128xf32>
      %c0_360 = arith.constant 0 : index
      %c6_361 = arith.constant 6 : index
      %c1_362 = arith.constant 1 : index
      %c0_363 = arith.constant 0 : index
      %460 = vector.load %arg5[%c0_360, %c6_361, %c1_362, %c0_363] : memref<1x8x14x128xf32, #tpu.memory_space<vmem>>, vector<1x1x12x128xf32>
      %461 = vector.shape_cast %460 : vector<1x1x12x128xf32> to vector<12x128xf32>
      %c8_i32_364 = arith.constant 8 : i32
      %462 = arith.muli %100, %c8_i32_364 : i32
      %c6_i32_365 = arith.constant 6 : i32
      %463 = arith.addi %462, %c6_i32_365 : i32
      %c9_i32_366 = arith.constant 9 : i32
      %464 = arith.muli %463, %c9_i32_366 : i32
      %c3_i32_367 = arith.constant 3 : i32
      %465 = arith.addi %464, %c3_i32_367 : i32
      %c0_i32_368 = arith.constant 0 : i32
      %466 = arith.addi %465, %c0_i32_368 : i32
      %467 = arith.index_cast %466 : i32 to index
      %468 = memref.load %arg2[%467] : memref<1152xf32, #tpu.memory_space<smem>>
      %469 = vector.broadcast %468 : f32 to vector<12x128xf32>
      %470 = arith.mulf %469, %461 : vector<12x128xf32>
      %471 = arith.addf %459, %470 : vector<12x128xf32>
      %c0_369 = arith.constant 0 : index
      %c7_370 = arith.constant 7 : index
      %c1_371 = arith.constant 1 : index
      %c0_372 = arith.constant 0 : index
      %472 = vector.load %arg5[%c0_369, %c7_370, %c1_371, %c0_372] : memref<1x8x14x128xf32, #tpu.memory_space<vmem>>, vector<1x1x12x128xf32>
      %473 = vector.shape_cast %472 : vector<1x1x12x128xf32> to vector<12x128xf32>
      %c8_i32_373 = arith.constant 8 : i32
      %474 = arith.muli %100, %c8_i32_373 : i32
      %c7_i32_374 = arith.constant 7 : i32
      %475 = arith.addi %474, %c7_i32_374 : i32
      %c9_i32_375 = arith.constant 9 : i32
      %476 = arith.muli %475, %c9_i32_375 : i32
      %c3_i32_376 = arith.constant 3 : i32
      %477 = arith.addi %476, %c3_i32_376 : i32
      %c0_i32_377 = arith.constant 0 : i32
      %478 = arith.addi %477, %c0_i32_377 : i32
      %479 = arith.index_cast %478 : i32 to index
      %480 = memref.load %arg2[%479] : memref<1152xf32, #tpu.memory_space<smem>>
      %481 = vector.broadcast %480 : f32 to vector<12x128xf32>
      %482 = arith.mulf %481, %473 : vector<12x128xf32>
      %483 = arith.addf %471, %482 : vector<12x128xf32>
      %c0_378 = arith.constant 0 : index
      %c1_379 = arith.constant 1 : index
      %c0_380 = arith.constant 0 : index
      %484 = vector.load %arg7[%c0_378, %c1_379, %c0_380] : memref<16x14x128xf32, #tpu.memory_space<vmem>>, vector<1x12x128xf32>
      %485 = vector.shape_cast %484 : vector<1x12x128xf32> to vector<12x128xf32>
      %c8_i32_381 = arith.constant 8 : i32
      %486 = arith.muli %100, %c8_i32_381 : i32
      %c0_i32_382 = arith.constant 0 : i32
      %487 = arith.addi %486, %c0_i32_382 : i32
      %c9_i32_383 = arith.constant 9 : i32
      %488 = arith.muli %487, %c9_i32_383 : i32
      %c3_i32_384 = arith.constant 3 : i32
      %489 = arith.addi %488, %c3_i32_384 : i32
      %c1_i32_385 = arith.constant 1 : i32
      %490 = arith.addi %489, %c1_i32_385 : i32
      %491 = arith.index_cast %490 : i32 to index
      %492 = memref.load %arg2[%491] : memref<1152xf32, #tpu.memory_space<smem>>
      %493 = vector.broadcast %492 : f32 to vector<12x128xf32>
      %494 = arith.mulf %493, %485 : vector<12x128xf32>
      %495 = arith.addf %483, %494 : vector<12x128xf32>
      %c1_386 = arith.constant 1 : index
      %c1_387 = arith.constant 1 : index
      %c0_388 = arith.constant 0 : index
      %496 = vector.load %arg7[%c1_386, %c1_387, %c0_388] : memref<16x14x128xf32, #tpu.memory_space<vmem>>, vector<1x12x128xf32>
      %497 = vector.shape_cast %496 : vector<1x12x128xf32> to vector<12x128xf32>
      %c8_i32_389 = arith.constant 8 : i32
      %498 = arith.muli %100, %c8_i32_389 : i32
      %c1_i32_390 = arith.constant 1 : i32
      %499 = arith.addi %498, %c1_i32_390 : i32
      %c9_i32_391 = arith.constant 9 : i32
      %500 = arith.muli %499, %c9_i32_391 : i32
      %c3_i32_392 = arith.constant 3 : i32
      %501 = arith.addi %500, %c3_i32_392 : i32
      %c1_i32_393 = arith.constant 1 : i32
      %502 = arith.addi %501, %c1_i32_393 : i32
      %503 = arith.index_cast %502 : i32 to index
      %504 = memref.load %arg2[%503] : memref<1152xf32, #tpu.memory_space<smem>>
      %505 = vector.broadcast %504 : f32 to vector<12x128xf32>
      %506 = arith.mulf %505, %497 : vector<12x128xf32>
      %507 = arith.addf %495, %506 : vector<12x128xf32>
      %c2_394 = arith.constant 2 : index
      %c1_395 = arith.constant 1 : index
      %c0_396 = arith.constant 0 : index
      %508 = vector.load %arg7[%c2_394, %c1_395, %c0_396] : memref<16x14x128xf32, #tpu.memory_space<vmem>>, vector<1x12x128xf32>
      %509 = vector.shape_cast %508 : vector<1x12x128xf32> to vector<12x128xf32>
      %c8_i32_397 = arith.constant 8 : i32
      %510 = arith.muli %100, %c8_i32_397 : i32
      %c2_i32_398 = arith.constant 2 : i32
      %511 = arith.addi %510, %c2_i32_398 : i32
      %c9_i32_399 = arith.constant 9 : i32
      %512 = arith.muli %511, %c9_i32_399 : i32
      %c3_i32_400 = arith.constant 3 : i32
      %513 = arith.addi %512, %c3_i32_400 : i32
      %c1_i32_401 = arith.constant 1 : i32
      %514 = arith.addi %513, %c1_i32_401 : i32
      %515 = arith.index_cast %514 : i32 to index
      %516 = memref.load %arg2[%515] : memref<1152xf32, #tpu.memory_space<smem>>
      %517 = vector.broadcast %516 : f32 to vector<12x128xf32>
      %518 = arith.mulf %517, %509 : vector<12x128xf32>
      %519 = arith.addf %507, %518 : vector<12x128xf32>
      %c3_402 = arith.constant 3 : index
      %c1_403 = arith.constant 1 : index
      %c0_404 = arith.constant 0 : index
      %520 = vector.load %arg7[%c3_402, %c1_403, %c0_404] : memref<16x14x128xf32, #tpu.memory_space<vmem>>, vector<1x12x128xf32>
      %521 = vector.shape_cast %520 : vector<1x12x128xf32> to vector<12x128xf32>
      %c8_i32_405 = arith.constant 8 : i32
      %522 = arith.muli %100, %c8_i32_405 : i32
      %c3_i32_406 = arith.constant 3 : i32
      %523 = arith.addi %522, %c3_i32_406 : i32
      %c9_i32_407 = arith.constant 9 : i32
      %524 = arith.muli %523, %c9_i32_407 : i32
      %c3_i32_408 = arith.constant 3 : i32
      %525 = arith.addi %524, %c3_i32_408 : i32
      %c1_i32_409 = arith.constant 1 : i32
      %526 = arith.addi %525, %c1_i32_409 : i32
      %527 = arith.index_cast %526 : i32 to index
      %528 = memref.load %arg2[%527] : memref<1152xf32, #tpu.memory_space<smem>>
      %529 = vector.broadcast %528 : f32 to vector<12x128xf32>
      %530 = arith.mulf %529, %521 : vector<12x128xf32>
      %531 = arith.addf %519, %530 : vector<12x128xf32>
      %c4_410 = arith.constant 4 : index
      %c1_411 = arith.constant 1 : index
      %c0_412 = arith.constant 0 : index
      %532 = vector.load %arg7[%c4_410, %c1_411, %c0_412] : memref<16x14x128xf32, #tpu.memory_space<vmem>>, vector<1x12x128xf32>
      %533 = vector.shape_cast %532 : vector<1x12x128xf32> to vector<12x128xf32>
      %c8_i32_413 = arith.constant 8 : i32
      %534 = arith.muli %100, %c8_i32_413 : i32
      %c4_i32_414 = arith.constant 4 : i32
      %535 = arith.addi %534, %c4_i32_414 : i32
      %c9_i32_415 = arith.constant 9 : i32
      %536 = arith.muli %535, %c9_i32_415 : i32
      %c3_i32_416 = arith.constant 3 : i32
      %537 = arith.addi %536, %c3_i32_416 : i32
      %c1_i32_417 = arith.constant 1 : i32
      %538 = arith.addi %537, %c1_i32_417 : i32
      %539 = arith.index_cast %538 : i32 to index
      %540 = memref.load %arg2[%539] : memref<1152xf32, #tpu.memory_space<smem>>
      %541 = vector.broadcast %540 : f32 to vector<12x128xf32>
      %542 = arith.mulf %541, %533 : vector<12x128xf32>
      %543 = arith.addf %531, %542 : vector<12x128xf32>
      %c5_418 = arith.constant 5 : index
      %c1_419 = arith.constant 1 : index
      %c0_420 = arith.constant 0 : index
      %544 = vector.load %arg7[%c5_418, %c1_419, %c0_420] : memref<16x14x128xf32, #tpu.memory_space<vmem>>, vector<1x12x128xf32>
      %545 = vector.shape_cast %544 : vector<1x12x128xf32> to vector<12x128xf32>
      %c8_i32_421 = arith.constant 8 : i32
      %546 = arith.muli %100, %c8_i32_421 : i32
      %c5_i32_422 = arith.constant 5 : i32
      %547 = arith.addi %546, %c5_i32_422 : i32
      %c9_i32_423 = arith.constant 9 : i32
      %548 = arith.muli %547, %c9_i32_423 : i32
      %c3_i32_424 = arith.constant 3 : i32
      %549 = arith.addi %548, %c3_i32_424 : i32
      %c1_i32_425 = arith.constant 1 : i32
      %550 = arith.addi %549, %c1_i32_425 : i32
      %551 = arith.index_cast %550 : i32 to index
      %552 = memref.load %arg2[%551] : memref<1152xf32, #tpu.memory_space<smem>>
      %553 = vector.broadcast %552 : f32 to vector<12x128xf32>
      %554 = arith.mulf %553, %545 : vector<12x128xf32>
      %555 = arith.addf %543, %554 : vector<12x128xf32>
      %c6_426 = arith.constant 6 : index
      %c1_427 = arith.constant 1 : index
      %c0_428 = arith.constant 0 : index
      %556 = vector.load %arg7[%c6_426, %c1_427, %c0_428] : memref<16x14x128xf32, #tpu.memory_space<vmem>>, vector<1x12x128xf32>
      %557 = vector.shape_cast %556 : vector<1x12x128xf32> to vector<12x128xf32>
      %c8_i32_429 = arith.constant 8 : i32
      %558 = arith.muli %100, %c8_i32_429 : i32
      %c6_i32_430 = arith.constant 6 : i32
      %559 = arith.addi %558, %c6_i32_430 : i32
      %c9_i32_431 = arith.constant 9 : i32
      %560 = arith.muli %559, %c9_i32_431 : i32
      %c3_i32_432 = arith.constant 3 : i32
      %561 = arith.addi %560, %c3_i32_432 : i32
      %c1_i32_433 = arith.constant 1 : i32
      %562 = arith.addi %561, %c1_i32_433 : i32
      %563 = arith.index_cast %562 : i32 to index
      %564 = memref.load %arg2[%563] : memref<1152xf32, #tpu.memory_space<smem>>
      %565 = vector.broadcast %564 : f32 to vector<12x128xf32>
      %566 = arith.mulf %565, %557 : vector<12x128xf32>
      %567 = arith.addf %555, %566 : vector<12x128xf32>
      %c7_434 = arith.constant 7 : index
      %c1_435 = arith.constant 1 : index
      %c0_436 = arith.constant 0 : index
      %568 = vector.load %arg7[%c7_434, %c1_435, %c0_436] : memref<16x14x128xf32, #tpu.memory_space<vmem>>, vector<1x12x128xf32>
      %569 = vector.shape_cast %568 : vector<1x12x128xf32> to vector<12x128xf32>
      %c8_i32_437 = arith.constant 8 : i32
      %570 = arith.muli %100, %c8_i32_437 : i32
      %c7_i32_438 = arith.constant 7 : i32
      %571 = arith.addi %570, %c7_i32_438 : i32
      %c9_i32_439 = arith.constant 9 : i32
      %572 = arith.muli %571, %c9_i32_439 : i32
      %c3_i32_440 = arith.constant 3 : i32
      %573 = arith.addi %572, %c3_i32_440 : i32
      %c1_i32_441 = arith.constant 1 : i32
      %574 = arith.addi %573, %c1_i32_441 : i32
      %575 = arith.index_cast %574 : i32 to index
      %576 = memref.load %arg2[%575] : memref<1152xf32, #tpu.memory_space<smem>>
      %577 = vector.broadcast %576 : f32 to vector<12x128xf32>
      %578 = arith.mulf %577, %569 : vector<12x128xf32>
      %579 = arith.addf %567, %578 : vector<12x128xf32>
      %c8_442 = arith.constant 8 : index
      %c1_443 = arith.constant 1 : index
      %c0_444 = arith.constant 0 : index
      %580 = vector.load %arg7[%c8_442, %c1_443, %c0_444] : memref<16x14x128xf32, #tpu.memory_space<vmem>>, vector<1x12x128xf32>
      %581 = vector.shape_cast %580 : vector<1x12x128xf32> to vector<12x128xf32>
      %c8_i32_445 = arith.constant 8 : i32
      %582 = arith.muli %100, %c8_i32_445 : i32
      %c0_i32_446 = arith.constant 0 : i32
      %583 = arith.addi %582, %c0_i32_446 : i32
      %c9_i32_447 = arith.constant 9 : i32
      %584 = arith.muli %583, %c9_i32_447 : i32
      %c3_i32_448 = arith.constant 3 : i32
      %585 = arith.addi %584, %c3_i32_448 : i32
      %c2_i32_449 = arith.constant 2 : i32
      %586 = arith.addi %585, %c2_i32_449 : i32
      %587 = arith.index_cast %586 : i32 to index
      %588 = memref.load %arg2[%587] : memref<1152xf32, #tpu.memory_space<smem>>
      %589 = vector.broadcast %588 : f32 to vector<12x128xf32>
      %590 = arith.mulf %589, %581 : vector<12x128xf32>
      %591 = arith.addf %579, %590 : vector<12x128xf32>
      %c9_450 = arith.constant 9 : index
      %c1_451 = arith.constant 1 : index
      %c0_452 = arith.constant 0 : index
      %592 = vector.load %arg7[%c9_450, %c1_451, %c0_452] : memref<16x14x128xf32, #tpu.memory_space<vmem>>, vector<1x12x128xf32>
      %593 = vector.shape_cast %592 : vector<1x12x128xf32> to vector<12x128xf32>
      %c8_i32_453 = arith.constant 8 : i32
      %594 = arith.muli %100, %c8_i32_453 : i32
      %c1_i32_454 = arith.constant 1 : i32
      %595 = arith.addi %594, %c1_i32_454 : i32
      %c9_i32_455 = arith.constant 9 : i32
      %596 = arith.muli %595, %c9_i32_455 : i32
      %c3_i32_456 = arith.constant 3 : i32
      %597 = arith.addi %596, %c3_i32_456 : i32
      %c2_i32_457 = arith.constant 2 : i32
      %598 = arith.addi %597, %c2_i32_457 : i32
      %599 = arith.index_cast %598 : i32 to index
      %600 = memref.load %arg2[%599] : memref<1152xf32, #tpu.memory_space<smem>>
      %601 = vector.broadcast %600 : f32 to vector<12x128xf32>
      %602 = arith.mulf %601, %593 : vector<12x128xf32>
      %603 = arith.addf %591, %602 : vector<12x128xf32>
      %c10_458 = arith.constant 10 : index
      %c1_459 = arith.constant 1 : index
      %c0_460 = arith.constant 0 : index
      %604 = vector.load %arg7[%c10_458, %c1_459, %c0_460] : memref<16x14x128xf32, #tpu.memory_space<vmem>>, vector<1x12x128xf32>
      %605 = vector.shape_cast %604 : vector<1x12x128xf32> to vector<12x128xf32>
      %c8_i32_461 = arith.constant 8 : i32
      %606 = arith.muli %100, %c8_i32_461 : i32
      %c2_i32_462 = arith.constant 2 : i32
      %607 = arith.addi %606, %c2_i32_462 : i32
      %c9_i32_463 = arith.constant 9 : i32
      %608 = arith.muli %607, %c9_i32_463 : i32
      %c3_i32_464 = arith.constant 3 : i32
      %609 = arith.addi %608, %c3_i32_464 : i32
      %c2_i32_465 = arith.constant 2 : i32
      %610 = arith.addi %609, %c2_i32_465 : i32
      %611 = arith.index_cast %610 : i32 to index
      %612 = memref.load %arg2[%611] : memref<1152xf32, #tpu.memory_space<smem>>
      %613 = vector.broadcast %612 : f32 to vector<12x128xf32>
      %614 = arith.mulf %613, %605 : vector<12x128xf32>
      %615 = arith.addf %603, %614 : vector<12x128xf32>
      %c11_466 = arith.constant 11 : index
      %c1_467 = arith.constant 1 : index
      %c0_468 = arith.constant 0 : index
      %616 = vector.load %arg7[%c11_466, %c1_467, %c0_468] : memref<16x14x128xf32, #tpu.memory_space<vmem>>, vector<1x12x128xf32>
      %617 = vector.shape_cast %616 : vector<1x12x128xf32> to vector<12x128xf32>
      %c8_i32_469 = arith.constant 8 : i32
      %618 = arith.muli %100, %c8_i32_469 : i32
      %c3_i32_470 = arith.constant 3 : i32
      %619 = arith.addi %618, %c3_i32_470 : i32
      %c9_i32_471 = arith.constant 9 : i32
      %620 = arith.muli %619, %c9_i32_471 : i32
      %c3_i32_472 = arith.constant 3 : i32
      %621 = arith.addi %620, %c3_i32_472 : i32
      %c2_i32_473 = arith.constant 2 : i32
      %622 = arith.addi %621, %c2_i32_473 : i32
      %623 = arith.index_cast %622 : i32 to index
      %624 = memref.load %arg2[%623] : memref<1152xf32, #tpu.memory_space<smem>>
      %625 = vector.broadcast %624 : f32 to vector<12x128xf32>
      %626 = arith.mulf %625, %617 : vector<12x128xf32>
      %627 = arith.addf %615, %626 : vector<12x128xf32>
      %c12_474 = arith.constant 12 : index
      %c1_475 = arith.constant 1 : index
      %c0_476 = arith.constant 0 : index
      %628 = vector.load %arg7[%c12_474, %c1_475, %c0_476] : memref<16x14x128xf32, #tpu.memory_space<vmem>>, vector<1x12x128xf32>
      %629 = vector.shape_cast %628 : vector<1x12x128xf32> to vector<12x128xf32>
      %c8_i32_477 = arith.constant 8 : i32
      %630 = arith.muli %100, %c8_i32_477 : i32
      %c4_i32_478 = arith.constant 4 : i32
      %631 = arith.addi %630, %c4_i32_478 : i32
      %c9_i32_479 = arith.constant 9 : i32
      %632 = arith.muli %631, %c9_i32_479 : i32
      %c3_i32_480 = arith.constant 3 : i32
      %633 = arith.addi %632, %c3_i32_480 : i32
      %c2_i32_481 = arith.constant 2 : i32
      %634 = arith.addi %633, %c2_i32_481 : i32
      %635 = arith.index_cast %634 : i32 to index
      %636 = memref.load %arg2[%635] : memref<1152xf32, #tpu.memory_space<smem>>
      %637 = vector.broadcast %636 : f32 to vector<12x128xf32>
      %638 = arith.mulf %637, %629 : vector<12x128xf32>
      %639 = arith.addf %627, %638 : vector<12x128xf32>
      %c13_482 = arith.constant 13 : index
      %c1_483 = arith.constant 1 : index
      %c0_484 = arith.constant 0 : index
      %640 = vector.load %arg7[%c13_482, %c1_483, %c0_484] : memref<16x14x128xf32, #tpu.memory_space<vmem>>, vector<1x12x128xf32>
      %641 = vector.shape_cast %640 : vector<1x12x128xf32> to vector<12x128xf32>
      %c8_i32_485 = arith.constant 8 : i32
      %642 = arith.muli %100, %c8_i32_485 : i32
      %c5_i32_486 = arith.constant 5 : i32
      %643 = arith.addi %642, %c5_i32_486 : i32
      %c9_i32_487 = arith.constant 9 : i32
      %644 = arith.muli %643, %c9_i32_487 : i32
      %c3_i32_488 = arith.constant 3 : i32
      %645 = arith.addi %644, %c3_i32_488 : i32
      %c2_i32_489 = arith.constant 2 : i32
      %646 = arith.addi %645, %c2_i32_489 : i32
      %647 = arith.index_cast %646 : i32 to index
      %648 = memref.load %arg2[%647] : memref<1152xf32, #tpu.memory_space<smem>>
      %649 = vector.broadcast %648 : f32 to vector<12x128xf32>
      %650 = arith.mulf %649, %641 : vector<12x128xf32>
      %651 = arith.addf %639, %650 : vector<12x128xf32>
      %c14_490 = arith.constant 14 : index
      %c1_491 = arith.constant 1 : index
      %c0_492 = arith.constant 0 : index
      %652 = vector.load %arg7[%c14_490, %c1_491, %c0_492] : memref<16x14x128xf32, #tpu.memory_space<vmem>>, vector<1x12x128xf32>
      %653 = vector.shape_cast %652 : vector<1x12x128xf32> to vector<12x128xf32>
      %c8_i32_493 = arith.constant 8 : i32
      %654 = arith.muli %100, %c8_i32_493 : i32
      %c6_i32_494 = arith.constant 6 : i32
      %655 = arith.addi %654, %c6_i32_494 : i32
      %c9_i32_495 = arith.constant 9 : i32
      %656 = arith.muli %655, %c9_i32_495 : i32
      %c3_i32_496 = arith.constant 3 : i32
      %657 = arith.addi %656, %c3_i32_496 : i32
      %c2_i32_497 = arith.constant 2 : i32
      %658 = arith.addi %657, %c2_i32_497 : i32
      %659 = arith.index_cast %658 : i32 to index
      %660 = memref.load %arg2[%659] : memref<1152xf32, #tpu.memory_space<smem>>
      %661 = vector.broadcast %660 : f32 to vector<12x128xf32>
      %662 = arith.mulf %661, %653 : vector<12x128xf32>
      %663 = arith.addf %651, %662 : vector<12x128xf32>
      %c15_498 = arith.constant 15 : index
      %c1_499 = arith.constant 1 : index
      %c0_500 = arith.constant 0 : index
      %664 = vector.load %arg7[%c15_498, %c1_499, %c0_500] : memref<16x14x128xf32, #tpu.memory_space<vmem>>, vector<1x12x128xf32>
      %665 = vector.shape_cast %664 : vector<1x12x128xf32> to vector<12x128xf32>
      %c8_i32_501 = arith.constant 8 : i32
      %666 = arith.muli %100, %c8_i32_501 : i32
      %c7_i32_502 = arith.constant 7 : i32
      %667 = arith.addi %666, %c7_i32_502 : i32
      %c9_i32_503 = arith.constant 9 : i32
      %668 = arith.muli %667, %c9_i32_503 : i32
      %c3_i32_504 = arith.constant 3 : i32
      %669 = arith.addi %668, %c3_i32_504 : i32
      %c2_i32_505 = arith.constant 2 : i32
      %670 = arith.addi %669, %c2_i32_505 : i32
      %671 = arith.index_cast %670 : i32 to index
      %672 = memref.load %arg2[%671] : memref<1152xf32, #tpu.memory_space<smem>>
      %673 = vector.broadcast %672 : f32 to vector<12x128xf32>
      %674 = arith.mulf %673, %665 : vector<12x128xf32>
      %675 = arith.addf %663, %674 : vector<12x128xf32>
      %c0_506 = arith.constant 0 : index
      %c0_507 = arith.constant 0 : index
      %c2_508 = arith.constant 2 : index
      %c0_509 = arith.constant 0 : index
      %676 = vector.load %arg5[%c0_506, %c0_507, %c2_508, %c0_509] : memref<1x8x14x128xf32, #tpu.memory_space<vmem>>, vector<1x1x12x128xf32>
      %677 = vector.shape_cast %676 : vector<1x1x12x128xf32> to vector<12x128xf32>
      %c8_i32_510 = arith.constant 8 : i32
      %678 = arith.muli %100, %c8_i32_510 : i32
      %c0_i32_511 = arith.constant 0 : i32
      %679 = arith.addi %678, %c0_i32_511 : i32
      %c9_i32_512 = arith.constant 9 : i32
      %680 = arith.muli %679, %c9_i32_512 : i32
      %c6_i32_513 = arith.constant 6 : i32
      %681 = arith.addi %680, %c6_i32_513 : i32
      %c0_i32_514 = arith.constant 0 : i32
      %682 = arith.addi %681, %c0_i32_514 : i32
      %683 = arith.index_cast %682 : i32 to index
      %684 = memref.load %arg2[%683] : memref<1152xf32, #tpu.memory_space<smem>>
      %685 = vector.broadcast %684 : f32 to vector<12x128xf32>
      %686 = arith.mulf %685, %677 : vector<12x128xf32>
      %687 = arith.addf %675, %686 : vector<12x128xf32>
      %c0_515 = arith.constant 0 : index
      %c1_516 = arith.constant 1 : index
      %c2_517 = arith.constant 2 : index
      %c0_518 = arith.constant 0 : index
      %688 = vector.load %arg5[%c0_515, %c1_516, %c2_517, %c0_518] : memref<1x8x14x128xf32, #tpu.memory_space<vmem>>, vector<1x1x12x128xf32>
      %689 = vector.shape_cast %688 : vector<1x1x12x128xf32> to vector<12x128xf32>
      %c8_i32_519 = arith.constant 8 : i32
      %690 = arith.muli %100, %c8_i32_519 : i32
      %c1_i32_520 = arith.constant 1 : i32
      %691 = arith.addi %690, %c1_i32_520 : i32
      %c9_i32_521 = arith.constant 9 : i32
      %692 = arith.muli %691, %c9_i32_521 : i32
      %c6_i32_522 = arith.constant 6 : i32
      %693 = arith.addi %692, %c6_i32_522 : i32
      %c0_i32_523 = arith.constant 0 : i32
      %694 = arith.addi %693, %c0_i32_523 : i32
      %695 = arith.index_cast %694 : i32 to index
      %696 = memref.load %arg2[%695] : memref<1152xf32, #tpu.memory_space<smem>>
      %697 = vector.broadcast %696 : f32 to vector<12x128xf32>
      %698 = arith.mulf %697, %689 : vector<12x128xf32>
      %699 = arith.addf %687, %698 : vector<12x128xf32>
      %c0_524 = arith.constant 0 : index
      %c2_525 = arith.constant 2 : index
      %c2_526 = arith.constant 2 : index
      %c0_527 = arith.constant 0 : index
      %700 = vector.load %arg5[%c0_524, %c2_525, %c2_526, %c0_527] : memref<1x8x14x128xf32, #tpu.memory_space<vmem>>, vector<1x1x12x128xf32>
      %701 = vector.shape_cast %700 : vector<1x1x12x128xf32> to vector<12x128xf32>
      %c8_i32_528 = arith.constant 8 : i32
      %702 = arith.muli %100, %c8_i32_528 : i32
      %c2_i32_529 = arith.constant 2 : i32
      %703 = arith.addi %702, %c2_i32_529 : i32
      %c9_i32_530 = arith.constant 9 : i32
      %704 = arith.muli %703, %c9_i32_530 : i32
      %c6_i32_531 = arith.constant 6 : i32
      %705 = arith.addi %704, %c6_i32_531 : i32
      %c0_i32_532 = arith.constant 0 : i32
      %706 = arith.addi %705, %c0_i32_532 : i32
      %707 = arith.index_cast %706 : i32 to index
      %708 = memref.load %arg2[%707] : memref<1152xf32, #tpu.memory_space<smem>>
      %709 = vector.broadcast %708 : f32 to vector<12x128xf32>
      %710 = arith.mulf %709, %701 : vector<12x128xf32>
      %711 = arith.addf %699, %710 : vector<12x128xf32>
      %c0_533 = arith.constant 0 : index
      %c3_534 = arith.constant 3 : index
      %c2_535 = arith.constant 2 : index
      %c0_536 = arith.constant 0 : index
      %712 = vector.load %arg5[%c0_533, %c3_534, %c2_535, %c0_536] : memref<1x8x14x128xf32, #tpu.memory_space<vmem>>, vector<1x1x12x128xf32>
      %713 = vector.shape_cast %712 : vector<1x1x12x128xf32> to vector<12x128xf32>
      %c8_i32_537 = arith.constant 8 : i32
      %714 = arith.muli %100, %c8_i32_537 : i32
      %c3_i32_538 = arith.constant 3 : i32
      %715 = arith.addi %714, %c3_i32_538 : i32
      %c9_i32_539 = arith.constant 9 : i32
      %716 = arith.muli %715, %c9_i32_539 : i32
      %c6_i32_540 = arith.constant 6 : i32
      %717 = arith.addi %716, %c6_i32_540 : i32
      %c0_i32_541 = arith.constant 0 : i32
      %718 = arith.addi %717, %c0_i32_541 : i32
      %719 = arith.index_cast %718 : i32 to index
      %720 = memref.load %arg2[%719] : memref<1152xf32, #tpu.memory_space<smem>>
      %721 = vector.broadcast %720 : f32 to vector<12x128xf32>
      %722 = arith.mulf %721, %713 : vector<12x128xf32>
      %723 = arith.addf %711, %722 : vector<12x128xf32>
      %c0_542 = arith.constant 0 : index
      %c4_543 = arith.constant 4 : index
      %c2_544 = arith.constant 2 : index
      %c0_545 = arith.constant 0 : index
      %724 = vector.load %arg5[%c0_542, %c4_543, %c2_544, %c0_545] : memref<1x8x14x128xf32, #tpu.memory_space<vmem>>, vector<1x1x12x128xf32>
      %725 = vector.shape_cast %724 : vector<1x1x12x128xf32> to vector<12x128xf32>
      %c8_i32_546 = arith.constant 8 : i32
      %726 = arith.muli %100, %c8_i32_546 : i32
      %c4_i32_547 = arith.constant 4 : i32
      %727 = arith.addi %726, %c4_i32_547 : i32
      %c9_i32_548 = arith.constant 9 : i32
      %728 = arith.muli %727, %c9_i32_548 : i32
      %c6_i32_549 = arith.constant 6 : i32
      %729 = arith.addi %728, %c6_i32_549 : i32
      %c0_i32_550 = arith.constant 0 : i32
      %730 = arith.addi %729, %c0_i32_550 : i32
      %731 = arith.index_cast %730 : i32 to index
      %732 = memref.load %arg2[%731] : memref<1152xf32, #tpu.memory_space<smem>>
      %733 = vector.broadcast %732 : f32 to vector<12x128xf32>
      %734 = arith.mulf %733, %725 : vector<12x128xf32>
      %735 = arith.addf %723, %734 : vector<12x128xf32>
      %c0_551 = arith.constant 0 : index
      %c5_552 = arith.constant 5 : index
      %c2_553 = arith.constant 2 : index
      %c0_554 = arith.constant 0 : index
      %736 = vector.load %arg5[%c0_551, %c5_552, %c2_553, %c0_554] : memref<1x8x14x128xf32, #tpu.memory_space<vmem>>, vector<1x1x12x128xf32>
      %737 = vector.shape_cast %736 : vector<1x1x12x128xf32> to vector<12x128xf32>
      %c8_i32_555 = arith.constant 8 : i32
      %738 = arith.muli %100, %c8_i32_555 : i32
      %c5_i32_556 = arith.constant 5 : i32
      %739 = arith.addi %738, %c5_i32_556 : i32
      %c9_i32_557 = arith.constant 9 : i32
      %740 = arith.muli %739, %c9_i32_557 : i32
      %c6_i32_558 = arith.constant 6 : i32
      %741 = arith.addi %740, %c6_i32_558 : i32
      %c0_i32_559 = arith.constant 0 : i32
      %742 = arith.addi %741, %c0_i32_559 : i32
      %743 = arith.index_cast %742 : i32 to index
      %744 = memref.load %arg2[%743] : memref<1152xf32, #tpu.memory_space<smem>>
      %745 = vector.broadcast %744 : f32 to vector<12x128xf32>
      %746 = arith.mulf %745, %737 : vector<12x128xf32>
      %747 = arith.addf %735, %746 : vector<12x128xf32>
      %c0_560 = arith.constant 0 : index
      %c6_561 = arith.constant 6 : index
      %c2_562 = arith.constant 2 : index
      %c0_563 = arith.constant 0 : index
      %748 = vector.load %arg5[%c0_560, %c6_561, %c2_562, %c0_563] : memref<1x8x14x128xf32, #tpu.memory_space<vmem>>, vector<1x1x12x128xf32>
      %749 = vector.shape_cast %748 : vector<1x1x12x128xf32> to vector<12x128xf32>
      %c8_i32_564 = arith.constant 8 : i32
      %750 = arith.muli %100, %c8_i32_564 : i32
      %c6_i32_565 = arith.constant 6 : i32
      %751 = arith.addi %750, %c6_i32_565 : i32
      %c9_i32_566 = arith.constant 9 : i32
      %752 = arith.muli %751, %c9_i32_566 : i32
      %c6_i32_567 = arith.constant 6 : i32
      %753 = arith.addi %752, %c6_i32_567 : i32
      %c0_i32_568 = arith.constant 0 : i32
      %754 = arith.addi %753, %c0_i32_568 : i32
      %755 = arith.index_cast %754 : i32 to index
      %756 = memref.load %arg2[%755] : memref<1152xf32, #tpu.memory_space<smem>>
      %757 = vector.broadcast %756 : f32 to vector<12x128xf32>
      %758 = arith.mulf %757, %749 : vector<12x128xf32>
      %759 = arith.addf %747, %758 : vector<12x128xf32>
      %c0_569 = arith.constant 0 : index
      %c7_570 = arith.constant 7 : index
      %c2_571 = arith.constant 2 : index
      %c0_572 = arith.constant 0 : index
      %760 = vector.load %arg5[%c0_569, %c7_570, %c2_571, %c0_572] : memref<1x8x14x128xf32, #tpu.memory_space<vmem>>, vector<1x1x12x128xf32>
      %761 = vector.shape_cast %760 : vector<1x1x12x128xf32> to vector<12x128xf32>
      %c8_i32_573 = arith.constant 8 : i32
      %762 = arith.muli %100, %c8_i32_573 : i32
      %c7_i32_574 = arith.constant 7 : i32
      %763 = arith.addi %762, %c7_i32_574 : i32
      %c9_i32_575 = arith.constant 9 : i32
      %764 = arith.muli %763, %c9_i32_575 : i32
      %c6_i32_576 = arith.constant 6 : i32
      %765 = arith.addi %764, %c6_i32_576 : i32
      %c0_i32_577 = arith.constant 0 : i32
      %766 = arith.addi %765, %c0_i32_577 : i32
      %767 = arith.index_cast %766 : i32 to index
      %768 = memref.load %arg2[%767] : memref<1152xf32, #tpu.memory_space<smem>>
      %769 = vector.broadcast %768 : f32 to vector<12x128xf32>
      %770 = arith.mulf %769, %761 : vector<12x128xf32>
      %771 = arith.addf %759, %770 : vector<12x128xf32>
      %c0_578 = arith.constant 0 : index
      %c2_579 = arith.constant 2 : index
      %c0_580 = arith.constant 0 : index
      %772 = vector.load %arg7[%c0_578, %c2_579, %c0_580] : memref<16x14x128xf32, #tpu.memory_space<vmem>>, vector<1x12x128xf32>
      %773 = vector.shape_cast %772 : vector<1x12x128xf32> to vector<12x128xf32>
      %c8_i32_581 = arith.constant 8 : i32
      %774 = arith.muli %100, %c8_i32_581 : i32
      %c0_i32_582 = arith.constant 0 : i32
      %775 = arith.addi %774, %c0_i32_582 : i32
      %c9_i32_583 = arith.constant 9 : i32
      %776 = arith.muli %775, %c9_i32_583 : i32
      %c6_i32_584 = arith.constant 6 : i32
      %777 = arith.addi %776, %c6_i32_584 : i32
      %c1_i32_585 = arith.constant 1 : i32
      %778 = arith.addi %777, %c1_i32_585 : i32
      %779 = arith.index_cast %778 : i32 to index
      %780 = memref.load %arg2[%779] : memref<1152xf32, #tpu.memory_space<smem>>
      %781 = vector.broadcast %780 : f32 to vector<12x128xf32>
      %782 = arith.mulf %781, %773 : vector<12x128xf32>
      %783 = arith.addf %771, %782 : vector<12x128xf32>
      %c1_586 = arith.constant 1 : index
      %c2_587 = arith.constant 2 : index
      %c0_588 = arith.constant 0 : index
      %784 = vector.load %arg7[%c1_586, %c2_587, %c0_588] : memref<16x14x128xf32, #tpu.memory_space<vmem>>, vector<1x12x128xf32>
      %785 = vector.shape_cast %784 : vector<1x12x128xf32> to vector<12x128xf32>
      %c8_i32_589 = arith.constant 8 : i32
      %786 = arith.muli %100, %c8_i32_589 : i32
      %c1_i32_590 = arith.constant 1 : i32
      %787 = arith.addi %786, %c1_i32_590 : i32
      %c9_i32_591 = arith.constant 9 : i32
      %788 = arith.muli %787, %c9_i32_591 : i32
      %c6_i32_592 = arith.constant 6 : i32
      %789 = arith.addi %788, %c6_i32_592 : i32
      %c1_i32_593 = arith.constant 1 : i32
      %790 = arith.addi %789, %c1_i32_593 : i32
      %791 = arith.index_cast %790 : i32 to index
      %792 = memref.load %arg2[%791] : memref<1152xf32, #tpu.memory_space<smem>>
      %793 = vector.broadcast %792 : f32 to vector<12x128xf32>
      %794 = arith.mulf %793, %785 : vector<12x128xf32>
      %795 = arith.addf %783, %794 : vector<12x128xf32>
      %c2_594 = arith.constant 2 : index
      %c2_595 = arith.constant 2 : index
      %c0_596 = arith.constant 0 : index
      %796 = vector.load %arg7[%c2_594, %c2_595, %c0_596] : memref<16x14x128xf32, #tpu.memory_space<vmem>>, vector<1x12x128xf32>
      %797 = vector.shape_cast %796 : vector<1x12x128xf32> to vector<12x128xf32>
      %c8_i32_597 = arith.constant 8 : i32
      %798 = arith.muli %100, %c8_i32_597 : i32
      %c2_i32_598 = arith.constant 2 : i32
      %799 = arith.addi %798, %c2_i32_598 : i32
      %c9_i32_599 = arith.constant 9 : i32
      %800 = arith.muli %799, %c9_i32_599 : i32
      %c6_i32_600 = arith.constant 6 : i32
      %801 = arith.addi %800, %c6_i32_600 : i32
      %c1_i32_601 = arith.constant 1 : i32
      %802 = arith.addi %801, %c1_i32_601 : i32
      %803 = arith.index_cast %802 : i32 to index
      %804 = memref.load %arg2[%803] : memref<1152xf32, #tpu.memory_space<smem>>
      %805 = vector.broadcast %804 : f32 to vector<12x128xf32>
      %806 = arith.mulf %805, %797 : vector<12x128xf32>
      %807 = arith.addf %795, %806 : vector<12x128xf32>
      %c3_602 = arith.constant 3 : index
      %c2_603 = arith.constant 2 : index
      %c0_604 = arith.constant 0 : index
      %808 = vector.load %arg7[%c3_602, %c2_603, %c0_604] : memref<16x14x128xf32, #tpu.memory_space<vmem>>, vector<1x12x128xf32>
      %809 = vector.shape_cast %808 : vector<1x12x128xf32> to vector<12x128xf32>
      %c8_i32_605 = arith.constant 8 : i32
      %810 = arith.muli %100, %c8_i32_605 : i32
      %c3_i32_606 = arith.constant 3 : i32
      %811 = arith.addi %810, %c3_i32_606 : i32
      %c9_i32_607 = arith.constant 9 : i32
      %812 = arith.muli %811, %c9_i32_607 : i32
      %c6_i32_608 = arith.constant 6 : i32
      %813 = arith.addi %812, %c6_i32_608 : i32
      %c1_i32_609 = arith.constant 1 : i32
      %814 = arith.addi %813, %c1_i32_609 : i32
      %815 = arith.index_cast %814 : i32 to index
      %816 = memref.load %arg2[%815] : memref<1152xf32, #tpu.memory_space<smem>>
      %817 = vector.broadcast %816 : f32 to vector<12x128xf32>
      %818 = arith.mulf %817, %809 : vector<12x128xf32>
      %819 = arith.addf %807, %818 : vector<12x128xf32>
      %c4_610 = arith.constant 4 : index
      %c2_611 = arith.constant 2 : index
      %c0_612 = arith.constant 0 : index
      %820 = vector.load %arg7[%c4_610, %c2_611, %c0_612] : memref<16x14x128xf32, #tpu.memory_space<vmem>>, vector<1x12x128xf32>
      %821 = vector.shape_cast %820 : vector<1x12x128xf32> to vector<12x128xf32>
      %c8_i32_613 = arith.constant 8 : i32
      %822 = arith.muli %100, %c8_i32_613 : i32
      %c4_i32_614 = arith.constant 4 : i32
      %823 = arith.addi %822, %c4_i32_614 : i32
      %c9_i32_615 = arith.constant 9 : i32
      %824 = arith.muli %823, %c9_i32_615 : i32
      %c6_i32_616 = arith.constant 6 : i32
      %825 = arith.addi %824, %c6_i32_616 : i32
      %c1_i32_617 = arith.constant 1 : i32
      %826 = arith.addi %825, %c1_i32_617 : i32
      %827 = arith.index_cast %826 : i32 to index
      %828 = memref.load %arg2[%827] : memref<1152xf32, #tpu.memory_space<smem>>
      %829 = vector.broadcast %828 : f32 to vector<12x128xf32>
      %830 = arith.mulf %829, %821 : vector<12x128xf32>
      %831 = arith.addf %819, %830 : vector<12x128xf32>
      %c5_618 = arith.constant 5 : index
      %c2_619 = arith.constant 2 : index
      %c0_620 = arith.constant 0 : index
      %832 = vector.load %arg7[%c5_618, %c2_619, %c0_620] : memref<16x14x128xf32, #tpu.memory_space<vmem>>, vector<1x12x128xf32>
      %833 = vector.shape_cast %832 : vector<1x12x128xf32> to vector<12x128xf32>
      %c8_i32_621 = arith.constant 8 : i32
      %834 = arith.muli %100, %c8_i32_621 : i32
      %c5_i32_622 = arith.constant 5 : i32
      %835 = arith.addi %834, %c5_i32_622 : i32
      %c9_i32_623 = arith.constant 9 : i32
      %836 = arith.muli %835, %c9_i32_623 : i32
      %c6_i32_624 = arith.constant 6 : i32
      %837 = arith.addi %836, %c6_i32_624 : i32
      %c1_i32_625 = arith.constant 1 : i32
      %838 = arith.addi %837, %c1_i32_625 : i32
      %839 = arith.index_cast %838 : i32 to index
      %840 = memref.load %arg2[%839] : memref<1152xf32, #tpu.memory_space<smem>>
      %841 = vector.broadcast %840 : f32 to vector<12x128xf32>
      %842 = arith.mulf %841, %833 : vector<12x128xf32>
      %843 = arith.addf %831, %842 : vector<12x128xf32>
      %c6_626 = arith.constant 6 : index
      %c2_627 = arith.constant 2 : index
      %c0_628 = arith.constant 0 : index
      %844 = vector.load %arg7[%c6_626, %c2_627, %c0_628] : memref<16x14x128xf32, #tpu.memory_space<vmem>>, vector<1x12x128xf32>
      %845 = vector.shape_cast %844 : vector<1x12x128xf32> to vector<12x128xf32>
      %c8_i32_629 = arith.constant 8 : i32
      %846 = arith.muli %100, %c8_i32_629 : i32
      %c6_i32_630 = arith.constant 6 : i32
      %847 = arith.addi %846, %c6_i32_630 : i32
      %c9_i32_631 = arith.constant 9 : i32
      %848 = arith.muli %847, %c9_i32_631 : i32
      %c6_i32_632 = arith.constant 6 : i32
      %849 = arith.addi %848, %c6_i32_632 : i32
      %c1_i32_633 = arith.constant 1 : i32
      %850 = arith.addi %849, %c1_i32_633 : i32
      %851 = arith.index_cast %850 : i32 to index
      %852 = memref.load %arg2[%851] : memref<1152xf32, #tpu.memory_space<smem>>
      %853 = vector.broadcast %852 : f32 to vector<12x128xf32>
      %854 = arith.mulf %853, %845 : vector<12x128xf32>
      %855 = arith.addf %843, %854 : vector<12x128xf32>
      %c7_634 = arith.constant 7 : index
      %c2_635 = arith.constant 2 : index
      %c0_636 = arith.constant 0 : index
      %856 = vector.load %arg7[%c7_634, %c2_635, %c0_636] : memref<16x14x128xf32, #tpu.memory_space<vmem>>, vector<1x12x128xf32>
      %857 = vector.shape_cast %856 : vector<1x12x128xf32> to vector<12x128xf32>
      %c8_i32_637 = arith.constant 8 : i32
      %858 = arith.muli %100, %c8_i32_637 : i32
      %c7_i32_638 = arith.constant 7 : i32
      %859 = arith.addi %858, %c7_i32_638 : i32
      %c9_i32_639 = arith.constant 9 : i32
      %860 = arith.muli %859, %c9_i32_639 : i32
      %c6_i32_640 = arith.constant 6 : i32
      %861 = arith.addi %860, %c6_i32_640 : i32
      %c1_i32_641 = arith.constant 1 : i32
      %862 = arith.addi %861, %c1_i32_641 : i32
      %863 = arith.index_cast %862 : i32 to index
      %864 = memref.load %arg2[%863] : memref<1152xf32, #tpu.memory_space<smem>>
      %865 = vector.broadcast %864 : f32 to vector<12x128xf32>
      %866 = arith.mulf %865, %857 : vector<12x128xf32>
      %867 = arith.addf %855, %866 : vector<12x128xf32>
      %c8_642 = arith.constant 8 : index
      %c2_643 = arith.constant 2 : index
      %c0_644 = arith.constant 0 : index
      %868 = vector.load %arg7[%c8_642, %c2_643, %c0_644] : memref<16x14x128xf32, #tpu.memory_space<vmem>>, vector<1x12x128xf32>
      %869 = vector.shape_cast %868 : vector<1x12x128xf32> to vector<12x128xf32>
      %c8_i32_645 = arith.constant 8 : i32
      %870 = arith.muli %100, %c8_i32_645 : i32
      %c0_i32_646 = arith.constant 0 : i32
      %871 = arith.addi %870, %c0_i32_646 : i32
      %c9_i32_647 = arith.constant 9 : i32
      %872 = arith.muli %871, %c9_i32_647 : i32
      %c6_i32_648 = arith.constant 6 : i32
      %873 = arith.addi %872, %c6_i32_648 : i32
      %c2_i32_649 = arith.constant 2 : i32
      %874 = arith.addi %873, %c2_i32_649 : i32
      %875 = arith.index_cast %874 : i32 to index
      %876 = memref.load %arg2[%875] : memref<1152xf32, #tpu.memory_space<smem>>
      %877 = vector.broadcast %876 : f32 to vector<12x128xf32>
      %878 = arith.mulf %877, %869 : vector<12x128xf32>
      %879 = arith.addf %867, %878 : vector<12x128xf32>
      %c9_650 = arith.constant 9 : index
      %c2_651 = arith.constant 2 : index
      %c0_652 = arith.constant 0 : index
      %880 = vector.load %arg7[%c9_650, %c2_651, %c0_652] : memref<16x14x128xf32, #tpu.memory_space<vmem>>, vector<1x12x128xf32>
      %881 = vector.shape_cast %880 : vector<1x12x128xf32> to vector<12x128xf32>
      %c8_i32_653 = arith.constant 8 : i32
      %882 = arith.muli %100, %c8_i32_653 : i32
      %c1_i32_654 = arith.constant 1 : i32
      %883 = arith.addi %882, %c1_i32_654 : i32
      %c9_i32_655 = arith.constant 9 : i32
      %884 = arith.muli %883, %c9_i32_655 : i32
      %c6_i32_656 = arith.constant 6 : i32
      %885 = arith.addi %884, %c6_i32_656 : i32
      %c2_i32_657 = arith.constant 2 : i32
      %886 = arith.addi %885, %c2_i32_657 : i32
      %887 = arith.index_cast %886 : i32 to index
      %888 = memref.load %arg2[%887] : memref<1152xf32, #tpu.memory_space<smem>>
      %889 = vector.broadcast %888 : f32 to vector<12x128xf32>
      %890 = arith.mulf %889, %881 : vector<12x128xf32>
      %891 = arith.addf %879, %890 : vector<12x128xf32>
      %c10_658 = arith.constant 10 : index
      %c2_659 = arith.constant 2 : index
      %c0_660 = arith.constant 0 : index
      %892 = vector.load %arg7[%c10_658, %c2_659, %c0_660] : memref<16x14x128xf32, #tpu.memory_space<vmem>>, vector<1x12x128xf32>
      %893 = vector.shape_cast %892 : vector<1x12x128xf32> to vector<12x128xf32>
      %c8_i32_661 = arith.constant 8 : i32
      %894 = arith.muli %100, %c8_i32_661 : i32
      %c2_i32_662 = arith.constant 2 : i32
      %895 = arith.addi %894, %c2_i32_662 : i32
      %c9_i32_663 = arith.constant 9 : i32
      %896 = arith.muli %895, %c9_i32_663 : i32
      %c6_i32_664 = arith.constant 6 : i32
      %897 = arith.addi %896, %c6_i32_664 : i32
      %c2_i32_665 = arith.constant 2 : i32
      %898 = arith.addi %897, %c2_i32_665 : i32
      %899 = arith.index_cast %898 : i32 to index
      %900 = memref.load %arg2[%899] : memref<1152xf32, #tpu.memory_space<smem>>
      %901 = vector.broadcast %900 : f32 to vector<12x128xf32>
      %902 = arith.mulf %901, %893 : vector<12x128xf32>
      %903 = arith.addf %891, %902 : vector<12x128xf32>
      %c11_666 = arith.constant 11 : index
      %c2_667 = arith.constant 2 : index
      %c0_668 = arith.constant 0 : index
      %904 = vector.load %arg7[%c11_666, %c2_667, %c0_668] : memref<16x14x128xf32, #tpu.memory_space<vmem>>, vector<1x12x128xf32>
      %905 = vector.shape_cast %904 : vector<1x12x128xf32> to vector<12x128xf32>
      %c8_i32_669 = arith.constant 8 : i32
      %906 = arith.muli %100, %c8_i32_669 : i32
      %c3_i32_670 = arith.constant 3 : i32
      %907 = arith.addi %906, %c3_i32_670 : i32
      %c9_i32_671 = arith.constant 9 : i32
      %908 = arith.muli %907, %c9_i32_671 : i32
      %c6_i32_672 = arith.constant 6 : i32
      %909 = arith.addi %908, %c6_i32_672 : i32
      %c2_i32_673 = arith.constant 2 : i32
      %910 = arith.addi %909, %c2_i32_673 : i32
      %911 = arith.index_cast %910 : i32 to index
      %912 = memref.load %arg2[%911] : memref<1152xf32, #tpu.memory_space<smem>>
      %913 = vector.broadcast %912 : f32 to vector<12x128xf32>
      %914 = arith.mulf %913, %905 : vector<12x128xf32>
      %915 = arith.addf %903, %914 : vector<12x128xf32>
      %c12_674 = arith.constant 12 : index
      %c2_675 = arith.constant 2 : index
      %c0_676 = arith.constant 0 : index
      %916 = vector.load %arg7[%c12_674, %c2_675, %c0_676] : memref<16x14x128xf32, #tpu.memory_space<vmem>>, vector<1x12x128xf32>
      %917 = vector.shape_cast %916 : vector<1x12x128xf32> to vector<12x128xf32>
      %c8_i32_677 = arith.constant 8 : i32
      %918 = arith.muli %100, %c8_i32_677 : i32
      %c4_i32_678 = arith.constant 4 : i32
      %919 = arith.addi %918, %c4_i32_678 : i32
      %c9_i32_679 = arith.constant 9 : i32
      %920 = arith.muli %919, %c9_i32_679 : i32
      %c6_i32_680 = arith.constant 6 : i32
      %921 = arith.addi %920, %c6_i32_680 : i32
      %c2_i32_681 = arith.constant 2 : i32
      %922 = arith.addi %921, %c2_i32_681 : i32
      %923 = arith.index_cast %922 : i32 to index
      %924 = memref.load %arg2[%923] : memref<1152xf32, #tpu.memory_space<smem>>
      %925 = vector.broadcast %924 : f32 to vector<12x128xf32>
      %926 = arith.mulf %925, %917 : vector<12x128xf32>
      %927 = arith.addf %915, %926 : vector<12x128xf32>
      %c13_682 = arith.constant 13 : index
      %c2_683 = arith.constant 2 : index
      %c0_684 = arith.constant 0 : index
      %928 = vector.load %arg7[%c13_682, %c2_683, %c0_684] : memref<16x14x128xf32, #tpu.memory_space<vmem>>, vector<1x12x128xf32>
      %929 = vector.shape_cast %928 : vector<1x12x128xf32> to vector<12x128xf32>
      %c8_i32_685 = arith.constant 8 : i32
      %930 = arith.muli %100, %c8_i32_685 : i32
      %c5_i32_686 = arith.constant 5 : i32
      %931 = arith.addi %930, %c5_i32_686 : i32
      %c9_i32_687 = arith.constant 9 : i32
      %932 = arith.muli %931, %c9_i32_687 : i32
      %c6_i32_688 = arith.constant 6 : i32
      %933 = arith.addi %932, %c6_i32_688 : i32
      %c2_i32_689 = arith.constant 2 : i32
      %934 = arith.addi %933, %c2_i32_689 : i32
      %935 = arith.index_cast %934 : i32 to index
      %936 = memref.load %arg2[%935] : memref<1152xf32, #tpu.memory_space<smem>>
      %937 = vector.broadcast %936 : f32 to vector<12x128xf32>
      %938 = arith.mulf %937, %929 : vector<12x128xf32>
      %939 = arith.addf %927, %938 : vector<12x128xf32>
      %c14_690 = arith.constant 14 : index
      %c2_691 = arith.constant 2 : index
      %c0_692 = arith.constant 0 : index
      %940 = vector.load %arg7[%c14_690, %c2_691, %c0_692] : memref<16x14x128xf32, #tpu.memory_space<vmem>>, vector<1x12x128xf32>
      %941 = vector.shape_cast %940 : vector<1x12x128xf32> to vector<12x128xf32>
      %c8_i32_693 = arith.constant 8 : i32
      %942 = arith.muli %100, %c8_i32_693 : i32
      %c6_i32_694 = arith.constant 6 : i32
      %943 = arith.addi %942, %c6_i32_694 : i32
      %c9_i32_695 = arith.constant 9 : i32
      %944 = arith.muli %943, %c9_i32_695 : i32
      %c6_i32_696 = arith.constant 6 : i32
      %945 = arith.addi %944, %c6_i32_696 : i32
      %c2_i32_697 = arith.constant 2 : i32
      %946 = arith.addi %945, %c2_i32_697 : i32
      %947 = arith.index_cast %946 : i32 to index
      %948 = memref.load %arg2[%947] : memref<1152xf32, #tpu.memory_space<smem>>
      %949 = vector.broadcast %948 : f32 to vector<12x128xf32>
      %950 = arith.mulf %949, %941 : vector<12x128xf32>
      %951 = arith.addf %939, %950 : vector<12x128xf32>
      %c15_698 = arith.constant 15 : index
      %c2_699 = arith.constant 2 : index
      %c0_700 = arith.constant 0 : index
      %952 = vector.load %arg7[%c15_698, %c2_699, %c0_700] : memref<16x14x128xf32, #tpu.memory_space<vmem>>, vector<1x12x128xf32>
      %953 = vector.shape_cast %952 : vector<1x12x128xf32> to vector<12x128xf32>
      %c8_i32_701 = arith.constant 8 : i32
      %954 = arith.muli %100, %c8_i32_701 : i32
      %c7_i32_702 = arith.constant 7 : i32
      %955 = arith.addi %954, %c7_i32_702 : i32
      %c9_i32_703 = arith.constant 9 : i32
      %956 = arith.muli %955, %c9_i32_703 : i32
      %c6_i32_704 = arith.constant 6 : i32
      %957 = arith.addi %956, %c6_i32_704 : i32
      %c2_i32_705 = arith.constant 2 : i32
      %958 = arith.addi %957, %c2_i32_705 : i32
      %959 = arith.index_cast %958 : i32 to index
      %960 = memref.load %arg2[%959] : memref<1152xf32, #tpu.memory_space<smem>>
      %961 = vector.broadcast %960 : f32 to vector<12x128xf32>
      %962 = arith.mulf %961, %953 : vector<12x128xf32>
      %963 = arith.addf %951, %962 : vector<12x128xf32>
      %964 = arith.index_cast %100 : i32 to index
      %965 = memref.load %arg3[%964] : memref<16xf32, #tpu.memory_space<smem>>
      %966 = vector.broadcast %965 : f32 to vector<12x128xf32>
      %967 = arith.mulf %963, %966 : vector<12x128xf32>
      %968 = arith.index_cast %100 : i32 to index
      %969 = memref.load %arg4[%968] : memref<16xf32, #tpu.memory_space<smem>>
      %970 = vector.broadcast %969 : f32 to vector<12x128xf32>
      %971 = arith.addf %967, %970 : vector<12x128xf32>
      %cst = arith.constant 0.000000e+00 : f32
      %972 = vector.broadcast %cst : f32 to vector<12x128xf32>
      %973 = arith.maximumf %971, %972 : vector<12x128xf32>
      %c0_706 = arith.constant 0 : index
      %c0_707 = arith.constant 0 : index
      %974 = vector.load %arg8[%c0_706, %c0_707] : memref<12x128xf32, #tpu.memory_space<vmem>>, vector<12x128xf32>
      tpu.vector_store %arg8[%c0_706, %c0_707], %973 {strides = array<i32>} : memref<12x128xf32, #tpu.memory_space<vmem>>, vector<12x128xf32>,
      %c0_708 = arith.constant 0 : index
      %c0_709 = arith.constant 0 : index
      %975 = tpu.strided_load %arg8[%c0_708, %c0_709] {strides = array<i32: 3, 1>} : memref<12x128xf32, #tpu.memory_space<vmem>>, vector<4x128xf32>
      %c1_710 = arith.constant 1 : index
      %c0_711 = arith.constant 0 : index
      %976 = tpu.strided_load %arg8[%c1_710, %c0_711] {strides = array<i32: 3, 1>} : memref<12x128xf32, #tpu.memory_space<vmem>>, vector<4x128xf32>
      %c2_712 = arith.constant 2 : index
      %c0_713 = arith.constant 0 : index
      %977 = tpu.strided_load %arg8[%c2_712, %c0_713] {strides = array<i32: 3, 1>} : memref<12x128xf32, #tpu.memory_space<vmem>>, vector<4x128xf32>
      %978 = arith.maximumf %975, %976 : vector<4x128xf32>
      %979 = arith.maximumf %978, %977 : vector<4x128xf32>
      %c0_714 = arith.constant 0 : index
      %980 = arith.index_cast %98 : i32 to index
      %c0_715 = arith.constant 0 : index
      %c0_716 = arith.constant 0 : index
      %981 = vector.load %arg6[%c0_714, %980, %c0_715, %c0_716] : memref<1x16x4x128xf32, #tpu.memory_space<vmem>>, vector<1x1x4x128xf32>
      %982 = vector.shape_cast %981 : vector<1x1x4x128xf32> to vector<4x128xf32>
      %983 = vector.shape_cast %979 : vector<4x128xf32> to vector<1x1x4x128xf32>
      tpu.vector_store %arg6[%c0_714, %980, %c0_715, %c0_716], %983 {strides = array<i32>} : memref<1x16x4x128xf32, #tpu.memory_space<vmem>>, vector<1x1x4x128xf32>,
    }
    %c16_i32_110 = arith.constant 16 : i32
    return
  }
  func.func @transform_0(%arg0: i32, %arg1: i32) -> i32 {
    %c0_i32 = arith.constant 0 : i32
    %c0_i32_0 = arith.constant 0 : i32
    return %c0_i32 : i32
  }
  func.func @transform_1(%arg0: i32, %arg1: i32) -> i32 {
    %c0_i32 = arith.constant 0 : i32
    %c0_i32_0 = arith.constant 0 : i32
    return %c0_i32 : i32
  }
  func.func @transform_2(%arg0: i32, %arg1: i32) -> i32 {
    %c0_i32 = arith.constant 0 : i32
    %c0_i32_0 = arith.constant 0 : i32
    return %c0_i32 : i32
  }
  func.func @transform_3(%arg0: i32, %arg1: i32) -> (i32, i32, i32, i32) {
    %c0_i32 = arith.constant 0 : i32
    %c0_i32_0 = arith.constant 0 : i32
    %c0_i32_1 = arith.constant 0 : i32
    %c0_i32_2 = arith.constant 0 : i32
    return %arg0, %c0_i32, %c0_i32_0, %c0_i32_1 : i32, i32, i32, i32
  }
  func.func @transform_4(%arg0: i32, %arg1: i32) -> (i32, i32, i32, i32) {
    %c0_i32 = arith.constant 0 : i32
    %c0_i32_0 = arith.constant 0 : i32
    %c0_i32_1 = arith.constant 0 : i32
    return %arg0, %arg1, %c0_i32, %c0_i32_0 : i32, i32, i32, i32
  }
}

module attributes {stable_mosaic.version = 11 : i64} {
  func.func @_fc_relu_kernel(%arg0: i32, %arg1: i32, %arg2: memref<2x256xbf16, #tpu.memory_space<vmem>>, %arg3: memref<256x256xbf16, #tpu.memory_space<vmem>>, %arg4: memref<1x256xf32, #tpu.memory_space<vmem>>, %arg5: memref<2x256xf32, #tpu.memory_space<vmem>>, %arg6: memref<2x256xf32, #tpu.memory_space<vmem>>) attributes {dimension_semantics = [#tpu.dimension_semantics<parallel>, #tpu.dimension_semantics<arbitrary>], iteration_bounds = array<i64: 2, 1>, scalar_prefetch = 0 : i64, scratch_operands = 1 : i64, tpu.core_type = #tpu.core_type<tc>, window_params = [{transform_indices = @transform_0, window_bounds = array<i64: 2, 256>}, {transform_indices = @transform_1, window_bounds = array<i64: 256, 256>}, {transform_indices = @transform_2, window_bounds = array<i64: 1, 256>}, {transform_indices = @transform_3, window_bounds = array<i64: 2, 256>}]} {
    %c0_i32 = arith.constant 0 : i32
    %0 = arith.cmpi eq, %arg1, %c0_i32 : i32
    %1 = arith.extui %0 : i1 to i32
    %c0_i32_0 = arith.constant 0 : i32
    %2 = arith.cmpi ne, %1, %c0_i32_0 : i32
    scf.if %2 {
      %cst_10 = arith.constant 0.000000e+00 : f32
      %12 = vector.broadcast %cst_10 : f32 to vector<2x256xf32>
      %c0_11 = arith.constant 0 : index
      %c0_12 = arith.constant 0 : index
      %13 = vector.load %arg6[%c0_11, %c0_12] : memref<2x256xf32, #tpu.memory_space<vmem>>, vector<2x256xf32>
      tpu.vector_store %arg6[%c0_11, %c0_12], %12 {strides = array<i32>} : memref<2x256xf32, #tpu.memory_space<vmem>>, vector<2x256xf32>,
    } else {
    }
    %c0 = arith.constant 0 : index
    %c0_1 = arith.constant 0 : index
    %3 = vector.load %arg6[%c0, %c0_1] : memref<2x256xf32, #tpu.memory_space<vmem>>, vector<2x256xf32>
    %c0_2 = arith.constant 0 : index
    %c0_3 = arith.constant 0 : index
    %4 = vector.load %arg2[%c0_2, %c0_3] : memref<2x256xbf16, #tpu.memory_space<vmem>>, vector<2x256xbf16>
    %c0_4 = arith.constant 0 : index
    %c0_5 = arith.constant 0 : index
    %5 = vector.load %arg3[%c0_4, %c0_5] : memref<256x256xbf16, #tpu.memory_space<vmem>>, vector<256x256xbf16>
    %cst = arith.constant dense<0.000000e+00> : vector<2x256xf32>
    %6 = tpu.matmul %4, %5, %cst {dimension_numbers = #tpu.dot_dimension_numbers<[1], [0], [0], [1], [0, 0, 1, 1], [], []>} : vector<2x256xbf16>, vector<256x256xbf16>, vector<2x256xf32> -> vector<2x256xf32>
    %7 = arith.addf %3, %6 : vector<2x256xf32>
    %c0_6 = arith.constant 0 : index
    %c0_7 = arith.constant 0 : index
    %8 = vector.load %arg6[%c0_6, %c0_7] : memref<2x256xf32, #tpu.memory_space<vmem>>, vector<2x256xf32>
    tpu.vector_store %arg6[%c0_6, %c0_7], %7 {strides = array<i32>} : memref<2x256xf32, #tpu.memory_space<vmem>>, vector<2x256xf32>,
    %c0_i32_8 = arith.constant 0 : i32
    %9 = arith.cmpi eq, %arg1, %c0_i32_8 : i32
    %10 = arith.extui %9 : i1 to i32
    %c0_i32_9 = arith.constant 0 : i32
    %11 = arith.cmpi ne, %10, %c0_i32_9 : i32
    scf.if %11 {
      %c0_10 = arith.constant 0 : index
      %c0_11 = arith.constant 0 : index
      %12 = vector.load %arg6[%c0_10, %c0_11] : memref<2x256xf32, #tpu.memory_space<vmem>>, vector<2x256xf32>
      %c0_12 = arith.constant 0 : index
      %c0_13 = arith.constant 0 : index
      %13 = vector.load %arg4[%c0_12, %c0_13] : memref<1x256xf32, #tpu.memory_space<vmem>>, vector<1x256xf32>
      %14 = vector.broadcast %13 : vector<1x256xf32> to vector<2x256xf32>
      %15 = arith.addf %12, %14 : vector<2x256xf32>
      %cst_14 = arith.constant 0.000000e+00 : f32
      %16 = vector.broadcast %cst_14 : f32 to vector<2x256xf32>
      %17 = arith.maximumf %15, %16 : vector<2x256xf32>
      %c0_15 = arith.constant 0 : index
      %c0_16 = arith.constant 0 : index
      %18 = vector.load %arg5[%c0_15, %c0_16] : memref<2x256xf32, #tpu.memory_space<vmem>>, vector<2x256xf32>
      tpu.vector_store %arg5[%c0_15, %c0_16], %17 {strides = array<i32>} : memref<2x256xf32, #tpu.memory_space<vmem>>, vector<2x256xf32>,
    } else {
    }
    return
  }
  func.func @transform_0(%arg0: i32, %arg1: i32) -> (i32, i32) {
    %c0_i32 = arith.constant 0 : i32
    %c0_i32_0 = arith.constant 0 : i32
    return %c0_i32, %arg1 : i32, i32
  }
  func.func @transform_1(%arg0: i32, %arg1: i32) -> (i32, i32) {
    %c0_i32 = arith.constant 0 : i32
    return %arg1, %arg0 : i32, i32
  }
  func.func @transform_2(%arg0: i32, %arg1: i32) -> (i32, i32) {
    %c0_i32 = arith.constant 0 : i32
    %c0_i32_0 = arith.constant 0 : i32
    return %c0_i32, %arg0 : i32, i32
  }
  func.func @transform_3(%arg0: i32, %arg1: i32) -> (i32, i32) {
    %c0_i32 = arith.constant 0 : i32
    %c0_i32_0 = arith.constant 0 : i32
    return %c0_i32, %arg0 : i32, i32
  }
}

</mosaic_0001>

<bundles_post_ra>
// kernel: attention_cnn_forward.3
= control target key start
LH: loop header
LB: loop body
LE: loop exit
PB: predicated region body
PF: predicated region fallthrough
CT: control target
= control target key end

     0   :  { %9 = vsyncpa [#allocation5], 0  ;;  %s1873_s0 = inlined_call_operand.vmem [shape: f32[288], index: 0, kind: input, shape index: {}]   ;;  %s1874_s1 = inlined_call_operand.vmem [shape: f32[8], index: 1, kind: input, shape index: {}]   ;;  %s1875_s2 = inlined_call_operand.vmem [shape: f32[8], index: 2, kind: input, shape index: {}]   ;;  %s1876_s3 = inlined_call_operand.vmem [shape: f32[2,4,38,128], index: 3, kind: input, shape index: {}]   ;;  %s1877_s4 = inlined_call_operand.vmem [shape: f32[2,8,12,128], index: 4, kind: output, shape index: {}]  }
   0x1   :  { %10 = vsyncpa [#allocation7], 0  ;;  %s1530_s15 = smov 0   ;;  %s1532_s16 = smov 0  }
   0x2   :  { %s1534_s17 = smov 0  }
   0x3 LB: > { %s172_s20 = sshll.u32 %s1874_s1, 4  ;;  %s1255_s21 = sadd.s32 4294967295, %s1494_s17   ;;  %s1494_s17 = sphi %s1534_s17, %s16_s17   ;;  %s1490_s16 = sphi %s1532_s16, %s1881_s16   ;;  %s1486_s15 = sphi %s1530_s15, %s1880_s15   ;;  %s173_s20 = int_to_ptr.vmem [resolvable:$true] %s172_s20 }
   0x4   : > { %p1257_p0 = scmp.ge.s32.totalorder %s1494_s17, 1  ;;  %p150_p1 = scmp.lt.s32.totalorder %s1494_s17, 3 }
   0x5   : > { %p1551_p2 = scmp.eq.s32.totalorder %s1255_s21, 0  ;;  %s28_s24 = sadd.s32 1, %s1490_s16 }
   0x6   : > { %p1555_p3 = pnand %p1257_p0, %p150_p1  ;;  %s162_s27 = sshll.u32 %s1873_s0, 4  ;;  %s163_s27 = int_to_ptr.vmem [resolvable:$true] %s162_s27 }
   0x7   : > { %p30_p6 = scmp.ge.s32.totalorder %s28_s24, 2  ;;  %s182_s30 = sshll.u32 %s1875_s2, 4  ;;  %s183_s30 = int_to_ptr.vmem [resolvable:$true] %s182_s30 }
   0x8   : > { %p1362_p4 = pneg %p1555_p3  ;;  %s1500_s5 = smov [#allocation6]  }
   0x9   : > { %s1883_s24 = smov (%p30_p6, %s28_s24), 0  ;;  %s1501_s6 = smov [#allocation4]  }
   0xa   : > { %p1363_p5 = pnand %p1551_p2, %p1362_p4  ;;  %s1502_s7 = smov [#allocation8]  }
   0xb   : > { %203 = sbr.rel (%p1555_p3) target bundleno = 379 (0x17b), region = 36 }
   0xc   : > { %1368 = dma.vmem_to_smem (!%p1363_p5), %s173_s20, 16, %s1500_s5, [#allocation7]  }
   0xd   : > { %1365 = dma.vmem_to_smem (!%p1363_p5), %s163_s27, 48, %s1501_s6, [#allocation5]  }
   0xe   : > { %1371 = dma.vmem_to_smem (!%p1363_p5), %s183_s30, 16, %s1502_s7, [#allocation7]  }
  0x10   : > { %1477 = dma.done.wait (%p1551_p2), [#allocation5], 48  }
  0x11   : > { %1479 = vsyncadd (%p1551_p2), [#allocation5], 4294967248 }
  0x12   : > { %1481 = dma.done.wait (%p1551_p2), [#allocation7], 32  }
  0x13   : > { %1483 = vsyncadd (%p1551_p2), [#allocation7], 4294967264 }
  0x14   : > { %220 = sfence }
  0x15   : > { %p246_p7 = scmp.lt.s32.totalorder %s1486_s15, 1  ;;  %s1504_s19 = smov 126  }
  0x16   : > { %s1638_s20 = smov 0  }
  0x17   : > { %s1885_s15 = smov (!%p246_p7, %s1486_s15), 1 }
  0x18   : > { %s1349_s8 = smul.u32 160, %s1885_s15  ;;  %s1348_s9 = sshll.u32 %s1885_s15, 7 }
  0x19   : > { %s1587_s12 = scalar_lea.vmem %s1877_s4, %s1348_s9  ;;  %s1503_s15 = smov 127  }
  0x1a   : > { %s1592_s18 = scalar_lea.vmem %s1876_s3, %s1349_s8 }
  0x1b   : > { %v262_v0 = vld [vmem:[%s1592_s18] sm:$0xff]  ;;  %v264_v1 = vld [vmem:[%s1592_s18 + $0x10] sm:$0xff]  ;;  %v263_v3 = vld [vmem:[%s1592_s18 + $0x8] sm:$0xff] }
  0x1c   : > { %267 = vrot.lane.b32.xlu0 %v262_v0, %s1503_s15  ;;  %271 = vrot.lane.b32.xlu1 %v264_v1, %s1503_s15  ;;  %v266_v2 = vld [vmem:[%s1592_s18 + $0x20] sm:$0x3f]  ;;  %v265_v4 = vld [vmem:[%s1592_s18 + $0x18] sm:$0xff] }
  0x1d   : > { %275 = vrot.lane.b32.xlu2 %v266_v2, %s1503_s15  ;;  %v1269_v5 = vld [vmem:[%s1592_s18 + $0x28] sm:$0xff]  ;;  %v1270_v6 = vld [vmem:[%s1592_s18 + $0x30] sm:$0xff]  ;;  %v1271_v7 = vld [vmem:[%s1592_s18 + $0x38] sm:$0xff] }
  0x1e   : > { %v1272_v8 = vld [vmem:[%s1592_s18 + $0x40] sm:$0xff]  ;;  %v1273_v9 = vld [vmem:[%s1592_s18 + $0x48] sm:$0x3f]  ;;  %v1274_v10 = vld [vmem:[%s1592_s18 + $0x50] sm:$0xff] }
  0x1f   : > { %v1275_v11 = vld [vmem:[%s1592_s18 + $0x58] sm:$0xff]  ;;  %v1276_v12 = vld [vmem:[%s1592_s18 + $0x60] sm:$0xff]  ;;  %v1277_v13 = vld [vmem:[%s1592_s18 + $0x68] sm:$0xff] }
  0x20   : > { %v1278_v14 = vld [vmem:[%s1592_s18 + $0x70] sm:$0x3f]  ;;  %v1279_v15 = vld [vmem:[%s1592_s18 + $0x78] sm:$0xff]  ;;  %v1280_v16 = vld [vmem:[%s1592_s18 + $0x80] sm:$0xff] }
  0x21   : > { %v1281_v17 = vld [vmem:[%s1592_s18 + $0x88] sm:$0xff]  ;;  %v1282_v18 = vld [vmem:[%s1592_s18 + $0x90] sm:$0xff]  ;;  %v1283_v19 = vld [vmem:[%s1592_s18 + $0x98] sm:$0x3f] }
  0x22   : > { %v352_v20 = vld [vmem:[%s1592_s18 + $0x20] sm:$0x3f]  ;;  %v1288_v21 = vld [vmem:[%s1592_s18 + $0x48] sm:$0x3f]  ;;  %v1293_v22 = vld [vmem:[%s1592_s18 + $0x70] sm:$0x3f] }
  0x23   : > { %v1298_v25 = vld [vmem:[%s1592_s18 + $0x98] sm:$0x3f] }
  0x24   : > { %269 = vrot.lane.b32.xlu0 %v263_v3, %s1503_s15  ;;  %273 = vrot.lane.b32.xlu1 %v265_v4, %s1503_s15 }
  0x25   : > { %288 = vrot.lane.b32.xlu2 %v1269_v5, %s1503_s15 }
  0x2c   : > { %290 = vrot.lane.b32.xlu0 %v1270_v6, %s1503_s15  ;;  %292 = vrot.lane.b32.xlu1 %v1271_v7, %s1503_s15 }
  0x2d   : > { %294 = vrot.lane.b32.xlu2 %v1272_v8, %s1503_s15 }
  0x34   : > { %296 = vrot.lane.b32.xlu0 %v1273_v9, %s1503_s15  ;;  %310 = vrot.lane.b32.xlu1 %v1274_v10, %s1503_s15 }
  0x35   : > { %312 = vrot.lane.b32.xlu2 %v1275_v11, %s1503_s15 }
  0x3c   : > { %314 = vrot.lane.b32.xlu0 %v1276_v12, %s1503_s15  ;;  %316 = vrot.lane.b32.xlu1 %v1277_v13, %s1503_s15 }
  0x3d   : > { %318 = vrot.lane.b32.xlu2 %v1278_v14, %s1503_s15 }
  0x44   : > { %332 = vrot.lane.b32.xlu0 %v1279_v15, %s1503_s15  ;;  %334 = vrot.lane.b32.xlu1 %v1280_v16, %s1503_s15 }
  0x45   : > { %336 = vrot.lane.b32.xlu2 %v1281_v17, %s1503_s15 }
  0x4c   : > { %338 = vrot.lane.b32.xlu0 %v1282_v18, %s1503_s15  ;;  %340 = vrot.lane.b32.xlu1 %v1283_v19, %s1503_s15 }
  0x4d   : > { %353 = vrot.lane.b32.xlu2 %v262_v0, %s1504_s19 }
  0x54   : > { %355 = vrot.lane.b32.xlu0 %v263_v3, %s1504_s19  ;;  %357 = vrot.lane.b32.xlu1 %v264_v1, %s1504_s19 }
  0x55   : > { %359 = vrot.lane.b32.xlu2 %v265_v4, %s1504_s19 }
  0x5c   : > { %361 = vrot.lane.b32.xlu0 %v352_v20, %s1504_s19  ;;  %374 = vrot.lane.b32.xlu1 %v1269_v5, %s1504_s19 }
  0x5d   : > { %376 = vrot.lane.b32.xlu2 %v1270_v6, %s1504_s19 }
  0x64   : > { %378 = vrot.lane.b32.xlu0 %v1271_v7, %s1504_s19  ;;  %380 = vrot.lane.b32.xlu1 %v1272_v8, %s1504_s19 }
  0x65   : > { %382 = vrot.lane.b32.xlu2 %v1288_v21, %s1504_s19 }
  0x6c   : > { %395 = vrot.lane.b32.xlu0 %v1274_v10, %s1504_s19  ;;  %397 = vrot.lane.b32.xlu1 %v1275_v11, %s1504_s19 }
  0x6d   : > { %399 = vrot.lane.b32.xlu2 %v1276_v12, %s1504_s19 }
  0x74   : > { %401 = vrot.lane.b32.xlu0 %v1277_v13, %s1504_s19  ;;  %403 = vrot.lane.b32.xlu1 %v1293_v22, %s1504_s19 }
  0x75   : > { %416 = vrot.lane.b32.xlu2 %v1279_v15, %s1504_s19 }
  0x77   : > { %v276_v23 = vpop.permute.xlu2 %275 }
  0x78   : > { %281 = vst [vmem:[#allocation2 + $0x20] sm:$0x3f] %v276_v23 }
  0x7c   : > { %418 = vrot.lane.b32.xlu0 %v1280_v16, %s1504_s19  ;;  %420 = vrot.lane.b32.xlu1 %v1281_v17, %s1504_s19 }
  0x7d   : > { %422 = vrot.lane.b32.xlu2 %v1282_v18, %s1504_s19 }
  0x7f   : > { %v289_v24 = vpop.permute.xlu2 %288 }
  0x80   : > { %299 = vst [vmem:[#allocation2 + $0x28] sm:$0xff] %v289_v24 }
  0x84   : > { %424 = vrot.lane.b32.xlu0 %v1298_v25, %s1504_s19 }
  0x87   : > { %v295_v26 = vpop.permute.xlu2 %294 }
  0x88   : > { %302 = vst [vmem:[#allocation2 + $0x40] sm:$0xff] %v295_v26 }
  0x8e   : > { %v268_v27 = vpop.permute.xlu0 %267  ;;  %v272_v28 = vpop.permute.xlu1 %271 }
  0x8f   : > { %277 = vst [vmem:[#allocation2] sm:$0xff] %v268_v27  ;;  %v313_v29 = vpop.permute.xlu2 %312 }
  0x90   : > { %279 = vst [vmem:[#allocation2 + $0x10] sm:$0xff] %v272_v28 }
  0x91   : > { %322 = vst [vmem:[#allocation2 + $0x58] sm:$0xff] %v313_v29 }
  0x96   : > { %v270_v30 = vpop.permute.xlu0 %269  ;;  %v274_v31 = vpop.permute.xlu1 %273 }
  0x97   : > { %278 = vst [vmem:[#allocation2 + $0x8] sm:$0xff] %v270_v30  ;;  %v319_v32 = vpop.permute.xlu2 %318 }
  0x98   : > { %280 = vst [vmem:[#allocation2 + $0x18] sm:$0xff] %v274_v31 }
  0x99   : > { %325 = vst [vmem:[#allocation2 + $0x70] sm:$0x3f] %v319_v32 }
  0x9e   : > { %v291_v33 = vpop.permute.xlu0 %290  ;;  %v293_v34 = vpop.permute.xlu1 %292 }
  0x9f   : > { %300 = vst [vmem:[#allocation2 + $0x30] sm:$0xff] %v291_v33  ;;  %v337_v35 = vpop.permute.xlu2 %336 }
  0xa0   : > { %301 = vst [vmem:[#allocation2 + $0x38] sm:$0xff] %v293_v34 }
  0xa1   : > { %345 = vst [vmem:[#allocation2 + $0x88] sm:$0xff] %v337_v35 }
  0xa6   : > { %v297_v36 = vpop.permute.xlu0 %296  ;;  %v311_v37 = vpop.permute.xlu1 %310 }
  0xa7   : > { %303 = vst [vmem:[#allocation2 + $0x48] sm:$0x3f] %v297_v36  ;;  %v354_v38 = vpop.permute.xlu2 %353 }
  0xa8   : > { %321 = vst [vmem:[#allocation2 + $0x50] sm:$0xff] %v311_v37 }
  0xa9   : > { %364 = vst [vmem:[#allocation2 + $0xa0] sm:$0xff] %v354_v38 }
  0xae   : > { %v315_v39 = vpop.permute.xlu0 %314  ;;  %v317_v40 = vpop.permute.xlu1 %316 }
  0xaf   : > { %323 = vst [vmem:[#allocation2 + $0x60] sm:$0xff] %v315_v39  ;;  %v360_v41 = vpop.permute.xlu2 %359 }
  0xb0   : > { %324 = vst [vmem:[#allocation2 + $0x68] sm:$0xff] %v317_v40 }
  0xb1   : > { %367 = vst [vmem:[#allocation2 + $0xb8] sm:$0xff] %v360_v41 }
  0xb6   : > { %v333_v42 = vpop.permute.xlu0 %332  ;;  %v335_v43 = vpop.permute.xlu1 %334 }
  0xb7   : > { %343 = vst [vmem:[#allocation2 + $0x78] sm:$0xff] %v333_v42  ;;  %v377_v44 = vpop.permute.xlu2 %376 }
  0xb8   : > { %344 = vst [vmem:[#allocation2 + $0x80] sm:$0xff] %v335_v43 }
  0xb9   : > { %386 = vst [vmem:[#allocation2 + $0xd0] sm:$0xff] %v377_v44 }
  0xbe   : > { %v339_v45 = vpop.permute.xlu0 %338  ;;  %v341_v46 = vpop.permute.xlu1 %340 }
  0xbf   : > { %346 = vst [vmem:[#allocation2 + $0x90] sm:$0xff] %v339_v45  ;;  %v383_v47 = vpop.permute.xlu2 %382 }
  0xc0   : > { %347 = vst [vmem:[#allocation2 + $0x98] sm:$0x3f] %v341_v46 }
  0xc1   : > { %389 = vst [vmem:[#allocation2 + $0xe8] sm:$0x3f] %v383_v47 }
  0xc6   : > { %v356_v48 = vpop.permute.xlu0 %355  ;;  %v358_v49 = vpop.permute.xlu1 %357 }
  0xc7   : > { %365 = vst [vmem:[#allocation2 + $0xa8] sm:$0xff] %v356_v48  ;;  %v400_v50 = vpop.permute.xlu2 %399 }
  0xc8   : > { %366 = vst [vmem:[#allocation2 + $0xb0] sm:$0xff] %v358_v49 }
  0xc9   : > { %408 = vst [vmem:[#allocation2 + $0x100] sm:$0xff] %v400_v50 }
  0xce   : > { %v362_v51 = vpop.permute.xlu0 %361  ;;  %v375_v52 = vpop.permute.xlu1 %374 }
  0xcf   : > { %368 = vst [vmem:[#allocation2 + $0xc0] sm:$0x3f] %v362_v51  ;;  %v417_v53 = vpop.permute.xlu2 %416 }
  0xd0   : > { %385 = vst [vmem:[#allocation2 + $0xc8] sm:$0xff] %v375_v52 }
  0xd1   : > { %427 = vst [vmem:[#allocation2 + $0x118] sm:$0xff] %v417_v53 }
  0xd6   : > { %v379_v54 = vpop.permute.xlu0 %378  ;;  %v381_v55 = vpop.permute.xlu1 %380 }
  0xd7   : > { %387 = vst [vmem:[#allocation2 + $0xd8] sm:$0xff] %v379_v54  ;;  %v423_v56 = vpop.permute.xlu2 %422 }
  0xd8   : > { %388 = vst [vmem:[#allocation2 + $0xe0] sm:$0xff] %v381_v55 }
  0xd9   : > { %430 = vst [vmem:[#allocation2 + $0x130] sm:$0xff] %v423_v56 }
  0xde   : > { %v396_v57 = vpop.permute.xlu0 %395  ;;  %v398_v58 = vpop.permute.xlu1 %397 }
  0xdf   : > { %406 = vst [vmem:[#allocation2 + $0xf0] sm:$0xff] %v396_v57 }
  0xe0   : > { %407 = vst [vmem:[#allocation2 + $0xf8] sm:$0xff] %v398_v58 }
  0xe6   : > { %v402_v59 = vpop.permute.xlu0 %401  ;;  %v404_v60 = vpop.permute.xlu1 %403 }
  0xe7   : > { %409 = vst [vmem:[#allocation2 + $0x108] sm:$0xff] %v402_v59 }
  0xe8   : > { %410 = vst [vmem:[#allocation2 + $0x110] sm:$0x3f] %v404_v60 }
  0xee   : > { %v419_v61 = vpop.permute.xlu0 %418  ;;  %v421_v62 = vpop.permute.xlu1 %420 }
  0xef   : > { %428 = vst [vmem:[#allocation2 + $0x120] sm:$0xff] %v419_v61 }
  0xf0   : > { %429 = vst [vmem:[#allocation2 + $0x128] sm:$0xff] %v421_v62 }
  0xf6   : > { %v425_v63 = vpop.permute.xlu0 %424 }
  0xf7   : > { %431 = vst [vmem:[#allocation2 + $0x138] sm:$0x3f] %v425_v63 }
  0xf8 LB: >> { %s1644_s21 = smul.u32 36, %s1498_s20  ;;  %s1304_s22 = sshll.u32 %s1498_s20, 2  ;;  %v440_v0 = vld [vmem:[%s1592_s18] sm:$0xff]  ;;  %v441_v1 = vld [vmem:[%s1592_s18 + $0x8] sm:$0xff]  ;;  %v442_v2 = vld [vmem:[%s1592_s18 + $0x10] sm:$0xff]  ;;  %s1498_s20 = sphi %s1638_s20, %s437_s20  }
  0xf9   : >> { %s459_s23 = sadd.s32 1, %s1304_s22  ;;  %s478_s25 = sadd.s32 2, %s1304_s22  ;;  %v443_v3 = vld [vmem:[%s1592_s18 + $0x18] sm:$0xff]  ;;  %v444_v4 = vld [vmem:[%s1592_s18 + $0x20] sm:$0xf]  ;;  %v1299_v5 = vld [vmem:[%s1592_s18 + $0x28] sm:$0xff] }
  0xfa   : >> { %s446_s26 = sld [smem:[#allocation4 + %s1644_s21]]  ;;  %s1648_s27 = smul.u32 9, %s459_s23  ;;  %v1300_v7 = vld [vmem:[%s1592_s18 + $0x30] sm:$0xff]  ;;  %v1301_v8 = vld [vmem:[%s1592_s18 + $0x38] sm:$0xff]  ;;  %v1302_v9 = vld [vmem:[%s1592_s18 + $0x40] sm:$0xff] }
  0xfb   : >> { %s1650_s28 = smul.u32 9, %s478_s25  ;;  %s497_s29 = sadd.s32 3, %s1304_s22  ;;  %v1303_v14 = vld [vmem:[%s1592_s18 + $0x48] sm:$0xf]  ;;  %v1305_v17 = vld [vmem:[%s1592_s18 + $0x50] sm:$0xff]  ;;  %v1306_v18 = vld [vmem:[%s1592_s18 + $0x58] sm:$0xff] }
  0xfc   : >> { %s461_s30 = sld [smem:[#allocation4 + %s1648_s27]]  ;;  %s1653_s5 = smul.u32 9, %s497_s29  ;;  %v1307_v23 = vld [vmem:[%s1592_s18 + $0x60] sm:$0xff]  ;;  %v1308_v24 = vld [vmem:[%s1592_s18 + $0x68] sm:$0xff]  ;;  %v1309_v25 = vld [vmem:[%s1592_s18 + $0x70] sm:$0xf] }
  0xfd   : >> { %s1657_s6 = sld [smem:[#allocation4 + %s1650_s28]]  ;;  %s516_s8 = sadd.s32 1, %s1644_s21  ;;  %v1310_v28 = vld [vmem:[%s1592_s18 + $0x78] sm:$0xff]  ;;  %v1311_v29 = vld [vmem:[%s1592_s18 + $0x80] sm:$0xff]  ;;  %v1312_v35 = vld [vmem:[%s1592_s18 + $0x88] sm:$0xff] }
  0xfe   : >> { %s1663_s7 = sld [smem:[#allocation4 + %s1653_s5]]  ;;  %s534_s9 = sadd.s32 1, %s1648_s27  ;;  %v1313_v40 = vld [vmem:[%s1592_s18 + $0x90] sm:$0xff]  ;;  %v1314_v41 = vld [vmem:[%s1592_s18 + $0x98] sm:$0xf]  ;;  %v511_v50 = vld [vmem:[#allocation2] sm:$0xff] }
  0xff   : >> { %s1675_s10 = sld [smem:[#allocation4 + %s516_s8]]  ;;  %s552_s11 = sadd.s32 1, %s1650_s28  ;;  %v512_v51 = vld [vmem:[#allocation2 + $0x8] sm:$0xff]  ;;  %v513_v56 = vld [vmem:[#allocation2 + $0x10] sm:$0xff]  ;;  %v514_v57 = vld [vmem:[#allocation2 + $0x18] sm:$0xff] }
 0x100   : >> { %v447_v6 = vstv %s446_s26  ;;  %s1685_s13 = sld [smem:[#allocation4 + %s534_s9]]  ;;  %s570_s14 = sadd.s32 1, %s1653_s5  ;;  %v515_v58 = vld [vmem:[#allocation2 + $0x20] sm:$0xf]  ;;  %v529_v63 = vld [vmem:[#allocation2 + $0x28] sm:$0xff] }
 0x101   : >> { %v448_v10 = vmul.f32 %v447_v6, %v440_v0  ;;  %v449_v11 = vmul.f32 %v447_v6, %v441_v1  ;;  %v450_v12 = vmul.f32 %v447_v6, %v442_v2  ;;  %v451_v13 = vmul.f32 %v447_v6, %v443_v3  ;;  %s588_s15 = sadd.s32 2, %s1644_s21  ;;  %s1692_s19 = sld [smem:[#allocation4 + %s552_s11]]  ;;  %v530_v0 = vld [vmem:[#allocation2 + $0x30] sm:$0xff] }
 0x102   : >> { %v452_v15 = vmul.f32 %v447_v6, %v444_v4  ;;  %v462_v16 = vstv %s461_s30  ;;  %s1694_s22 = sld [smem:[#allocation4 + %s570_s14]]  ;;  %s606_s25 = sadd.s32 2, %s1648_s27 }
 0x103   : >> { %v463_v19 = vmul.f32 %v1299_v5, %v462_v16  ;;  %v464_v20 = vmul.f32 %v1300_v7, %v462_v16  ;;  %v465_v21 = vmul.f32 %v1301_v8, %v462_v16  ;;  %v466_v22 = vmul.f32 %v1302_v9, %v462_v16  ;;  %s1696_s23 = sld [smem:[#allocation4 + %s588_s15]]  ;;  %v531_v5 = vld [vmem:[#allocation2 + $0x38] sm:$0xff]  ;;  %v532_v9 = vld [vmem:[#allocation2 + $0x40] sm:$0xff]  ;;  %s624_s26 = sadd.s32 2, %s1650_s28 }
 0x104   : >> { %v467_v26 = vmul.f32 %v1303_v14, %v462_v16  ;;  %v481_v27 = vstv %s1657_s6  ;;  %v500_v30 = vstv %s1663_s7  ;;  %s1702_s29 = sld [smem:[#allocation4 + %s606_s25]]  ;;  %s642_s6 = sadd.s32 2, %s1653_s5 }
 0x105   : >> { %v468_v31 = vadd.f32 %v463_v19, %v448_v10  ;;  %v469_v32 = vadd.f32 %v464_v20, %v449_v11  ;;  %v470_v33 = vadd.f32 %v465_v21, %v450_v12  ;;  %v471_v34 = vadd.f32 %v466_v22, %v451_v13  ;;  %v533_v10 = vld [vmem:[#allocation2 + $0x48] sm:$0xf]  ;;  %v547_v20 = vld [vmem:[#allocation2 + $0x50] sm:$0xff]  ;;  %v548_v21 = vld [vmem:[#allocation2 + $0x58] sm:$0xff]  ;;  %s1707_s30 = sld [smem:[#allocation4 + %s624_s26]]  ;;  %s660_s7 = sadd.s32 3, %s1644_s21 }
 0x106   : >> { %v472_v36 = vadd.f32 %v467_v26, %v452_v15  ;;  %v482_v37 = vmul.f32 %v1305_v17, %v481_v27  ;;  %v483_v38 = vmul.f32 %v1306_v18, %v481_v27  ;;  %v484_v39 = vmul.f32 %v1307_v23, %v481_v27  ;;  %v549_v22 = vld [vmem:[#allocation2 + $0x60] sm:$0xff]  ;;  %s1711_s8 = sld [smem:[#allocation4 + %s642_s6]]  ;;  %s678_s9 = sadd.s32 3, %s1648_s27 }
 0x107   : >> { %v485_v42 = vmul.f32 %v1308_v24, %v481_v27  ;;  %v486_v43 = vmul.f32 %v1309_v25, %v481_v27  ;;  %v501_v44 = vmul.f32 %v1310_v28, %v500_v30  ;;  %v502_v45 = vmul.f32 %v1311_v29, %v500_v30  ;;  %v550_v27 = vld [vmem:[#allocation2 + $0x68] sm:$0xff]  ;;  %v551_v28 = vld [vmem:[#allocation2 + $0x70] sm:$0xf]  ;;  %v565_v29 = vld [vmem:[#allocation2 + $0x78] sm:$0xff]  ;;  %s1718_s11 = sld [smem:[#allocation4 + %s678_s9]]  ;;  %s714_s15 = sadd.s32 3, %s1653_s5 }
 0x108   : >> { %v487_v46 = vadd.f32 %v482_v37, %v468_v31  ;;  %v488_v47 = vadd.f32 %v483_v38, %v469_v32  ;;  %v489_v48 = vadd.f32 %v484_v39, %v470_v33  ;;  %v503_v49 = vmul.f32 %v1312_v35, %v500_v30  ;;  %v566_v32 = vld [vmem:[#allocation2 + $0x80] sm:$0xff]  ;;  %v567_v33 = vld [vmem:[#allocation2 + $0x88] sm:$0xff]  ;;  %s786_s6 = sadd.s32 4, %s1653_s5  ;;  %s822_s9 = sadd.s32 5, %s1648_s27 }
 0x109   : >> { %v490_v52 = vadd.f32 %v485_v42, %v471_v34  ;;  %v491_v53 = vadd.f32 %v486_v43, %v472_v36  ;;  %v504_v54 = vmul.f32 %v1313_v40, %v500_v30  ;;  %v505_v55 = vmul.f32 %v1314_v41, %v500_v30  ;;  %v568_v40 = vld [vmem:[#allocation2 + $0x90] sm:$0xff] }
 0x10a   : >> { %v506_v59 = vadd.f32 %v501_v44, %v487_v46  ;;  %v507_v60 = vadd.f32 %v502_v45, %v488_v47  ;;  %v508_v61 = vadd.f32 %v503_v49, %v489_v48  ;;  %v518_v62 = vstv %s1675_s10  ;;  %v569_v44 = vld [vmem:[#allocation2 + $0x98] sm:$0xf]  ;;  %v583_v46 = vld [vmem:[#allocation2 + $0xa0] sm:$0xff]  ;;  %s1714_s10 = sld [smem:[#allocation4 + %s660_s7]]  ;;  %s804_s7 = sadd.s32 5, %s1644_s21 }
 0x10b   : >> { %v509_v1 = vadd.f32 %v504_v54, %v490_v52  ;;  %v510_v2 = vadd.f32 %v505_v55, %v491_v53  ;;  %v519_v3 = vmul.f32 %v518_v62, %v511_v50  ;;  %v520_v4 = vmul.f32 %v518_v62, %v512_v51  ;;  %v584_v51 = vld [vmem:[#allocation2 + $0xa8] sm:$0xff]  ;;  %v585_v52 = vld [vmem:[#allocation2 + $0xb0] sm:$0xff] }
 0x10c   : >> { %v521_v6 = vmul.f32 %v518_v62, %v513_v56  ;;  %v522_v7 = vmul.f32 %v518_v62, %v514_v57  ;;  %v523_v8 = vmul.f32 %v518_v62, %v515_v58  ;;  %v536_v11 = vstv %s1685_s13  ;;  %v586_v57 = vld [vmem:[#allocation2 + $0xb8] sm:$0xff]  ;;  %v587_v58 = vld [vmem:[#allocation2 + $0xc0] sm:$0xf]  ;;  %s696_s13 = sadd.s32 3, %s1650_s28 }
 0x10d   : >> { %v524_v12 = vadd.f32 %v519_v3, %v506_v59  ;;  %v525_v13 = vadd.f32 %v520_v4, %v507_v60  ;;  %v537_v14 = vmul.f32 %v536_v11, %v529_v63  ;;  %v538_v15 = vmul.f32 %v536_v11, %v530_v0  ;;  %v601_v3 = vld [vmem:[#allocation2 + $0xc8] sm:$0xff]  ;;  %v602_v4 = vld [vmem:[#allocation2 + $0xd0] sm:$0xff]  ;;  %s1722_s14 = sld [smem:[#allocation4 + %s696_s13]]  ;;  %s840_s13 = sadd.s32 5, %s1650_s28 }
 0x10e   : >> { %v526_v16 = vadd.f32 %v521_v6, %v508_v61  ;;  %v527_v17 = vadd.f32 %v522_v7, %v509_v1  ;;  %v528_v18 = vadd.f32 %v523_v8, %v510_v2  ;;  %v539_v19 = vmul.f32 %v536_v11, %v531_v5  ;;  %v603_v5 = vld [vmem:[#allocation2 + $0xd8] sm:$0xff] }
 0x10f   : >> { %v540_v23 = vmul.f32 %v536_v11, %v532_v9  ;;  %v541_v24 = vmul.f32 %v536_v11, %v533_v10  ;;  %v542_v25 = vadd.f32 %v537_v14, %v524_v12  ;;  %v543_v26 = vadd.f32 %v538_v15, %v525_v13  ;;  %v604_v10 = vld [vmem:[#allocation2 + $0xe0] sm:$0xff]  ;;  %v605_v11 = vld [vmem:[#allocation2 + $0xe8] sm:$0xf]  ;;  %v619_v12 = vld [vmem:[#allocation2 + $0xf0] sm:$0xff] }
 0x110   : >> { %v544_v30 = vadd.f32 %v539_v19, %v526_v16  ;;  %v554_v31 = vstv %s1692_s19  ;;  %v572_v34 = vstv %s1694_s22  ;;  %v590_v35 = vstv %s1696_s23  ;;  %v620_v16 = vld [vmem:[#allocation2 + $0xf8] sm:$0xff]  ;;  %s732_s19 = sadd.s32 4, %s1644_s21  ;;  %s1736_s22 = sld [smem:[#allocation4 + %s714_s15]] }
 0x111   : >> { %v545_v36 = vadd.f32 %v540_v23, %v527_v17  ;;  %v546_v37 = vadd.f32 %v541_v24, %v528_v18  ;;  %v555_v38 = vmul.f32 %v554_v31, %v547_v20  ;;  %v556_v39 = vmul.f32 %v554_v31, %v548_v21  ;;  %v621_v17 = vld [vmem:[#allocation2 + $0x100] sm:$0xff]  ;;  %v622_v23 = vld [vmem:[#allocation2 + $0x108] sm:$0xff]  ;;  %s750_s23 = sadd.s32 4, %s1648_s27  ;;  %s1741_s25 = sld [smem:[#allocation4 + %s732_s19]] }
 0x112   : >> { %v557_v41 = vmul.f32 %v554_v31, %v549_v22  ;;  %v558_v42 = vmul.f32 %v554_v31, %v550_v27  ;;  %v559_v43 = vmul.f32 %v554_v31, %v551_v28  ;;  %v573_v45 = vmul.f32 %v572_v34, %v565_v29  ;;  %v623_v27 = vld [vmem:[#allocation2 + $0x110] sm:$0xf]  ;;  %s1745_s26 = sld [smem:[#allocation4 + %s750_s23]]  ;;  %s858_s15 = sadd.s32 5, %s1653_s5 }
 0x113   : >> { %v560_v47 = vadd.f32 %v555_v38, %v542_v25  ;;  %v561_v48 = vadd.f32 %v556_v39, %v543_v26  ;;  %v574_v49 = vmul.f32 %v572_v34, %v566_v32  ;;  %v575_v50 = vmul.f32 %v572_v34, %v567_v33  ;;  %v637_v33 = vld [vmem:[#allocation2 + $0x118] sm:$0xff]  ;;  %v639_v39 = vld [vmem:[#allocation2 + $0x128] sm:$0xff]  ;;  %s876_s19 = sadd.s32 6, %s1644_s21  ;;  %s894_s23 = sadd.s32 6, %s1648_s27 }
 0x114   : >> { %v562_v53 = vadd.f32 %v557_v41, %v544_v30  ;;  %v563_v54 = vadd.f32 %v558_v42, %v545_v36  ;;  %v564_v55 = vadd.f32 %v559_v43, %v546_v37  ;;  %v576_v56 = vmul.f32 %v572_v34, %v568_v40  ;;  %v640_v40 = vld [vmem:[#allocation2 + $0x130] sm:$0xff]  ;;  %v641_v41 = vld [vmem:[#allocation2 + $0x138] sm:$0xf] }
 0x115   : >> { %v577_v59 = vmul.f32 %v572_v34, %v569_v44  ;;  %v578_v60 = vadd.f32 %v573_v45, %v560_v47  ;;  %v579_v61 = vadd.f32 %v574_v49, %v561_v48  ;;  %v591_v62 = vmul.f32 %v590_v35, %v583_v46  ;;  %v638_v34 = vld [vmem:[#allocation2 + $0x120] sm:$0xff] }
 0x116   : >> { %v580_v63 = vadd.f32 %v575_v50, %v562_v53  ;;  %v581_v0 = vadd.f32 %v576_v56, %v563_v54  ;;  %v592_v1 = vmul.f32 %v590_v35, %v584_v51  ;;  %v593_v2 = vmul.f32 %v590_v35, %v585_v52  ;;  %v655_v50 = vld [vmem:[%s1592_s18 + $0x1] sm:$0xff]  ;;  %v656_v51 = vld [vmem:[%s1592_s18 + $0x9] sm:$0xff]  ;;  %v657_v52 = vld [vmem:[%s1592_s18 + $0x11] sm:$0xff] }
 0x117   : >> { %v582_v6 = vadd.f32 %v577_v59, %v564_v55  ;;  %v594_v7 = vmul.f32 %v590_v35, %v586_v57  ;;  %v595_v8 = vmul.f32 %v590_v35, %v587_v58  ;;  %v596_v9 = vadd.f32 %v591_v62, %v578_v60  ;;  %v658_v57 = vld [vmem:[%s1592_s18 + $0x19] sm:$0xff]  ;;  %v659_v58 = vld [vmem:[%s1592_s18 + $0x21] sm:$0xf]  ;;  %v1315_v59 = vld [vmem:[%s1592_s18 + $0x29] sm:$0xff] }
 0x118   : >> { %v597_v13 = vadd.f32 %v592_v1, %v579_v61  ;;  %v598_v14 = vadd.f32 %v593_v2, %v580_v63  ;;  %v608_v15 = vstv %s1702_s29  ;;  %v626_v18 = vstv %s1707_s30  ;;  %v1316_v63 = vld [vmem:[%s1592_s18 + $0x31] sm:$0xff]  ;;  %s768_s29 = sadd.s32 4, %s1650_s28 }
 0x119   : >> { %v599_v19 = vadd.f32 %v594_v7, %v581_v0  ;;  %v600_v20 = vadd.f32 %v595_v8, %v582_v6  ;;  %v609_v21 = vmul.f32 %v608_v15, %v601_v3  ;;  %v610_v22 = vmul.f32 %v608_v15, %v602_v4  ;;  %v1317_v0 = vld [vmem:[%s1592_s18 + $0x39] sm:$0xff]  ;;  %s1758_s30 = sld [smem:[#allocation4 + %s768_s29]]  ;;  %s912_s29 = sadd.s32 6, %s1650_s28 }
 0x11a   : >> { %v611_v24 = vmul.f32 %v608_v15, %v603_v5  ;;  %v612_v25 = vmul.f32 %v608_v15, %v604_v10  ;;  %v613_v26 = vmul.f32 %v608_v15, %v605_v11  ;;  %v627_v28 = vmul.f32 %v626_v18, %v619_v12  ;;  %v1318_v10 = vld [vmem:[%s1592_s18 + $0x41] sm:$0xff]  ;;  %v1319_v11 = vld [vmem:[%s1592_s18 + $0x49] sm:$0xf] }
 0x11b   : >> { %v614_v29 = vadd.f32 %v609_v21, %v596_v9  ;;  %v615_v30 = vadd.f32 %v610_v22, %v597_v13  ;;  %v628_v31 = vmul.f32 %v626_v18, %v620_v16  ;;  %v629_v32 = vmul.f32 %v626_v18, %v621_v17  ;;  %v1320_v16 = vld [vmem:[%s1592_s18 + $0x51] sm:$0xff]  ;;  %v1321_v17 = vld [vmem:[%s1592_s18 + $0x59] sm:$0xff]  ;;  %v1322_v22 = vld [vmem:[%s1592_s18 + $0x61] sm:$0xff] }
 0x11c   : >> { %v616_v35 = vadd.f32 %v611_v24, %v598_v14  ;;  %v617_v36 = vadd.f32 %v612_v25, %v599_v19  ;;  %v618_v37 = vadd.f32 %v613_v26, %v600_v20  ;;  %v630_v38 = vmul.f32 %v626_v18, %v622_v23  ;;  %v1323_v23 = vld [vmem:[%s1592_s18 + $0x69] sm:$0xff] }
 0x11d   : >> { %v631_v42 = vmul.f32 %v626_v18, %v623_v27  ;;  %v632_v43 = vadd.f32 %v627_v28, %v614_v29  ;;  %v633_v44 = vadd.f32 %v628_v31, %v615_v30  ;;  %v644_v45 = vstv %s1711_s8  ;;  %v1324_v27 = vld [vmem:[%s1592_s18 + $0x71] sm:$0xf]  ;;  %s1764_s8 = sld [smem:[#allocation4 + %s786_s6]]  ;;  %s930_s6 = sadd.s32 6, %s1653_s5 }
 0x11e   : >> { %v634_v46 = vadd.f32 %v629_v32, %v616_v35  ;;  %v635_v47 = vadd.f32 %v630_v38, %v617_v36  ;;  %v645_v48 = vmul.f32 %v644_v45, %v637_v33  ;;  %v646_v49 = vmul.f32 %v644_v45, %v638_v34  ;;  %v1325_v33 = vld [vmem:[%s1592_s18 + $0x79] sm:$0xff]  ;;  %v1326_v34 = vld [vmem:[%s1592_s18 + $0x81] sm:$0xff] }
 0x11f   : >> { %v636_v53 = vadd.f32 %v631_v42, %v618_v37  ;;  %v647_v54 = vmul.f32 %v644_v45, %v639_v39  ;;  %v648_v55 = vmul.f32 %v644_v45, %v640_v40  ;;  %v649_v56 = vmul.f32 %v644_v45, %v641_v41  ;;  %v1327_v39 = vld [vmem:[%s1592_s18 + $0x89] sm:$0xff]  ;;  %v1328_v40 = vld [vmem:[%s1592_s18 + $0x91] sm:$0xff]  ;;  %v1329_v41 = vld [vmem:[%s1592_s18 + $0x99] sm:$0xf] }
 0x120   : >> { %v650_v60 = vadd.f32 %v645_v48, %v632_v43  ;;  %v651_v61 = vadd.f32 %v646_v49, %v633_v44  ;;  %v662_v62 = vstv %s1714_s10  ;;  %v680_v1 = vstv %s1718_s11  ;;  %s1767_s10 = sld [smem:[#allocation4 + %s804_s7]]  ;;  %s948_s7 = sadd.s32 7, %s1644_s21 }
 0x121   : >> { %v652_v2 = vadd.f32 %v647_v54, %v634_v46  ;;  %v653_v3 = vadd.f32 %v648_v55, %v635_v47  ;;  %v654_v4 = vadd.f32 %v649_v56, %v636_v53  ;;  %v663_v5 = vmul.f32 %v662_v62, %v655_v50  ;;  %v727_v50 = vld [vmem:[#allocation2 + $0x1] sm:$0xff]  ;;  %v729_v56 = vld [vmem:[#allocation2 + $0x11] sm:$0xff]  ;;  %s1769_s11 = sld [smem:[#allocation4 + %s822_s9]]  ;;  %s966_s9 = sadd.s32 7, %s1648_s27 }
 0x122   : >> { %v664_v6 = vmul.f32 %v662_v62, %v656_v51  ;;  %v665_v7 = vmul.f32 %v662_v62, %v657_v52  ;;  %v666_v8 = vmul.f32 %v662_v62, %v658_v57  ;;  %v667_v9 = vmul.f32 %v662_v62, %v659_v58  ;;  %v728_v51 = vld [vmem:[#allocation2 + $0x9] sm:$0xff]  ;;  %v730_v57 = vld [vmem:[#allocation2 + $0x19] sm:$0xff]  ;;  %v731_v58 = vld [vmem:[#allocation2 + $0x21] sm:$0xf] }
 0x123   : >> { %v668_v12 = vadd.f32 %v663_v5, %v650_v60  ;;  %v681_v13 = vmul.f32 %v1315_v59, %v680_v1  ;;  %v682_v14 = vmul.f32 %v1316_v63, %v680_v1  ;;  %v683_v15 = vmul.f32 %v1317_v0, %v680_v1  ;;  %v745_v62 = vld [vmem:[#allocation2 + $0x29] sm:$0xff]  ;;  %v746_v63 = vld [vmem:[#allocation2 + $0x31] sm:$0xff]  ;;  %v747_v0 = vld [vmem:[#allocation2 + $0x39] sm:$0xff] }
 0x124   : >> { %v669_v18 = vadd.f32 %v664_v6, %v651_v61  ;;  %v670_v19 = vadd.f32 %v665_v7, %v652_v2  ;;  %v671_v20 = vadd.f32 %v666_v8, %v653_v3  ;;  %v672_v21 = vadd.f32 %v667_v9, %v654_v4 }
 0x125   : >> { %v684_v24 = vmul.f32 %v1318_v10, %v680_v1  ;;  %v685_v25 = vmul.f32 %v1319_v11, %v680_v1  ;;  %v686_v26 = vadd.f32 %v681_v13, %v668_v12  ;;  %v698_v28 = vstv %s1722_s14  ;;  %v748_v10 = vld [vmem:[#allocation2 + $0x41] sm:$0xff]  ;;  %v749_v11 = vld [vmem:[#allocation2 + $0x49] sm:$0xf]  ;;  %s1774_s14 = sld [smem:[#allocation4 + %s840_s13]]  ;;  %s984_s13 = sadd.s32 7, %s1650_s28 }
 0x126   : >> { %v687_v29 = vadd.f32 %v682_v14, %v669_v18  ;;  %v688_v30 = vadd.f32 %v683_v15, %v670_v19  ;;  %v699_v31 = vmul.f32 %v1320_v16, %v698_v28  ;;  %v700_v32 = vmul.f32 %v1321_v17, %v698_v28  ;;  %v763_v16 = vld [vmem:[#allocation2 + $0x51] sm:$0xff]  ;;  %v764_v17 = vld [vmem:[#allocation2 + $0x59] sm:$0xff] }
 0x127   : >> { %v689_v35 = vadd.f32 %v684_v24, %v671_v20  ;;  %v690_v36 = vadd.f32 %v685_v25, %v672_v21  ;;  %v701_v37 = vmul.f32 %v1322_v22, %v698_v28  ;;  %v702_v38 = vmul.f32 %v1323_v23, %v698_v28  ;;  %v765_v22 = vld [vmem:[#allocation2 + $0x61] sm:$0xff]  ;;  %v766_v23 = vld [vmem:[#allocation2 + $0x69] sm:$0xff] }
 0x128   : >> { %v703_v42 = vmul.f32 %v1324_v27, %v698_v28  ;;  %v704_v43 = vadd.f32 %v699_v31, %v686_v26  ;;  %v705_v44 = vadd.f32 %v700_v32, %v687_v29  ;;  %v716_v45 = vstv %s1736_s22  ;;  %v767_v27 = vld [vmem:[#allocation2 + $0x71] sm:$0xf]  ;;  %s1780_s22 = sld [smem:[#allocation4 + %s858_s15]]  ;;  %s1002_s15 = sadd.s32 7, %s1653_s5 }
 0x129   : >> { %v706_v46 = vadd.f32 %v701_v37, %v688_v30  ;;  %v707_v47 = vadd.f32 %v702_v38, %v689_v35  ;;  %v717_v48 = vmul.f32 %v1325_v33, %v716_v45  ;;  %v718_v49 = vmul.f32 %v1326_v34, %v716_v45  ;;  %v781_v33 = vld [vmem:[#allocation2 + $0x79] sm:$0xff]  ;;  %v782_v34 = vld [vmem:[#allocation2 + $0x81] sm:$0xff] }
 0x12a   : >> { %v708_v52 = vadd.f32 %v703_v42, %v690_v36  ;;  %v719_v53 = vmul.f32 %v1327_v39, %v716_v45  ;;  %v720_v54 = vmul.f32 %v1328_v40, %v716_v45  ;;  %v721_v55 = vmul.f32 %v1329_v41, %v716_v45  ;;  %v783_v39 = vld [vmem:[#allocation2 + $0x89] sm:$0xff]  ;;  %v784_v40 = vld [vmem:[#allocation2 + $0x91] sm:$0xff]  ;;  %v785_v41 = vld [vmem:[#allocation2 + $0x99] sm:$0xf] }
 0x12b   : >> { %v722_v59 = vadd.f32 %v717_v48, %v704_v43  ;;  %v723_v60 = vadd.f32 %v718_v49, %v705_v44  ;;  %v734_v61 = vstv %s1741_s25  ;;  %v752_v1 = vstv %s1745_s26  ;;  %s1783_s25 = sld [smem:[#allocation4 + %s876_s19]]  ;;  %s1020_s19 = sadd.s32 8, %s1644_s21 }
 0x12c   : >> { %v724_v2 = vadd.f32 %v719_v53, %v706_v46  ;;  %v725_v3 = vadd.f32 %v720_v54, %v707_v47  ;;  %v726_v4 = vadd.f32 %v721_v55, %v708_v52  ;;  %v735_v5 = vmul.f32 %v734_v61, %v727_v50  ;;  %v799_v50 = vld [vmem:[#allocation2 + $0xa1] sm:$0xff]  ;;  %s1785_s26 = sld [smem:[#allocation4 + %s894_s23]]  ;;  %s1038_s23 = sadd.s32 8, %s1648_s27 }
 0x12d   : >> { %v736_v6 = vmul.f32 %v734_v61, %v728_v51  ;;  %v737_v7 = vmul.f32 %v734_v61, %v729_v56  ;;  %v738_v8 = vmul.f32 %v734_v61, %v730_v57  ;;  %v739_v9 = vmul.f32 %v734_v61, %v731_v58  ;;  %v800_v51 = vld [vmem:[#allocation2 + $0xa9] sm:$0xff]  ;;  %v801_v56 = vld [vmem:[#allocation2 + $0xb1] sm:$0xff]  ;;  %v802_v57 = vld [vmem:[#allocation2 + $0xb9] sm:$0xff]  ;;  %s1835_s21 = sld [smem:[#allocation4 + %s1020_s19]] }
 0x12e   : >> { %v740_v12 = vadd.f32 %v735_v5, %v722_v59  ;;  %v753_v13 = vmul.f32 %v752_v1, %v745_v62  ;;  %v754_v14 = vmul.f32 %v752_v1, %v746_v63  ;;  %v755_v15 = vmul.f32 %v752_v1, %v747_v0  ;;  %v803_v58 = vld [vmem:[#allocation2 + $0xc1] sm:$0xf]  ;;  %v817_v62 = vld [vmem:[#allocation2 + $0xc9] sm:$0xff]  ;;  %v818_v63 = vld [vmem:[#allocation2 + $0xd1] sm:$0xff]  ;;  %s1837_s27 = sld [smem:[#allocation4 + %s1038_s23]] }
 0x12f   : >> { %v741_v18 = vadd.f32 %v736_v6, %v723_v60  ;;  %v742_v19 = vadd.f32 %v737_v7, %v724_v2  ;;  %v743_v20 = vadd.f32 %v738_v8, %v725_v3  ;;  %v744_v21 = vadd.f32 %v739_v9, %v726_v4  ;;  %v819_v0 = vld [vmem:[#allocation2 + $0xd9] sm:$0xff] }
 0x130   : >> { %v756_v24 = vmul.f32 %v752_v1, %v748_v10  ;;  %v757_v25 = vmul.f32 %v752_v1, %v749_v11  ;;  %v758_v26 = vadd.f32 %v753_v13, %v740_v12  ;;  %v770_v28 = vstv %s1758_s30  ;;  %v820_v10 = vld [vmem:[#allocation2 + $0xe1] sm:$0xff]  ;;  %v821_v11 = vld [vmem:[#allocation2 + $0xe9] sm:$0xf]  ;;  %s1790_s30 = sld [smem:[#allocation4 + %s912_s29]] }
 0x131   : >> { %v759_v29 = vadd.f32 %v754_v14, %v741_v18  ;;  %v760_v30 = vadd.f32 %v755_v15, %v742_v19  ;;  %v771_v31 = vmul.f32 %v770_v28, %v763_v16  ;;  %v772_v32 = vmul.f32 %v770_v28, %v764_v17  ;;  %v835_v16 = vld [vmem:[#allocation2 + $0xf1] sm:$0xff]  ;;  %v836_v17 = vld [vmem:[#allocation2 + $0xf9] sm:$0xff]  ;;  %s1850_s29 = sld [smem:[#allocation6 + %s1498_s20]] }
 0x132   : >> { %v761_v35 = vadd.f32 %v756_v24, %v743_v20  ;;  %v762_v36 = vadd.f32 %v757_v25, %v744_v21  ;;  %v773_v37 = vmul.f32 %v770_v28, %v765_v22  ;;  %v774_v38 = vmul.f32 %v770_v28, %v766_v23  ;;  %v837_v22 = vld [vmem:[#allocation2 + $0x101] sm:$0xff]  ;;  %v838_v23 = vld [vmem:[#allocation2 + $0x109] sm:$0xff] }
 0x133   : >> { %v775_v42 = vmul.f32 %v770_v28, %v767_v27  ;;  %v776_v43 = vadd.f32 %v771_v31, %v758_v26  ;;  %v777_v44 = vadd.f32 %v772_v32, %v759_v29  ;;  %v788_v45 = vstv %s1764_s8  ;;  %v839_v27 = vld [vmem:[#allocation2 + $0x111] sm:$0xf]  ;;  %s1804_s8 = sld [smem:[#allocation4 + %s930_s6]]  ;;  %s1345_s6 = sshll.u32 %s1498_s20, 4 }
 0x134   : >> { %v778_v46 = vadd.f32 %v773_v37, %v760_v30  ;;  %v779_v47 = vadd.f32 %v774_v38, %v761_v35  ;;  %v789_v48 = vmul.f32 %v788_v45, %v781_v33  ;;  %v790_v49 = vmul.f32 %v788_v45, %v782_v34  ;;  %v853_v33 = vld [vmem:[#allocation2 + $0x119] sm:$0xff]  ;;  %v854_v34 = vld [vmem:[#allocation2 + $0x121] sm:$0xff] }
 0x135   : >> { %v780_v52 = vadd.f32 %v775_v42, %v762_v36  ;;  %v791_v53 = vmul.f32 %v788_v45, %v783_v39  ;;  %v792_v54 = vmul.f32 %v788_v45, %v784_v40  ;;  %v793_v55 = vmul.f32 %v788_v45, %v785_v41  ;;  %v855_v39 = vld [vmem:[#allocation2 + $0x129] sm:$0xff]  ;;  %v856_v40 = vld [vmem:[#allocation2 + $0x131] sm:$0xff]  ;;  %v857_v41 = vld [vmem:[#allocation2 + $0x139] sm:$0xf] }
 0x136   : >> { %v794_v59 = vadd.f32 %v789_v48, %v776_v43  ;;  %v795_v60 = vadd.f32 %v790_v49, %v777_v44  ;;  %v806_v61 = vstv %s1767_s10  ;;  %v824_v1 = vstv %s1769_s11  ;;  %s1809_s10 = sld [smem:[#allocation4 + %s948_s7]]  ;;  %s1127_s7 = scalar_lea.vmem %s1587_s12, %s1345_s6 }
 0x137   : >> { %v796_v2 = vadd.f32 %v791_v53, %v778_v46  ;;  %v797_v3 = vadd.f32 %v792_v54, %v779_v47  ;;  %v798_v4 = vadd.f32 %v793_v55, %v780_v52  ;;  %v807_v5 = vmul.f32 %v806_v61, %v799_v50  ;;  %v871_v50 = vld [vmem:[%s1592_s18 + $0x2] sm:$0xff]  ;;  %v873_v52 = vld [vmem:[%s1592_s18 + $0x12] sm:$0xff]  ;;  %s1813_s11 = sld [smem:[#allocation4 + %s966_s9]] }
 0x138   : >> { %v808_v6 = vmul.f32 %v806_v61, %v800_v51  ;;  %v809_v7 = vmul.f32 %v806_v61, %v801_v56  ;;  %v810_v8 = vmul.f32 %v806_v61, %v802_v57  ;;  %v811_v9 = vmul.f32 %v806_v61, %v803_v58  ;;  %v872_v51 = vld [vmem:[%s1592_s18 + $0xa] sm:$0xff]  ;;  %v874_v57 = vld [vmem:[%s1592_s18 + $0x1a] sm:$0xff]  ;;  %v875_v58 = vld [vmem:[%s1592_s18 + $0x22] sm:$0xf] }
 0x139   : >> { %v812_v12 = vadd.f32 %v807_v5, %v794_v59  ;;  %v825_v13 = vmul.f32 %v824_v1, %v817_v62  ;;  %v826_v14 = vmul.f32 %v824_v1, %v818_v63  ;;  %v827_v15 = vmul.f32 %v824_v1, %v819_v0  ;;  %v1330_v59 = vld [vmem:[%s1592_s18 + $0x2a] sm:$0xff]  ;;  %v1331_v63 = vld [vmem:[%s1592_s18 + $0x32] sm:$0xff]  ;;  %v1332_v0 = vld [vmem:[%s1592_s18 + $0x3a] sm:$0xff] }
 0x13a   : >> { %v813_v18 = vadd.f32 %v808_v6, %v795_v60  ;;  %v814_v19 = vadd.f32 %v809_v7, %v796_v2  ;;  %v815_v20 = vadd.f32 %v810_v8, %v797_v3  ;;  %v816_v21 = vadd.f32 %v811_v9, %v798_v4 }
 0x13b   : >> { %v828_v24 = vmul.f32 %v824_v1, %v820_v10  ;;  %v829_v25 = vmul.f32 %v824_v1, %v821_v11  ;;  %v830_v26 = vadd.f32 %v825_v13, %v812_v12  ;;  %v842_v28 = vstv %s1774_s14  ;;  %v1333_v10 = vld [vmem:[%s1592_s18 + $0x42] sm:$0xff]  ;;  %v1334_v11 = vld [vmem:[%s1592_s18 + $0x4a] sm:$0xf]  ;;  %s1826_s14 = sld [smem:[#allocation4 + %s984_s13]] }
 0x13c   : >> { %v831_v29 = vadd.f32 %v826_v14, %v813_v18  ;;  %v832_v30 = vadd.f32 %v827_v15, %v814_v19  ;;  %v843_v31 = vmul.f32 %v842_v28, %v835_v16  ;;  %v844_v32 = vmul.f32 %v842_v28, %v836_v17  ;;  %v1335_v16 = vld [vmem:[%s1592_s18 + $0x52] sm:$0xff]  ;;  %v1336_v17 = vld [vmem:[%s1592_s18 + $0x5a] sm:$0xff] }
 0x13d   : >> { %v833_v35 = vadd.f32 %v828_v24, %v815_v20  ;;  %v834_v36 = vadd.f32 %v829_v25, %v816_v21  ;;  %v845_v37 = vmul.f32 %v842_v28, %v837_v22  ;;  %v846_v38 = vmul.f32 %v842_v28, %v838_v23  ;;  %v1337_v22 = vld [vmem:[%s1592_s18 + $0x62] sm:$0xff]  ;;  %v1338_v23 = vld [vmem:[%s1592_s18 + $0x6a] sm:$0xff] }
 0x13e   : >> { %v847_v42 = vmul.f32 %v842_v28, %v839_v27  ;;  %v848_v43 = vadd.f32 %v843_v31, %v830_v26  ;;  %v849_v44 = vadd.f32 %v844_v32, %v831_v29  ;;  %v860_v45 = vstv %s1780_s22  ;;  %v1339_v27 = vld [vmem:[%s1592_s18 + $0x72] sm:$0xf]  ;;  %s1832_s22 = sld [smem:[#allocation4 + %s1002_s15]] }
 0x13f   : >> { %v850_v46 = vadd.f32 %v845_v37, %v832_v30  ;;  %v851_v47 = vadd.f32 %v846_v38, %v833_v35  ;;  %v861_v48 = vmul.f32 %v860_v45, %v853_v33  ;;  %v862_v49 = vmul.f32 %v860_v45, %v854_v34  ;;  %v1340_v33 = vld [vmem:[%s1592_s18 + $0x7a] sm:$0xff]  ;;  %v1341_v34 = vld [vmem:[%s1592_s18 + $0x82] sm:$0xff] }
 0x140   : >> { %v852_v53 = vadd.f32 %v847_v42, %v834_v36  ;;  %v863_v54 = vmul.f32 %v860_v45, %v855_v39  ;;  %v864_v55 = vmul.f32 %v860_v45, %v856_v40  ;;  %v865_v56 = vmul.f32 %v860_v45, %v857_v41  ;;  %v1342_v39 = vld [vmem:[%s1592_s18 + $0x8a] sm:$0xff]  ;;  %v1343_v40 = vld [vmem:[%s1592_s18 + $0x92] sm:$0xff]  ;;  %v1344_v41 = vld [vmem:[%s1592_s18 + $0x9a] sm:$0xf] }
 0x141   : >> { %v866_v60 = vadd.f32 %v861_v48, %v848_v43  ;;  %v867_v61 = vadd.f32 %v862_v49, %v849_v44  ;;  %v878_v62 = vstv %s1783_s25  ;;  %v896_v1 = vstv %s1785_s26  ;;  %s1056_s25 = sadd.s32 8, %s1650_s28  ;;  %s1074_s26 = sadd.s32 8, %s1653_s5 }
 0x142   : >> { %v868_v2 = vadd.f32 %v863_v54, %v850_v46  ;;  %v869_v3 = vadd.f32 %v864_v55, %v851_v47  ;;  %v870_v4 = vadd.f32 %v865_v56, %v852_v53  ;;  %v879_v5 = vmul.f32 %v878_v62, %v871_v50  ;;  %v943_v50 = vld [vmem:[#allocation2 + $0x2] sm:$0xff]  ;;  %v945_v56 = vld [vmem:[#allocation2 + $0x12] sm:$0xff]  ;;  %s1842_s28 = sld [smem:[#allocation4 + %s1056_s25]] }
 0x143   : >> { %v880_v6 = vmul.f32 %v878_v62, %v872_v51  ;;  %v881_v7 = vmul.f32 %v878_v62, %v873_v52  ;;  %v882_v8 = vmul.f32 %v878_v62, %v874_v57  ;;  %v883_v9 = vmul.f32 %v878_v62, %v875_v58  ;;  %v944_v51 = vld [vmem:[#allocation2 + $0xa] sm:$0xff]  ;;  %v946_v57 = vld [vmem:[#allocation2 + $0x1a] sm:$0xff]  ;;  %v947_v58 = vld [vmem:[#allocation2 + $0x22] sm:$0xf]  ;;  %s1847_s5 = sld [smem:[#allocation4 + %s1074_s26]] }
 0x144   : >> { %v884_v12 = vadd.f32 %v879_v5, %v866_v60  ;;  %v897_v13 = vmul.f32 %v1330_v59, %v896_v1  ;;  %v898_v14 = vmul.f32 %v1331_v63, %v896_v1  ;;  %v899_v15 = vmul.f32 %v1332_v0, %v896_v1  ;;  %v961_v62 = vld [vmem:[#allocation2 + $0x2a] sm:$0xff]  ;;  %v962_v63 = vld [vmem:[#allocation2 + $0x32] sm:$0xff]  ;;  %v963_v0 = vld [vmem:[#allocation2 + $0x3a] sm:$0xff] }
 0x145   : >> { %v885_v18 = vadd.f32 %v880_v6, %v867_v61  ;;  %v886_v19 = vadd.f32 %v881_v7, %v868_v2  ;;  %v887_v20 = vadd.f32 %v882_v8, %v869_v3  ;;  %v888_v21 = vadd.f32 %v883_v9, %v870_v4 }
 0x146   : >> { %v900_v24 = vmul.f32 %v1333_v10, %v896_v1  ;;  %v901_v25 = vmul.f32 %v1334_v11, %v896_v1  ;;  %v902_v26 = vadd.f32 %v897_v13, %v884_v12  ;;  %v914_v28 = vstv %s1790_s30  ;;  %v964_v10 = vld [vmem:[#allocation2 + $0x42] sm:$0xff]  ;;  %v965_v11 = vld [vmem:[#allocation2 + $0x4a] sm:$0xf]  ;;  %s1853_s30 = sld [smem:[#allocation8 + %s1498_s20]]  ;;  %s437_s20 = sadd.s32 1, %s1498_s20  }
 0x147   : >> { %v903_v29 = vadd.f32 %v898_v14, %v885_v18  ;;  %v904_v30 = vadd.f32 %v899_v15, %v886_v19  ;;  %v915_v31 = vmul.f32 %v1335_v16, %v914_v28  ;;  %v916_v32 = vmul.f32 %v1336_v17, %v914_v28  ;;  %v979_v16 = vld [vmem:[#allocation2 + $0x52] sm:$0xff]  ;;  %v980_v17 = vld [vmem:[#allocation2 + $0x5a] sm:$0xff]  ;;  %p434_p8 = scmp.ge.s32.totalorder %s437_s20, 8  }
 0x148   : >> { %v905_v35 = vadd.f32 %v900_v24, %v887_v20  ;;  %v906_v36 = vadd.f32 %v901_v25, %v888_v21  ;;  %v917_v37 = vmul.f32 %v1337_v22, %v914_v28  ;;  %v918_v38 = vmul.f32 %v1338_v23, %v914_v28  ;;  %v981_v22 = vld [vmem:[#allocation2 + $0x62] sm:$0xff]  ;;  %v982_v23 = vld [vmem:[#allocation2 + $0x6a] sm:$0xff] }
 0x149   : >> { %v919_v42 = vmul.f32 %v1339_v27, %v914_v28  ;;  %v920_v43 = vadd.f32 %v915_v31, %v902_v26  ;;  %v921_v44 = vadd.f32 %v916_v32, %v903_v29  ;;  %v932_v45 = vstv %s1804_s8  ;;  %v983_v27 = vld [vmem:[#allocation2 + $0x72] sm:$0xf] }
 0x14a   : >> { %v922_v46 = vadd.f32 %v917_v37, %v904_v30  ;;  %v923_v47 = vadd.f32 %v918_v38, %v905_v35  ;;  %v933_v48 = vmul.f32 %v1340_v33, %v932_v45  ;;  %v934_v49 = vmul.f32 %v1341_v34, %v932_v45  ;;  %v997_v33 = vld [vmem:[#allocation2 + $0x7a] sm:$0xff]  ;;  %v998_v34 = vld [vmem:[#allocation2 + $0x82] sm:$0xff] }
 0x14b   : >> { %v924_v52 = vadd.f32 %v919_v42, %v906_v36  ;;  %v935_v53 = vmul.f32 %v1342_v39, %v932_v45  ;;  %v936_v54 = vmul.f32 %v1343_v40, %v932_v45  ;;  %v937_v55 = vmul.f32 %v1344_v41, %v932_v45  ;;  %v999_v39 = vld [vmem:[#allocation2 + $0x8a] sm:$0xff]  ;;  %v1000_v40 = vld [vmem:[#allocation2 + $0x92] sm:$0xff]  ;;  %v1001_v41 = vld [vmem:[#allocation2 + $0x9a] sm:$0xf] }
 0x14c   : >> { %v938_v59 = vadd.f32 %v933_v48, %v920_v43  ;;  %v939_v60 = vadd.f32 %v934_v49, %v921_v44  ;;  %v950_v61 = vstv %s1809_s10  ;;  %v968_v1 = vstv %s1813_s11 }
 0x14d   : >> { %v940_v2 = vadd.f32 %v935_v53, %v922_v46  ;;  %v941_v3 = vadd.f32 %v936_v54, %v923_v47  ;;  %v942_v4 = vadd.f32 %v937_v55, %v924_v52  ;;  %v951_v5 = vmul.f32 %v950_v61, %v943_v50  ;;  %v1015_v50 = vld [vmem:[#allocation2 + $0xa2] sm:$0xff] }
 0x14e   : >> { %v952_v6 = vmul.f32 %v950_v61, %v944_v51  ;;  %v953_v7 = vmul.f32 %v950_v61, %v945_v56  ;;  %v954_v8 = vmul.f32 %v950_v61, %v946_v57  ;;  %v955_v9 = vmul.f32 %v950_v61, %v947_v58  ;;  %v1016_v51 = vld [vmem:[#allocation2 + $0xaa] sm:$0xff]  ;;  %v1017_v56 = vld [vmem:[#allocation2 + $0xb2] sm:$0xff]  ;;  %v1018_v57 = vld [vmem:[#allocation2 + $0xba] sm:$0xff] }
 0x14f   : >> { %v956_v12 = vadd.f32 %v951_v5, %v938_v59  ;;  %v969_v13 = vmul.f32 %v968_v1, %v961_v62  ;;  %v970_v14 = vmul.f32 %v968_v1, %v962_v63  ;;  %v971_v15 = vmul.f32 %v968_v1, %v963_v0  ;;  %v1019_v58 = vld [vmem:[#allocation2 + $0xc2] sm:$0xf]  ;;  %v1033_v62 = vld [vmem:[#allocation2 + $0xca] sm:$0xff]  ;;  %v1034_v63 = vld [vmem:[#allocation2 + $0xd2] sm:$0xff] }
 0x150   : >> { %v957_v18 = vadd.f32 %v952_v6, %v939_v60  ;;  %v958_v19 = vadd.f32 %v953_v7, %v940_v2  ;;  %v959_v20 = vadd.f32 %v954_v8, %v941_v3  ;;  %v960_v21 = vadd.f32 %v955_v9, %v942_v4  ;;  %v1035_v0 = vld [vmem:[#allocation2 + $0xda] sm:$0xff] }
 0x151   : >> { %v972_v24 = vmul.f32 %v968_v1, %v964_v10  ;;  %v973_v25 = vmul.f32 %v968_v1, %v965_v11  ;;  %v974_v26 = vadd.f32 %v969_v13, %v956_v12  ;;  %v986_v28 = vstv %s1826_s14  ;;  %v1036_v10 = vld [vmem:[#allocation2 + $0xe2] sm:$0xff]  ;;  %v1037_v11 = vld [vmem:[#allocation2 + $0xea] sm:$0xf] }
 0x152   : >> { %v975_v29 = vadd.f32 %v970_v14, %v957_v18  ;;  %v976_v30 = vadd.f32 %v971_v15, %v958_v19  ;;  %v987_v31 = vmul.f32 %v986_v28, %v979_v16  ;;  %v988_v32 = vmul.f32 %v986_v28, %v980_v17  ;;  %v1051_v16 = vld [vmem:[#allocation2 + $0xf2] sm:$0xff]  ;;  %v1052_v17 = vld [vmem:[#allocation2 + $0xfa] sm:$0xff] }
 0x153   : >> { %v977_v35 = vadd.f32 %v972_v24, %v959_v20  ;;  %v978_v36 = vadd.f32 %v973_v25, %v960_v21  ;;  %v989_v37 = vmul.f32 %v986_v28, %v981_v22  ;;  %v990_v38 = vmul.f32 %v986_v28, %v982_v23  ;;  %v1053_v22 = vld [vmem:[#allocation2 + $0x102] sm:$0xff]  ;;  %v1054_v23 = vld [vmem:[#allocation2 + $0x10a] sm:$0xff] }
 0x154   : >> { %v991_v42 = vmul.f32 %v986_v28, %v983_v27  ;;  %v992_v43 = vadd.f32 %v987_v31, %v974_v26  ;;  %v993_v44 = vadd.f32 %v988_v32, %v975_v29  ;;  %v1004_v45 = vstv %s1832_s22  ;;  %v1055_v27 = vld [vmem:[#allocation2 + $0x112] sm:$0xf] }
 0x155   : >> { %v994_v46 = vadd.f32 %v989_v37, %v976_v30  ;;  %v995_v47 = vadd.f32 %v990_v38, %v977_v35  ;;  %v1005_v48 = vmul.f32 %v1004_v45, %v997_v33  ;;  %v1006_v49 = vmul.f32 %v1004_v45, %v998_v34  ;;  %v1069_v33 = vld [vmem:[#allocation2 + $0x11a] sm:$0xff]  ;;  %v1070_v34 = vld [vmem:[#allocation2 + $0x122] sm:$0xff] }
 0x156   : >> { %v996_v52 = vadd.f32 %v991_v42, %v978_v36  ;;  %v1007_v53 = vmul.f32 %v1004_v45, %v999_v39  ;;  %v1008_v54 = vmul.f32 %v1004_v45, %v1000_v40  ;;  %v1009_v55 = vmul.f32 %v1004_v45, %v1001_v41  ;;  %v1071_v39 = vld [vmem:[#allocation2 + $0x12a] sm:$0xff]  ;;  %v1072_v40 = vld [vmem:[#allocation2 + $0x132] sm:$0xff]  ;;  %v1073_v41 = vld [vmem:[#allocation2 + $0x13a] sm:$0xf] }
 0x157   : >> { %v1010_v59 = vadd.f32 %v1005_v48, %v992_v43  ;;  %v1011_v60 = vadd.f32 %v1006_v49, %v993_v44  ;;  %v1022_v61 = vstv %s1835_s21  ;;  %v1040_v1 = vstv %s1837_s27 }
 0x158   : >> { %v1012_v2 = vadd.f32 %v1007_v53, %v994_v46  ;;  %v1013_v3 = vadd.f32 %v1008_v54, %v995_v47  ;;  %v1014_v4 = vadd.f32 %v1009_v55, %v996_v52  ;;  %v1023_v5 = vmul.f32 %v1022_v61, %v1015_v50 }
 0x159   : >> { %v1024_v6 = vmul.f32 %v1022_v61, %v1016_v51  ;;  %v1025_v7 = vmul.f32 %v1022_v61, %v1017_v56  ;;  %v1026_v8 = vmul.f32 %v1022_v61, %v1018_v57  ;;  %v1027_v9 = vmul.f32 %v1022_v61, %v1019_v58 }
 0x15a   : >> { %v1028_v12 = vadd.f32 %v1023_v5, %v1010_v59  ;;  %v1041_v13 = vmul.f32 %v1040_v1, %v1033_v62  ;;  %v1042_v14 = vmul.f32 %v1040_v1, %v1034_v63  ;;  %v1043_v15 = vmul.f32 %v1040_v1, %v1035_v0 }
 0x15b   : >> { %v1029_v18 = vadd.f32 %v1024_v6, %v1011_v60  ;;  %v1030_v19 = vadd.f32 %v1025_v7, %v1012_v2  ;;  %v1031_v20 = vadd.f32 %v1026_v8, %v1013_v3  ;;  %v1032_v21 = vadd.f32 %v1027_v9, %v1014_v4 }
 0x15c   : >> { %v1044_v24 = vmul.f32 %v1040_v1, %v1036_v10  ;;  %v1045_v25 = vmul.f32 %v1040_v1, %v1037_v11  ;;  %v1046_v26 = vadd.f32 %v1041_v13, %v1028_v12  ;;  %v1058_v28 = vstv %s1842_s28 }
 0x15d   : >> { %v1047_v29 = vadd.f32 %v1042_v14, %v1029_v18  ;;  %v1048_v30 = vadd.f32 %v1043_v15, %v1030_v19  ;;  %v1059_v31 = vmul.f32 %v1058_v28, %v1051_v16  ;;  %v1060_v32 = vmul.f32 %v1058_v28, %v1052_v17 }
 0x15e   : >> { %v1049_v35 = vadd.f32 %v1044_v24, %v1031_v20  ;;  %v1050_v36 = vadd.f32 %v1045_v25, %v1032_v21  ;;  %v1061_v37 = vmul.f32 %v1058_v28, %v1053_v22  ;;  %v1062_v38 = vmul.f32 %v1058_v28, %v1054_v23 }
 0x15f   : >> { %v1063_v42 = vmul.f32 %v1058_v28, %v1055_v27  ;;  %v1064_v43 = vadd.f32 %v1059_v31, %v1046_v26  ;;  %v1065_v44 = vadd.f32 %v1060_v32, %v1047_v29  ;;  %v1076_v45 = vstv %s1847_s5 }
 0x160   : >> { %v1066_v46 = vadd.f32 %v1061_v37, %v1048_v30  ;;  %v1067_v47 = vadd.f32 %v1062_v38, %v1049_v35  ;;  %v1077_v48 = vmul.f32 %v1076_v45, %v1069_v33  ;;  %v1078_v49 = vmul.f32 %v1076_v45, %v1070_v34 }
 0x161   : >> { %v1068_v50 = vadd.f32 %v1063_v42, %v1050_v36  ;;  %v1079_v51 = vmul.f32 %v1076_v45, %v1071_v39  ;;  %v1080_v52 = vmul.f32 %v1076_v45, %v1072_v40  ;;  %v1081_v53 = vmul.f32 %v1076_v45, %v1073_v41 }
 0x162   : >> { %v1082_v54 = vadd.f32 %v1077_v48, %v1064_v43  ;;  %v1083_v55 = vadd.f32 %v1078_v49, %v1065_v44  ;;  %v1088_v56 = vstv %s1850_s29  ;;  %v1095_v60 = vstv %s1853_s30 }
 0x163   : >> { %v1084_v57 = vadd.f32 %v1079_v51, %v1066_v46  ;;  %v1085_v58 = vadd.f32 %v1080_v52, %v1067_v47  ;;  %v1086_v59 = vadd.f32 %v1081_v53, %v1068_v50 }
 0x164   : >> { %v1089_v61 = vmul.f32 %v1088_v56, %v1082_v54  ;;  %v1090_v62 = vmul.f32 %v1088_v56, %v1083_v55 }
 0x165   : >> { %v1091_v63 = vmul.f32 %v1088_v56, %v1084_v57  ;;  %v1092_v0 = vmul.f32 %v1088_v56, %v1085_v58  ;;  %v1093_v1 = vmul.f32 %v1088_v56, %v1086_v59 }
 0x166   : >> { %v1096_v2 = vadd.f32 %v1095_v60, %v1089_v61  ;;  %v1097_v3 = vadd.f32 %v1095_v60, %v1090_v62 }
 0x167   : >> { %v1098_v4 = vadd.f32 %v1095_v60, %v1091_v63  ;;  %v1099_v5 = vadd.f32 %v1095_v60, %v1092_v0  ;;  %v1100_v6 = vadd.f32 %v1095_v60, %v1093_v1 }
 0x168   : >> { %v1101_v7 = vmax.f32 %v1096_v2, 0.0  ;;  %v1102_v8 = vmax.f32 %v1097_v3, 0.0 }
 0x169   : >> { %v1103_v9 = vmax.f32 %v1098_v4, 0.0  ;;  %v1104_v10 = vmax.f32 %v1099_v5, 0.0  ;;  %v1105_v11 = vmax.f32 %v1100_v6, 0.0 }
 0x16a   : >> { %1106 = vst [vmem:[#allocation3] sm:$0xff] %v1101_v7 }
 0x16b   : >> { %1107 = vst [vmem:[#allocation3 + $0x8] sm:$0xff] %v1102_v8 }
 0x16c   : >> { %1108 = vst [vmem:[#allocation3 + $0x10] sm:$0xff] %v1103_v9 }
 0x16d   : >> { %1109 = vst [vmem:[#allocation3 + $0x18] sm:$0xff] %v1104_v10 }
 0x16e   : >> { %1110 = vst [vmem:[#allocation3 + $0x20] sm:$0xf] %v1105_v11 }
 0x173   : >> { %v1111_v12 = vld [vmem:[#allocation3] ss:$3 sm:$0xff]  ;;  %v1115_v13 = vld [vmem:[#allocation3 + $0x1] ss:$3 sm:$0xff]  ;;  %v1119_v14 = vld [vmem:[#allocation3 + $0x2] ss:$3 sm:$0xff] }
 0x174   : >> { %v1122_v15 = vmax.f32 %v1111_v12, %v1115_v13 }
 0x175   : >> { %v1113_v16 = vld [vmem:[#allocation3 + $0x18] ss:$3 sm:$0xf]  ;;  %v1117_v17 = vld [vmem:[#allocation3 + $0x19] ss:$3 sm:$0xf] }
 0x176   : >> { %v1123_v18 = vmax.f32 %v1113_v16, %v1117_v17  ;;  %v1124_v19 = vmax.f32 %v1122_v15, %v1119_v14  ;;  %v1121_v20 = vld [vmem:[#allocation3 + $0x1a] ss:$3 sm:$0xf]  ;;  %436 = sbr.rel (!%p434_p8) target bundleno = 248 (0xf8), region = 102 }
 0x178   : >> { %v1125_v21 = vmax.f32 %v1123_v18, %v1121_v20  ;;  %1128 = vst [vmem:[%s1127_s7] sm:$0xff] %v1124_v19 }
 0x17a   : >> { %1129 = vst [vmem:[%s1127_s7 + $0x8] sm:$0xf] %v1125_v21 }
 0x17b PF: > { %s16_s17 = sadd.s32 1, %s1494_s17   ;;  %s1880_s15 = smov %s1490_s16 }
 0x17c   : > { %p13_p9 = scmp.ge.s32.totalorder %s16_s17, 4   ;;  %s1881_s16 = smov %s1883_s24 }
 0x17e   :  { %15 = sbr.rel (!%p13_p9) target bundleno = 3 (0x3), region = 113 }
 0x183   :  { %1162 = vsyncpa [#allocation5], 1 }
 0x184   :  { %1164 = vsyncpa [#allocation5 + $0x1], 1 }
 0x185   :  { %1165 = vsyncpa [#allocation7], 1 }

// kernel: attention_cnn_forward.5
= control target key start
LH: loop header
LB: loop body
LE: loop exit
PB: predicated region body
PF: predicated region fallthrough
CT: control target
= control target key end

     0   :  { %8 = vsyncpa [#allocation5], 0  ;;  %s1364_s0 = inlined_call_operand.vmem [shape: bf16[2,256], index: 0, kind: input, shape index: {}]   ;;  %s1365_s1 = inlined_call_operand.vmem [shape: bf16[256,512], index: 1, kind: input, shape index: {}]   ;;  %s1366_s2 = inlined_call_operand.vmem [shape: f32[1,512], index: 2, kind: input, shape index: {}]   ;;  %s1367_s3 = inlined_call_operand.hbm [shape: f32[2,512], index: 3, kind: output, shape index: {}]  }
   0x1   :  { %10 = vsyncpa [#allocation5 + $0x1], 0  ;;  %s1116_s12 = smov 0   ;;  %s1118_s13 = smov 0  }
   0x2   :  { %s1120_s14 = smov 0   ;;  %s1122_s15 = smov 0  }
   0x3   :  { %s1124_s16 = smov 0   ;;  %s1126_s17 = smov 0  }
   0x4 LB: > { %s780_s18 = sadd.s32 4294967295, %s1093_s17   ;;  %s781_s19 = sadd.s32 4294967294, %s1093_s17   ;;  %s1093_s17 = sphi %s1126_s17, %s16_s17   ;;  %s1089_s16 = sphi %s1124_s16, %s1374_s16   ;;  %s1085_s15 = sphi %s1122_s15, %s1373_s15   ;;  %s1081_s14 = sphi %s1120_s14, %s1372_s14   ;;  %s1077_s13 = sphi %s1118_s13, %s1371_s13   ;;  %s1073_s12 = sphi %s1116_s12, %s1370_s12  }
   0x5   : > { %s28_s20 = sadd.s32 1, %s1089_s16  ;;  %s63_s21 = sadd.s32 1, %s1081_s14 }
   0x6   : > { %p30_p0 = scmp.ge.s32.totalorder %s28_s20, 2  ;;  %p70_p1 = scmp.ne.s32.totalorder %s1081_s14, %s1077_s13 }
   0x7   : > { %p71_p2 = scmp.eq.s32.totalorder %s1093_s17, 0  ;;  %p126_p3 = scmp.eq.s32.totalorder %s780_s18, 1 }
   0x8   : > { %s1376_s20 = smov (%p30_p0, %s28_s20), 0  ;;  %p131_p6 = scmp.ne.s32.totalorder %s1077_s13, %s1073_s12 }
   0x9   : > { %p72_p4 = por %p71_p2, %p70_p1  ;;  %p1155_p5 = por %p126_p3, %p70_p1 }
   0xa   : > { %s59_s23 = ssub.s32 %s1089_s16, %s1376_s20  ;;  %p132_p8 = scmp.eq.s32.totalorder %s781_s19, 1 }
   0xb   : > { %p61_p7 = scmp.eq.s32.totalorder %s59_s23, 0  ;;  %p784_p10 = scmp.ge.s32.totalorder %s1093_s17, 2 }
   0xc   : > { %p1166_p9 = por %p132_p8, %p131_p6 }
   0xd   : > { %s1164_s24 = scalar_select %p61_p7, %s1081_s14, %s63_s21  }
   0xe   : > { %156 = sbr.rel (%p784_p10) target bundleno = 55 (0x37), region = 20 }
  0x13   : > { %159 = sbr.rel (!%p72_p4) target bundleno = 55 (0x37), region = 24  ;;  %s161_s26 = sand.u32 (%p72_p4), 1, %s1081_s14  }
  0x14   : > { %s925_s27 = sshll.u32 (%p72_p4), %s1089_s16, 3  ;;  %s785_s28 = sshll.u32 (%p72_p4), %s161_s26, 8 }
  0x15   : > { %s1178_s4 = scalar_lea.vmem (%p72_p4), %s1365_s1, %s925_s27  ;;  %s1183_s5 = scalar_lea.vmem (%p72_p4), [#allocation3], %s785_s28 }
  0x16   : > { %v260_v0 = vld [vmem:[%s1178_s4] sm:$0xff] (%p72_p4)  ;;  %v262_v1 = vld [vmem:[%s1178_s4 + $0x10] sm:$0xff] (%p72_p4) }
  0x17   : > { %v264_v2 = vld [vmem:[%s1178_s4 + $0x20] sm:$0xff] (%p72_p4)  ;;  %261 = vst [vmem:[%s1183_s5] sm:$0xff] (%p72_p4), %v260_v0  ;;  %v266_v3 = vld [vmem:[%s1178_s4 + $0x30] sm:$0xff] (%p72_p4) }
  0x18   : > { %263 = vst [vmem:[%s1183_s5 + $0x8] sm:$0xff] %v262_v1  ;;  %v268_v4 = vld [vmem:[%s1178_s4 + $0x40] sm:$0xff]  ;;  %v270_v5 = vld [vmem:[%s1178_s4 + $0x50] sm:$0xff] }
  0x19   : > { %265 = vst [vmem:[%s1183_s5 + $0x10] sm:$0xff] %v264_v2  ;;  %v272_v6 = vld [vmem:[%s1178_s4 + $0x60] sm:$0xff]  ;;  %v274_v7 = vld [vmem:[%s1178_s4 + $0x70] sm:$0xff] }
  0x1a   : > { %267 = vst [vmem:[%s1183_s5 + $0x18] sm:$0xff] %v266_v3  ;;  %v276_v8 = vld [vmem:[%s1178_s4 + $0x80] sm:$0xff]  ;;  %v278_v9 = vld [vmem:[%s1178_s4 + $0x90] sm:$0xff] }
  0x1b   : > { %269 = vst [vmem:[%s1183_s5 + $0x20] sm:$0xff] %v268_v4  ;;  %v280_v10 = vld [vmem:[%s1178_s4 + $0xa0] sm:$0xff]  ;;  %v282_v11 = vld [vmem:[%s1178_s4 + $0xb0] sm:$0xff] }
  0x1c   : > { %271 = vst [vmem:[%s1183_s5 + $0x28] sm:$0xff] %v270_v5  ;;  %v284_v12 = vld [vmem:[%s1178_s4 + $0xc0] sm:$0xff]  ;;  %v286_v13 = vld [vmem:[%s1178_s4 + $0xd0] sm:$0xff] }
  0x1d   : > { %273 = vst [vmem:[%s1183_s5 + $0x30] sm:$0xff] %v272_v6  ;;  %v288_v14 = vld [vmem:[%s1178_s4 + $0xe0] sm:$0xff]  ;;  %v290_v15 = vld [vmem:[%s1178_s4 + $0xf0] sm:$0xff] }
  0x1e   : > { %275 = vst [vmem:[%s1183_s5 + $0x38] sm:$0xff] %v274_v7  ;;  %v292_v16 = vld [vmem:[%s1178_s4 + $0x100] sm:$0xff]  ;;  %v294_v17 = vld [vmem:[%s1178_s4 + $0x110] sm:$0xff] }
  0x1f   : > { %277 = vst [vmem:[%s1183_s5 + $0x40] sm:$0xff] %v276_v8  ;;  %v296_v18 = vld [vmem:[%s1178_s4 + $0x120] sm:$0xff]  ;;  %v298_v19 = vld [vmem:[%s1178_s4 + $0x130] sm:$0xff] }
  0x20   : > { %279 = vst [vmem:[%s1183_s5 + $0x48] sm:$0xff] %v278_v9  ;;  %v300_v20 = vld [vmem:[%s1178_s4 + $0x140] sm:$0xff]  ;;  %v302_v21 = vld [vmem:[%s1178_s4 + $0x150] sm:$0xff] }
  0x21   : > { %281 = vst [vmem:[%s1183_s5 + $0x50] sm:$0xff] %v280_v10  ;;  %v304_v22 = vld [vmem:[%s1178_s4 + $0x160] sm:$0xff]  ;;  %v306_v23 = vld [vmem:[%s1178_s4 + $0x170] sm:$0xff] }
  0x22   : > { %283 = vst [vmem:[%s1183_s5 + $0x58] sm:$0xff] %v282_v11  ;;  %v308_v24 = vld [vmem:[%s1178_s4 + $0x180] sm:$0xff]  ;;  %v310_v25 = vld [vmem:[%s1178_s4 + $0x190] sm:$0xff] }
  0x23   : > { %285 = vst [vmem:[%s1183_s5 + $0x60] sm:$0xff] %v284_v12  ;;  %v312_v26 = vld [vmem:[%s1178_s4 + $0x1a0] sm:$0xff]  ;;  %v314_v27 = vld [vmem:[%s1178_s4 + $0x1b0] sm:$0xff] }
  0x24   : > { %287 = vst [vmem:[%s1183_s5 + $0x68] sm:$0xff] %v286_v13  ;;  %v316_v28 = vld [vmem:[%s1178_s4 + $0x1c0] sm:$0xff]  ;;  %v318_v29 = vld [vmem:[%s1178_s4 + $0x1d0] sm:$0xff] }
  0x25   : > { %289 = vst [vmem:[%s1183_s5 + $0x70] sm:$0xff] %v288_v14  ;;  %v320_v30 = vld [vmem:[%s1178_s4 + $0x1e0] sm:$0xff]  ;;  %v322_v31 = vld [vmem:[%s1178_s4 + $0x1f0] sm:$0xff] }
  0x26   : > { %291 = vst [vmem:[%s1183_s5 + $0x78] sm:$0xff] %v290_v15 }
  0x27   : > { %293 = vst [vmem:[%s1183_s5 + $0x80] sm:$0xff] %v292_v16 }
  0x28   : > { %295 = vst [vmem:[%s1183_s5 + $0x88] sm:$0xff] %v294_v17 }
  0x29   : > { %297 = vst [vmem:[%s1183_s5 + $0x90] sm:$0xff] %v296_v18 }
  0x2a   : > { %299 = vst [vmem:[%s1183_s5 + $0x98] sm:$0xff] %v298_v19 }
  0x2b   : > { %301 = vst [vmem:[%s1183_s5 + $0xa0] sm:$0xff] %v300_v20 }
  0x2c   : > { %303 = vst [vmem:[%s1183_s5 + $0xa8] sm:$0xff] %v302_v21 }
  0x2d   : > { %305 = vst [vmem:[%s1183_s5 + $0xb0] sm:$0xff] %v304_v22 }
  0x2e   : > { %307 = vst [vmem:[%s1183_s5 + $0xb8] sm:$0xff] %v306_v23 }
  0x2f   : > { %309 = vst [vmem:[%s1183_s5 + $0xc0] sm:$0xff] %v308_v24 }
  0x30   : > { %311 = vst [vmem:[%s1183_s5 + $0xc8] sm:$0xff] %v310_v25 }
  0x31   : > { %313 = vst [vmem:[%s1183_s5 + $0xd0] sm:$0xff] %v312_v26 }
  0x32   : > { %315 = vst [vmem:[%s1183_s5 + $0xd8] sm:$0xff] %v314_v27 }
  0x33   : > { %317 = vst [vmem:[%s1183_s5 + $0xe0] sm:$0xff] %v316_v28 }
  0x34   : > { %319 = vst [vmem:[%s1183_s5 + $0xe8] sm:$0xff] %v318_v29 }
  0x35   : > { %321 = vst [vmem:[%s1183_s5 + $0xf0] sm:$0xff] %v320_v30 }
  0x36   : > { %323 = vst [vmem:[%s1183_s5 + $0xf8] sm:$0xff] %v322_v31 }
  0x37 PF: > { %p788_p11 = scmp.ge.s32.totalorder %s1093_s17, 1  ;;  %p336_p12 = scmp.lt.s32.totalorder %s1093_s17, 3 }
  0x39   : > { %p337_p13 = pnand %p788_p11, %p336_p12 }
  0x3a   : > { %s1249_s6 = sand.u32 (!%p337_p13), 1, %s1077_s13   ;;  %s791_s11 = sshll.u32 (!%p337_p13), %s1085_s15, 1 }
  0x3b   : > { %340 = sbr.rel (%p337_p13) target bundleno = 255 (0xff), region = 66  ;;  %s789_s9 = sshll.u32 (!%p337_p13), %s1249_s6, 8 }
  0x3c   : > { %s1255_s10 = scalar_lea.vmem (!%p337_p13), [#allocation3], %s789_s9  ;;  %p382_p0 = scmp.lt.s32.totalorder (!%p337_p13), %s791_s11, 3 }
  0x3d   : > { %s790_s23 = sshll.u32 (!%p337_p13), %s1249_s6, 2  ;;  %s958_s26 = sshll.u32 (!%p337_p13), %s1085_s15, 2 }
  0x3e   : > { %s678_s29 = scalar_lea.hbm (!%p337_p13), %s1367_s3, %s958_s26  ;;  %s373_s30 = scalar_lea.vmem (!%p337_p13), [#allocation4], %s790_s23 }
  0x3f   : > { %s680_s4 = sshll.u32 (!%p337_p13), %s373_s30, 4  ;;  %s682_s5 = sshll.u32 (!%p337_p13), %s678_s29, 4  ;;  %s681_s4 = int_to_ptr.vmem [resolvable:$true] %s680_s4  ;;  %s683_s5 = int_to_ptr.hbm [resolvable:$true] %s682_s5 }
  0x40   : > { %v393_v32 = vld [vmem:[%s1364_s0] sm:$0x3]  ;;  %v850_v33 = vld [vmem:[%s1255_s10 + $0x70] sm:$0xf]  ;;  %v941_v34 = vld [vmem:[%s1255_s10 + $0x74] sm:$0xf0] }
  0x41   : > { %427 = vst [vmem:[#allocation1] ss:$9 sm:$0xff] %v393_v32  ;;  %v914_v35 = vld [vmem:[%s1255_s10 + $0xf0] sm:$0xf]  ;;  %v851_v36 = vor.u32 %v941_v34, %v850_v33  ;;  %v957_v37 = vld [vmem:[%s1255_s10 + $0xf4] sm:$0xf0] }
  0x42   : > { %v940_v38 = vld [vmem:[%s1255_s10 + $0x74] sm:$0xf]  ;;  %v852_v39 = vld [vmem:[%s1255_s10 + $0x78] sm:$0xf0]  ;;  %v915_v40 = vor.u32 %v957_v37, %v914_v35  ;;  %v842_v44 = vld [vmem:[%s1255_s10 + $0x60] sm:$0xf] }
  0x43   : > { %v855_v41 = vor.u32 %v940_v38, %v852_v39  ;;  %v956_v42 = vld [vmem:[%s1255_s10 + $0xf4] sm:$0xf]  ;;  %v916_v43 = vld [vmem:[%s1255_s10 + $0xf8] sm:$0xf0]  ;;  %592 = vmatpush.bf16.msra.mxu0 %v851_v36  ;;  %v939_v46 = vld [vmem:[%s1255_s10 + $0x64] sm:$0xf0] }
  0x44   : > { %v919_v45 = vor.u32 %v956_v42, %v916_v43  ;;  %v906_v47 = vld [vmem:[%s1255_s10 + $0xe0] sm:$0xf]  ;;  %v955_v48 = vld [vmem:[%s1255_s10 + $0xe4] sm:$0xf0]  ;;  %605 = vmatpush.bf16.msra.mxu1 %v915_v40  ;;  %v843_v49 = vor.u32 %v939_v46, %v842_v44  ;;  %v938_v51 = vld [vmem:[%s1255_s10 + $0x64] sm:$0xf] }
  0x45   : > { %618 = vmatpush.bf16.msra.mxu2 %v855_v41  ;;  %v907_v50 = vor.u32 %v955_v48, %v906_v47  ;;  %v844_v52 = vld [vmem:[%s1255_s10 + $0x68] sm:$0xf0]  ;;  %v954_v53 = vld [vmem:[%s1255_s10 + $0xe4] sm:$0xf]  ;;  %v834_v56 = vld [vmem:[%s1255_s10 + $0x50] sm:$0xf] }
  0x46   : > { %631 = vmatpush.bf16.msra.mxu3 %v919_v45  ;;  %v847_v54 = vor.u32 %v938_v51, %v844_v52  ;;  %v908_v55 = vld [vmem:[%s1255_s10 + $0xe8] sm:$0xf0]  ;;  %v937_v57 = vld [vmem:[%s1255_s10 + $0x54] sm:$0xf0]  ;;  %v898_v59 = vld [vmem:[%s1255_s10 + $0xd0] sm:$0xf] }
  0x47   : > { %v911_v58 = vor.u32 %v954_v53, %v908_v55  ;;  %v953_v60 = vld [vmem:[%s1255_s10 + $0xd4] sm:$0xf0]  ;;  %v936_v61 = vld [vmem:[%s1255_s10 + $0x54] sm:$0xf]  ;;  %593 = vmatpush.bf16.msra.mxu0 %v843_v49  ;;  %v835_v62 = vor.u32 %v937_v57, %v834_v56  ;;  %v836_v63 = vld [vmem:[%s1255_s10 + $0x58] sm:$0xf0] }
  0x48   : > { %v952_v0 = vld [vmem:[%s1255_s10 + $0xd4] sm:$0xf]  ;;  %v900_v1 = vld [vmem:[%s1255_s10 + $0xd8] sm:$0xf0]  ;;  %606 = vmatpush.bf16.msra.mxu1 %v907_v50  ;;  %v899_v2 = vor.u32 %v953_v60, %v898_v59  ;;  %v839_v3 = vor.u32 %v936_v61, %v836_v63  ;;  %v826_v4 = vld [vmem:[%s1255_s10 + $0x40] sm:$0xf] }
  0x49   : > { %619 = vmatpush.bf16.msra.mxu2 %v847_v54  ;;  %v935_v5 = vld [vmem:[%s1255_s10 + $0x44] sm:$0xf0]  ;;  %v890_v6 = vld [vmem:[%s1255_s10 + $0xc0] sm:$0xf]  ;;  %v903_v7 = vor.u32 %v952_v0, %v900_v1  ;;  %v934_v9 = vld [vmem:[%s1255_s10 + $0x44] sm:$0xf] }
  0x4a   : > { %632 = vmatpush.bf16.msra.mxu3 %v911_v58  ;;  %v951_v8 = vld [vmem:[%s1255_s10 + $0xc4] sm:$0xf0]  ;;  %v828_v10 = vld [vmem:[%s1255_s10 + $0x48] sm:$0xf0]  ;;  %v950_v11 = vld [vmem:[%s1255_s10 + $0xc4] sm:$0xf]  ;;  %v827_v13 = vor.u32 %v935_v5, %v826_v4 }
  0x4b   : > { %v892_v12 = vld [vmem:[%s1255_s10 + $0xc8] sm:$0xf0]  ;;  %594 = vmatpush.bf16.msra.mxu0 %v835_v62  ;;  %v891_v14 = vor.u32 %v951_v8, %v890_v6  ;;  %v831_v15 = vor.u32 %v934_v9, %v828_v10  ;;  %v818_v16 = vld [vmem:[%s1255_s10 + $0x30] sm:$0xf]  ;;  %v933_v17 = vld [vmem:[%s1255_s10 + $0x34] sm:$0xf0] }
  0x4c   : > { %607 = vmatpush.bf16.msra.mxu1 %v899_v2  ;;  %v882_v18 = vld [vmem:[%s1255_s10 + $0xb0] sm:$0xf]  ;;  %v895_v19 = vor.u32 %v950_v11, %v892_v12  ;;  %v949_v20 = vld [vmem:[%s1255_s10 + $0xb4] sm:$0xf0]  ;;  %v932_v21 = vld [vmem:[%s1255_s10 + $0x34] sm:$0xf]  ;;  %v819_v25 = vor.u32 %v933_v17, %v818_v16 }
  0x4d   : > { %620 = vmatpush.bf16.msra.mxu2 %v839_v3  ;;  %v820_v22 = vld [vmem:[%s1255_s10 + $0x38] sm:$0xf0]  ;;  %v948_v23 = vld [vmem:[%s1255_s10 + $0xb4] sm:$0xf]  ;;  %v883_v26 = vor.u32 %v949_v20, %v882_v18  ;;  %v810_v28 = vld [vmem:[%s1255_s10 + $0x20] sm:$0xf] }
  0x4e   : > { %633 = vmatpush.bf16.msra.mxu3 %v903_v7  ;;  %v884_v24 = vld [vmem:[%s1255_s10 + $0xb8] sm:$0xf0]  ;;  %v823_v27 = vor.u32 %v932_v21, %v820_v22  ;;  %v931_v29 = vld [vmem:[%s1255_s10 + $0x24] sm:$0xf0]  ;;  %v874_v30 = vld [vmem:[%s1255_s10 + $0xa0] sm:$0xf] }
  0x4f   : > { %595 = vmatpush.bf16.msra.mxu0 %v827_v13  ;;  %v887_v31 = vor.u32 %v948_v23, %v884_v24  ;;  %v947_v32 = vld [vmem:[%s1255_s10 + $0xa4] sm:$0xf0]  ;;  %v930_v33 = vld [vmem:[%s1255_s10 + $0x24] sm:$0xf]  ;;  %v812_v34 = vld [vmem:[%s1255_s10 + $0x28] sm:$0xf0]  ;;  %v811_v37 = vor.u32 %v931_v29, %v810_v28 }
  0x50   : > { %608 = vmatpush.bf16.msra.mxu1 %v891_v14  ;;  %v946_v35 = vld [vmem:[%s1255_s10 + $0xa4] sm:$0xf]  ;;  %v876_v36 = vld [vmem:[%s1255_s10 + $0xa8] sm:$0xf0]  ;;  %v875_v38 = vor.u32 %v947_v32, %v874_v30  ;;  %v815_v39 = vor.u32 %v930_v33, %v812_v34  ;;  %v802_v40 = vld [vmem:[%s1255_s10 + $0x10] sm:$0xf] }
  0x51   : > { %621 = vmatpush.bf16.msra.mxu2 %v831_v15  ;;  %v929_v41 = vld [vmem:[%s1255_s10 + $0x14] sm:$0xf0]  ;;  %v866_v42 = vld [vmem:[%s1255_s10 + $0x90] sm:$0xf]  ;;  %v879_v43 = vor.u32 %v946_v35, %v876_v36  ;;  %v928_v45 = vld [vmem:[%s1255_s10 + $0x14] sm:$0xf] }
  0x52   : > { %634 = vmatpush.bf16.msra.mxu3 %v895_v19  ;;  %v945_v44 = vld [vmem:[%s1255_s10 + $0x94] sm:$0xf0]  ;;  %v804_v46 = vld [vmem:[%s1255_s10 + $0x18] sm:$0xf0]  ;;  %v944_v47 = vld [vmem:[%s1255_s10 + $0x94] sm:$0xf]  ;;  %v803_v49 = vor.u32 %v929_v41, %v802_v40 }
  0x53   : > { %596 = vmatpush.bf16.msra.mxu0 %v819_v25  ;;  %v868_v48 = vld [vmem:[%s1255_s10 + $0x98] sm:$0xf0]  ;;  %v867_v50 = vor.u32 %v945_v44, %v866_v42  ;;  %v807_v51 = vor.u32 %v928_v45, %v804_v46  ;;  %v794_v52 = vld [vmem:[%s1255_s10] sm:$0xf]  ;;  %v927_v53 = vld [vmem:[%s1255_s10 + $0x4] sm:$0xf0] }
  0x54   : > { %609 = vmatpush.bf16.msra.mxu1 %v883_v26  ;;  %v858_v54 = vld [vmem:[%s1255_s10 + $0x80] sm:$0xf]  ;;  %v871_v55 = vor.u32 %v944_v47, %v868_v48  ;;  %v943_v56 = vld [vmem:[%s1255_s10 + $0x84] sm:$0xf0]  ;;  %v926_v57 = vld [vmem:[%s1255_s10 + $0x4] sm:$0xf]  ;;  %v795_v61 = vor.u32 %v927_v53, %v794_v52 }
  0x55   : > { %622 = vmatpush.bf16.msra.mxu2 %v823_v27  ;;  %v796_v58 = vld [vmem:[%s1255_s10 + $0x8] sm:$0xf0]  ;;  %v942_v59 = vld [vmem:[%s1255_s10 + $0x84] sm:$0xf]  ;;  %v859_v62 = vor.u32 %v943_v56, %v858_v54  ;;  %v428_v1 = vld [vmem:[#allocation1] sm:$0xff]  ;;  %v1095_v3 = vmov 0.0  }
  0x56   : > { %635 = vmatpush.bf16.msra.mxu3 %v887_v31  ;;  %v860_v60 = vld [vmem:[%s1255_s10 + $0x88] sm:$0xf0]  ;;  %v799_v63 = vor.u32 %v926_v57, %v796_v58  ;;  %v429_v2 = vld [vmem:[#allocation1 + $0x9] sm:$0xff]  ;;  %391 = vst [vmem:[#allocation2] sm:$0xf] %v1095_v3  ;;  %s1378_s11 = smov (!%p382_p0, %s791_s11), 3 }
  0x57   : > { %597 = vmatpush.bf16.msra.mxu0 %v811_v37  ;;  %v863_v0 = vor.u32 %v942_v59, %v860_v60  ;;  %s384_s21 = scalar_lea.vmem %s1366_s2, %s1378_s11  ;;  %vm647_vm0 = vcmask 1041408   ;;  %s667_s7 = scalar_lea.sflag [#allocation5], %s1249_s6 }
  0x58   : > { %610 = vmatpush.bf16.msra.mxu1 %v875_v38  ;;  %v656_v12 = vld [vmem:[%s384_s21] sm:$0x3]  ;;  %s1029_s8 = sshra.s32 %s683_s5, 4  ;;  %s1035_s11 = scalar_lea.hbm %s1367_s3, 8  ;;  %s1030_s8 = int_to_ptr.hbm [resolvable:$true] %s1029_s8 }
  0x59   : > { %623 = vmatpush.bf16.msra.mxu2 %v815_v39  ;;  %v659_v16 = vperm.slane %v656_v12, 1  ;;  %v658_v20 = vperm.slane %v656_v12, 0  ;;  %s1031_s9 = scalar_lea.hbm %s1030_s8, 4  ;;  %p1036_p4 = scmp.lt.s32.totalorder %s1030_s8, %s1367_s3 }
  0x5a   : > { %636 = vmatpush.bf16.msra.mxu3 %v879_v43  ;;  %p1032_p1 = scmp.ne.s32.totalorder %s1030_s8, %s1031_s9  ;;  %p1037_p6 = scmp.lt.s32.totalorder %s1035_s11, %s1031_s9 }
  0x5b   : > { %598 = vmatpush.bf16.msra.mxu0 %v803_v49  ;;  %v660_v21 = vrot.slane %v659_v16, 6 }
  0x5c   : > { %611 = vmatpush.bf16.msra.mxu1 %v867_v50  ;;  %p1033_p2 = pnand %p1032_p1, %p1155_p5  ;;  %p1038_p7 = por %p1037_p6, %p1036_p4 }
  0x5d   : > { %624 = vmatpush.bf16.msra.mxu2 %v807_v51  ;;  %v392_v13 = vld [vmem:[#allocation2] sm:$0xf]  ;;  %v661_v22 = vsel %vm647_vm0, %v658_v20, %v660_v21 }
  0x5e   : > { %637 = vmatpush.bf16.msra.mxu3 %v871_v55  ;;  %p1034_p3 = pneg %p1033_p2 }
  0x5f   : > { %599 = vmatpush.bf16.msra.mxu0 %v795_v61 }
  0x60   : > { %612 = vmatpush.bf16.msra.mxu1 %v859_v62  ;;  %p1039_p8 = pnand %p1038_p7, %p1034_p3 }
  0x61   : > { %625 = vmatpush.bf16.msra.mxu2 %v799_v63 }
  0x62   : > { %638 = vmatpush.bf16.msra.mxu3 %v863_v0  ;;  %600 = vmatmul.bf16.vlgmr.msra.gmra.mxu0 %v428_v1 }
  0x63   : > { %613 = vmatmul.bf16.vlgmr.msra.gmra.mxu1 %v429_v2 }
  0x64   : > { %626 = vmatmul.bf16.vlgmr.msra.gmra.mxu2 %v428_v1 }
  0x65   : > { %639 = vmatmul.bf16.vlgmr.msra.gmra.mxu3 %v429_v2 }
  0xdf   : > { %v601_v4 = vpop.f32.mrf.mxu0 }
  0xe0   : > { %v614_v5 = vpop.f32.mrf.mxu1 }
  0xe1   : > { %v615_v9 = vadd.f32 %v614_v5, %v601_v4 }
  0xe7   : > { %v627_v6 = vpop.f32.mrf.mxu2  ;;  %v603_v8 = vpop.f32.mrf.mxu0 }
  0xe8   : > { %v640_v7 = vpop.f32.mrf.mxu3  ;;  %v616_v11 = vpop.f32.mrf.mxu1 }
  0xe9   : > { %v641_v10 = vadd.f32 %v640_v7, %v627_v6 }
  0xeb   : > { %v646_v14 = vrot.slane %v641_v10, 6 }
  0xed   : > { %v648_v15 = vsel %vm647_vm0, %v615_v9, %v646_v14 }
  0xee   : > { %v650_v17 = vadd.f32 %v648_v15, %v392_v13 }
  0xef   : > { %v629_v18 = vpop.f32.mrf.mxu2 }
  0xf0   : > { %651 = vst [vmem:[#allocation2] sm:$0xf] %v650_v17  ;;  %v642_v19 = vpop.f32.mrf.mxu3 }
  0xf7   : > { %v655_v23 = vld [vmem:[#allocation2] sm:$0xf] }
  0xf8   : > { %v663_v24 = vadd.f32 %v661_v22, %v655_v23 }
  0xfa   : > { %v664_v25 = vmax.f32 %v663_v24, 0.0 }
  0xfc   : > { %665 = vst [vmem:[%s373_s30] sm:$0xf] %v664_v25 }
  0xfd   : > { %1042 = shalt.err (!%p1039_p8)
}
  0xfe   : > { %959 = dma.vmem_to_hbm [thread:$0]  (%p1155_p5), %s681_s4, 64, %s683_s5, %s667_s7  }
  0xff PF: > { %s694_s6 = sand.u32 1, %s1073_s12   ;;  %p962_p11 = pnand %p784_p10, %p1166_p9 }
 0x100   : > { %s695_s21 = scalar_lea.sflag [#allocation5], %s694_s6 }
 0x101   : > { %p963_p12 = pneg %p962_p11 }
 0x103   : > { %1068 = dma.done.wait (%p963_p12), %s695_s21, 64  }
 0x104   : > { %1070 = vsyncadd (%p963_p12), %s695_s21, 4294967232  ;;  %s16_s17 = sadd.s32 1, %s1093_s17   ;;  %s1370_s12 = smov %s1077_s13 }
 0x105   : > { %p13_p13 = scmp.ge.s32.totalorder %s16_s17, 4   ;;  %s1371_s13 = smov %s1081_s14 }
 0x106   : > { %s1372_s14 = smov %s1164_s24  ;;  %s1373_s15 = smov %s1089_s16 }
 0x107   : > { %s1374_s16 = smov %s1376_s20  ;;  %15 = sbr.rel (!%p13_p13) target bundleno = 4 (0x4), region = 124 }
 0x10c   :  { %701 = vsyncpa [#allocation5], 1 }
 0x10d   :  { %703 = vsyncpa [#allocation5 + $0x1], 1 }

// kernel: attention_cnn_forward.4
= control target key start
LH: loop header
LB: loop body
LE: loop exit
PB: predicated region body
PF: predicated region fallthrough
CT: control target
= control target key end

     0   :  { %9 = vsyncpa [#allocation5], 0  ;;  %s1963_s0 = inlined_call_operand.vmem [shape: f32[1152], index: 0, kind: input, shape index: {}]   ;;  %s1964_s1 = inlined_call_operand.vmem [shape: f32[16], index: 1, kind: input, shape index: {}]   ;;  %s1965_s2 = inlined_call_operand.vmem [shape: f32[16], index: 2, kind: input, shape index: {}]   ;;  %s1966_s3 = inlined_call_operand.vmem [shape: f32[2,8,14,128], index: 3, kind: input, shape index: {}]   ;;  %s1967_s4 = inlined_call_operand.vmem [shape: f32[2,16,4,128], index: 4, kind: output, shape index: {}]  }
   0x1   :  { %10 = vsyncpa [#allocation7], 0  ;;  %s1484_s15 = smov 0   ;;  %s1486_s16 = smov 0  }
   0x2   :  { %s1488_s17 = smov 0  }
   0x3 LB: > { %s172_s20 = sshll.u32 %s1964_s1, 4  ;;  %s1213_s21 = sadd.s32 4294967295, %s1448_s17   ;;  %s1448_s17 = sphi %s1488_s17, %s16_s17   ;;  %s1444_s16 = sphi %s1486_s16, %s1971_s16   ;;  %s1440_s15 = sphi %s1484_s15, %s1970_s15   ;;  %s173_s20 = int_to_ptr.vmem [resolvable:$true] %s172_s20 }
   0x4   : > { %p1215_p0 = scmp.ge.s32.totalorder %s1448_s17, 1  ;;  %p150_p1 = scmp.lt.s32.totalorder %s1448_s17, 3 }
   0x5   : > { %p1505_p2 = scmp.eq.s32.totalorder %s1213_s21, 0  ;;  %s28_s24 = sadd.s32 1, %s1444_s16 }
   0x6   : > { %p1509_p3 = pnand %p1215_p0, %p150_p1  ;;  %s162_s27 = sshll.u32 %s1963_s0, 4  ;;  %s163_s27 = int_to_ptr.vmem [resolvable:$true] %s162_s27 }
   0x7   : > { %p30_p6 = scmp.ge.s32.totalorder %s28_s24, 2  ;;  %s182_s30 = sshll.u32 %s1965_s2, 4  ;;  %s183_s30 = int_to_ptr.vmem [resolvable:$true] %s182_s30 }
   0x8   : > { %p1316_p4 = pneg %p1509_p3  ;;  %s1454_s5 = smov [#allocation6]  }
   0x9   : > { %s1973_s24 = smov (%p30_p6, %s28_s24), 0  ;;  %s1455_s6 = smov [#allocation4]  }
   0xa   : > { %p1317_p5 = pnand %p1505_p2, %p1316_p4  ;;  %s1456_s7 = smov [#allocation8]  }
   0xb   : > { %203 = sbr.rel (%p1509_p3) target bundleno = 399 (0x18f), region = 36 }
   0xc   : > { %1322 = dma.vmem_to_smem (!%p1317_p5), %s173_s20, 16, %s1454_s5, [#allocation7]  }
   0xd   : > { %1319 = dma.vmem_to_smem (!%p1317_p5), %s163_s27, 144, %s1455_s6, [#allocation5]  }
   0xe   : > { %1325 = dma.vmem_to_smem (!%p1317_p5), %s183_s30, 16, %s1456_s7, [#allocation7]  }
  0x10   : > { %1431 = dma.done.wait (%p1505_p2), [#allocation5], 144  }
  0x11   : > { %1433 = vsyncadd (%p1505_p2), [#allocation5], 4294967152 }
  0x12   : > { %1435 = dma.done.wait (%p1505_p2), [#allocation7], 32  }
  0x13   : > { %1437 = vsyncadd (%p1505_p2), [#allocation7], 4294967264 }
  0x14   : > { %220 = sfence }
  0x15   : > { %p245_p7 = scmp.lt.s32.totalorder %s1440_s15, 1  ;;  %s1458_s19 = smov 126  }
  0x16   : > { %s1588_s20 = smov 0  }
  0x17   : > { %s1975_s15 = smov (!%p245_p7, %s1440_s15), 1 }
  0x18   : > { %s1302_s8 = sshll.u32 %s1975_s15, 7  ;;  %s1303_s9 = sshll.u32 %s1975_s15, 6 }
  0x19   : > { %s1541_s12 = scalar_lea.vmem %s1966_s3, %s1302_s8  ;;  %s1546_s18 = scalar_lea.vmem %s1967_s4, %s1303_s9 }
  0x1a   : > { %v1228_v0 = vld [vmem:[%s1541_s12 + $0x10] sm:$0xff]  ;;  %v260_v1 = vld [vmem:[%s1541_s12] sm:$0xff]  ;;  %s1457_s15 = smov 127   ;;  %v1229_v3 = vld [vmem:[%s1541_s12 + $0x18] sm:$0x3f] }
  0x1b   : > { %271 = vrot.lane.b32.xlu1 %v1228_v0, %s1457_s15  ;;  %262 = vrot.lane.b32.xlu0 %v260_v1, %s1457_s15  ;;  %v1230_v2 = vld [vmem:[%s1541_s12 + $0x20] sm:$0xff]  ;;  %v261_v4 = vld [vmem:[%s1541_s12 + $0x8] sm:$0x3f] }
  0x1c   : > { %281 = vrot.lane.b32.xlu2 %v1230_v2, %s1457_s15  ;;  %v1231_v5 = vld [vmem:[%s1541_s12 + $0x28] sm:$0x3f]  ;;  %v1233_v6 = vld [vmem:[%s1541_s12 + $0x38] sm:$0x3f]  ;;  %v1232_v7 = vld [vmem:[%s1541_s12 + $0x30] sm:$0xff] }
  0x1d   : > { %v1234_v8 = vld [vmem:[%s1541_s12 + $0x40] sm:$0xff]  ;;  %v1236_v9 = vld [vmem:[%s1541_s12 + $0x50] sm:$0xff]  ;;  %v1235_v10 = vld [vmem:[%s1541_s12 + $0x48] sm:$0x3f] }
  0x1e   : > { %v1237_v11 = vld [vmem:[%s1541_s12 + $0x58] sm:$0x3f]  ;;  %v1239_v12 = vld [vmem:[%s1541_s12 + $0x68] sm:$0x3f]  ;;  %v1238_v13 = vld [vmem:[%s1541_s12 + $0x60] sm:$0xff] }
  0x1f   : > { %v1240_v14 = vld [vmem:[%s1541_s12 + $0x70] sm:$0xff]  ;;  %v1241_v15 = vld [vmem:[%s1541_s12 + $0x78] sm:$0x3f]  ;;  %v339_v16 = vld [vmem:[%s1541_s12 + $0x8] sm:$0x3f] }
  0x20   : > { %v1243_v17 = vld [vmem:[%s1541_s12 + $0x18] sm:$0x3f]  ;;  %v1245_v18 = vld [vmem:[%s1541_s12 + $0x28] sm:$0x3f] }
  0x21   : > { %v1247_v19 = vld [vmem:[%s1541_s12 + $0x38] sm:$0x3f]  ;;  %v1249_v20 = vld [vmem:[%s1541_s12 + $0x48] sm:$0x3f] }
  0x22   : > { %v1251_v21 = vld [vmem:[%s1541_s12 + $0x58] sm:$0x3f]  ;;  %v1253_v22 = vld [vmem:[%s1541_s12 + $0x68] sm:$0x3f] }
  0x23   : > { %273 = vrot.lane.b32.xlu1 %v1229_v3, %s1457_s15  ;;  %264 = vrot.lane.b32.xlu0 %v261_v4, %s1457_s15  ;;  %v1255_v23 = vld [vmem:[%s1541_s12 + $0x78] sm:$0x3f] }
  0x24   : > { %283 = vrot.lane.b32.xlu2 %v1231_v5, %s1457_s15 }
  0x2b   : > { %293 = vrot.lane.b32.xlu1 %v1233_v6, %s1457_s15  ;;  %291 = vrot.lane.b32.xlu0 %v1232_v7, %s1457_s15 }
  0x2c   : > { %301 = vrot.lane.b32.xlu2 %v1234_v8, %s1457_s15 }
  0x33   : > { %311 = vrot.lane.b32.xlu1 %v1236_v9, %s1457_s15  ;;  %303 = vrot.lane.b32.xlu0 %v1235_v10, %s1457_s15 }
  0x34   : > { %313 = vrot.lane.b32.xlu2 %v1237_v11, %s1457_s15 }
  0x3b   : > { %323 = vrot.lane.b32.xlu1 %v1239_v12, %s1457_s15  ;;  %321 = vrot.lane.b32.xlu0 %v1238_v13, %s1457_s15 }
  0x3c   : > { %331 = vrot.lane.b32.xlu2 %v1240_v14, %s1457_s15 }
  0x43   : > { %340 = vrot.lane.b32.xlu1 %v260_v1, %s1458_s19  ;;  %333 = vrot.lane.b32.xlu0 %v1241_v15, %s1457_s15 }
  0x44   : > { %342 = vrot.lane.b32.xlu2 %v339_v16, %s1458_s19 }
  0x4b   : > { %351 = vrot.lane.b32.xlu1 %v1243_v17, %s1458_s19  ;;  %349 = vrot.lane.b32.xlu0 %v1228_v0, %s1458_s19 }
  0x4c   : > { %358 = vrot.lane.b32.xlu2 %v1230_v2, %s1458_s19 }
  0x53   : > { %367 = vrot.lane.b32.xlu1 %v1232_v7, %s1458_s19  ;;  %360 = vrot.lane.b32.xlu0 %v1245_v18, %s1458_s19 }
  0x54   : > { %369 = vrot.lane.b32.xlu2 %v1247_v19, %s1458_s19 }
  0x5b   : > { %378 = vrot.lane.b32.xlu1 %v1249_v20, %s1458_s19  ;;  %376 = vrot.lane.b32.xlu0 %v1234_v8, %s1458_s19 }
  0x5c   : > { %385 = vrot.lane.b32.xlu2 %v1236_v9, %s1458_s19 }
  0x63   : > { %394 = vrot.lane.b32.xlu1 %v1238_v13, %s1458_s19  ;;  %387 = vrot.lane.b32.xlu0 %v1251_v21, %s1458_s19 }
  0x64   : > { %396 = vrot.lane.b32.xlu2 %v1253_v22, %s1458_s19 }
  0x6b   : > { %405 = vrot.lane.b32.xlu1 %v1255_v23, %s1458_s19  ;;  %403 = vrot.lane.b32.xlu0 %v1240_v14, %s1458_s19 }
  0x76   : > { %v282_v24 = vpop.permute.xlu2 %281 }
  0x77   : > { %286 = vst [vmem:[#allocation2 + $0x20] sm:$0xff] %v282_v24 }
  0x7e   : > { %v284_v25 = vpop.permute.xlu2 %283 }
  0x7f   : > { %287 = vst [vmem:[#allocation2 + $0x28] sm:$0x3f] %v284_v25 }
  0x86   : > { %v302_v26 = vpop.permute.xlu2 %301 }
  0x87   : > { %306 = vst [vmem:[#allocation2 + $0x40] sm:$0xff] %v302_v26 }
  0x8d   : > { %v272_v27 = vpop.permute.xlu1 %271  ;;  %v263_v28 = vpop.permute.xlu0 %262 }
  0x8e   : > { %276 = vst [vmem:[#allocation2 + $0x10] sm:$0xff] %v272_v27  ;;  %v314_v29 = vpop.permute.xlu2 %313 }
  0x8f   : > { %266 = vst [vmem:[#allocation2] sm:$0xff] %v263_v28 }
  0x90   : > { %317 = vst [vmem:[#allocation2 + $0x58] sm:$0x3f] %v314_v29 }
  0x95   : > { %v274_v30 = vpop.permute.xlu1 %273  ;;  %v265_v31 = vpop.permute.xlu0 %264 }
  0x96   : > { %277 = vst [vmem:[#allocation2 + $0x18] sm:$0x3f] %v274_v30  ;;  %v332_v32 = vpop.permute.xlu2 %331 }
  0x97   : > { %267 = vst [vmem:[#allocation2 + $0x8] sm:$0x3f] %v265_v31 }
  0x98   : > { %336 = vst [vmem:[#allocation2 + $0x70] sm:$0xff] %v332_v32 }
  0x9d   : > { %v294_v33 = vpop.permute.xlu1 %293  ;;  %v292_v34 = vpop.permute.xlu0 %291 }
  0x9e   : > { %297 = vst [vmem:[#allocation2 + $0x38] sm:$0x3f] %v294_v33  ;;  %v343_v35 = vpop.permute.xlu2 %342 }
  0x9f   : > { %296 = vst [vmem:[#allocation2 + $0x30] sm:$0xff] %v292_v34 }
  0xa0   : > { %346 = vst [vmem:[#allocation2 + $0x88] sm:$0x3f] %v343_v35 }
  0xa5   : > { %v312_v36 = vpop.permute.xlu1 %311  ;;  %v304_v37 = vpop.permute.xlu0 %303 }
  0xa6   : > { %316 = vst [vmem:[#allocation2 + $0x50] sm:$0xff] %v312_v36  ;;  %v359_v38 = vpop.permute.xlu2 %358 }
  0xa7   : > { %307 = vst [vmem:[#allocation2 + $0x48] sm:$0x3f] %v304_v37 }
  0xa8   : > { %363 = vst [vmem:[#allocation2 + $0xa0] sm:$0xff] %v359_v38 }
  0xad   : > { %v324_v39 = vpop.permute.xlu1 %323  ;;  %v322_v40 = vpop.permute.xlu0 %321 }
  0xae   : > { %327 = vst [vmem:[#allocation2 + $0x68] sm:$0x3f] %v324_v39  ;;  %v370_v41 = vpop.permute.xlu2 %369 }
  0xaf   : > { %326 = vst [vmem:[#allocation2 + $0x60] sm:$0xff] %v322_v40 }
  0xb0   : > { %373 = vst [vmem:[#allocation2 + $0xb8] sm:$0x3f] %v370_v41 }
  0xb5   : > { %v341_v42 = vpop.permute.xlu1 %340  ;;  %v334_v43 = vpop.permute.xlu0 %333 }
  0xb6   : > { %345 = vst [vmem:[#allocation2 + $0x80] sm:$0xff] %v341_v42  ;;  %v386_v44 = vpop.permute.xlu2 %385 }
  0xb7   : > { %337 = vst [vmem:[#allocation2 + $0x78] sm:$0x3f] %v334_v43 }
  0xb8   : > { %390 = vst [vmem:[#allocation2 + $0xd0] sm:$0xff] %v386_v44 }
  0xbd   : > { %v352_v45 = vpop.permute.xlu1 %351  ;;  %v350_v46 = vpop.permute.xlu0 %349 }
  0xbe   : > { %355 = vst [vmem:[#allocation2 + $0x98] sm:$0x3f] %v352_v45  ;;  %v397_v47 = vpop.permute.xlu2 %396 }
  0xbf   : > { %354 = vst [vmem:[#allocation2 + $0x90] sm:$0xff] %v350_v46 }
  0xc0   : > { %400 = vst [vmem:[#allocation2 + $0xe8] sm:$0x3f] %v397_v47 }
  0xc5   : > { %v368_v48 = vpop.permute.xlu1 %367  ;;  %v361_v49 = vpop.permute.xlu0 %360 }
  0xc6   : > { %372 = vst [vmem:[#allocation2 + $0xb0] sm:$0xff] %v368_v48 }
  0xc7   : > { %364 = vst [vmem:[#allocation2 + $0xa8] sm:$0x3f] %v361_v49 }
  0xcd   : > { %v379_v50 = vpop.permute.xlu1 %378  ;;  %v377_v51 = vpop.permute.xlu0 %376 }
  0xce   : > { %382 = vst [vmem:[#allocation2 + $0xc8] sm:$0x3f] %v379_v50 }
  0xcf   : > { %381 = vst [vmem:[#allocation2 + $0xc0] sm:$0xff] %v377_v51 }
  0xd5   : > { %v395_v52 = vpop.permute.xlu1 %394  ;;  %v388_v53 = vpop.permute.xlu0 %387 }
  0xd6   : > { %399 = vst [vmem:[#allocation2 + $0xe0] sm:$0xff] %v395_v52 }
  0xd7   : > { %391 = vst [vmem:[#allocation2 + $0xd8] sm:$0x3f] %v388_v53 }
  0xdd   : > { %v406_v54 = vpop.permute.xlu1 %405  ;;  %v404_v55 = vpop.permute.xlu0 %403 }
  0xde   : > { %409 = vst [vmem:[#allocation2 + $0xf8] sm:$0x3f] %v406_v54 }
  0xdf   : > { %408 = vst [vmem:[#allocation2 + $0xf0] sm:$0xff] %v404_v55 }
  0xe0 LB: >> { %s1594_s21 = smul.u32 72, %s1452_s20  ;;  %s1597_s22 = sshll.u32 %s1452_s20, 3  ;;  %v418_v56 = vld [vmem:[%s1541_s12] sm:$0xff]  ;;  %v419_v57 = vld [vmem:[%s1541_s12 + $0x8] sm:$0xf]  ;;  %v1256_v59 = vld [vmem:[%s1541_s12 + $0x10] sm:$0xff]  ;;  %s1452_s20 = sphi %s1588_s20, %s415_s20  }
  0xe1   : >> { %s428_s23 = sadd.s32 1, %s1597_s22  ;;  %s438_s25 = sadd.s32 2, %s1597_s22  ;;  %v1257_v60 = vld [vmem:[%s1541_s12 + $0x18] sm:$0xf]  ;;  %v1259_v63 = vld [vmem:[%s1541_s12 + $0x20] sm:$0xff]  ;;  %v1261_v2 = vld [vmem:[%s1541_s12 + $0x30] sm:$0xff] }
  0xe2   : >> { %s421_s26 = sld [smem:[#allocation4 + %s1594_s21]]  ;;  %s1602_s27 = smul.u32 9, %s428_s23  ;;  %v1260_v0 = vld [vmem:[%s1541_s12 + $0x28] sm:$0xf]  ;;  %v1262_v3 = vld [vmem:[%s1541_s12 + $0x38] sm:$0xf] }
  0xe3   : >> { %s1604_s28 = smul.u32 9, %s438_s25  ;;  %s448_s29 = sadd.s32 3, %s1597_s22  ;;  %v1263_v10 = vld [vmem:[%s1541_s12 + $0x40] sm:$0xff]  ;;  %v1264_v11 = vld [vmem:[%s1541_s12 + $0x48] sm:$0xf]  ;;  %v1265_v17 = vld [vmem:[%s1541_s12 + $0x50] sm:$0xff] }
  0xe4   : >> { %s430_s30 = sld [smem:[#allocation4 + %s1602_s27]]  ;;  %s1608_s5 = smul.u32 9, %s448_s29  ;;  %v1266_v18 = vld [vmem:[%s1541_s12 + $0x58] sm:$0xf]  ;;  %v1267_v24 = vld [vmem:[%s1541_s12 + $0x60] sm:$0xff]  ;;  %v1269_v31 = vld [vmem:[%s1541_s12 + $0x70] sm:$0xff] }
  0xe5   : >> { %s440_s6 = sld [smem:[#allocation4 + %s1604_s28]]  ;;  %s458_s7 = sadd.s32 4, %s1597_s22  ;;  %v1268_v25 = vld [vmem:[%s1541_s12 + $0x68] sm:$0xf]  ;;  %v1270_v32 = vld [vmem:[%s1541_s12 + $0x78] sm:$0xf] }
  0xe6   : >> { %s1615_s8 = sld [smem:[#allocation4 + %s1608_s5]]  ;;  %s1617_s9 = smul.u32 9, %s458_s7  ;;  %v496_v38 = vld [vmem:[#allocation2] sm:$0xff]  ;;  %v497_v39 = vld [vmem:[#allocation2 + $0x8] sm:$0xf]  ;;  %v505_v45 = vld [vmem:[#allocation2 + $0x10] sm:$0xff] }
  0xe7   : >> { %s468_s10 = sadd.s32 5, %s1597_s22  ;;  %s478_s11 = sadd.s32 6, %s1597_s22  ;;  %v506_v46 = vld [vmem:[#allocation2 + $0x18] sm:$0xf]  ;;  %v514_v52 = vld [vmem:[#allocation2 + $0x20] sm:$0xff] }
  0xe8   : >> { %v422_v58 = vstv %s421_s26  ;;  %s1624_s13 = sld [smem:[#allocation4 + %s1617_s9]]  ;;  %s1626_s14 = smul.u32 9, %s468_s10  ;;  %v515_v53 = vld [vmem:[#allocation2 + $0x28] sm:$0xf] }
  0xe9   : >> { %v423_v61 = vmul.f32 %v422_v58, %v418_v56  ;;  %v424_v62 = vmul.f32 %v422_v58, %v419_v57  ;;  %s1630_s15 = smul.u32 9, %s478_s11  ;;  %s488_s19 = sadd.s32 7, %s1597_s22 }
  0xea   : >> { %v431_v1 = vstv %s430_s30  ;;  %s1636_s23 = sld [smem:[#allocation4 + %s1626_s14]]  ;;  %s1638_s25 = smul.u32 9, %s488_s19 }
  0xeb   : >> { %v432_v4 = vmul.f32 %v1256_v59, %v431_v1  ;;  %v433_v5 = vmul.f32 %v1257_v60, %v431_v1  ;;  %v441_v6 = vstv %s440_s6  ;;  %s1641_s26 = sld [smem:[#allocation4 + %s1630_s15]]  ;;  %s498_s29 = sadd.s32 1, %s1594_s21  ;;  %v523_v59 = vld [vmem:[#allocation2 + $0x30] sm:$0xff]  ;;  %v524_v60 = vld [vmem:[#allocation2 + $0x38] sm:$0xf] }
  0xec   : >> { %v442_v7 = vmul.f32 %v1259_v63, %v441_v6  ;;  %v443_v8 = vmul.f32 %v1260_v0, %v441_v6  ;;  %v451_v9 = vstv %s1615_s8  ;;  %s1648_s22 = sld [smem:[#allocation4 + %s1638_s25]]  ;;  %s507_s30 = sadd.s32 1, %s1602_s27 }
  0xed   : >> { %v434_v12 = vadd.f32 %v432_v4, %v423_v61  ;;  %v435_v13 = vadd.f32 %v433_v5, %v424_v62  ;;  %v452_v14 = vmul.f32 %v1261_v2, %v451_v9  ;;  %v453_v15 = vmul.f32 %v1262_v3, %v451_v9  ;;  %s1651_s6 = sld [smem:[#allocation4 + %s498_s29]]  ;;  %s516_s7 = sadd.s32 1, %s1604_s28  ;;  %v532_v2 = vld [vmem:[#allocation2 + $0x40] sm:$0xff]  ;;  %v533_v3 = vld [vmem:[#allocation2 + $0x48] sm:$0xf]  ;;  %v541_v9 = vld [vmem:[#allocation2 + $0x50] sm:$0xff] }
  0xee   : >> { %v461_v16 = vstv %s1624_s13  ;;  %s1657_s8 = sld [smem:[#allocation4 + %s507_s30]]  ;;  %s525_s10 = sadd.s32 1, %s1608_s5 }
  0xef   : >> { %v444_v19 = vadd.f32 %v442_v7, %v434_v12  ;;  %v445_v20 = vadd.f32 %v443_v8, %v435_v13  ;;  %v462_v21 = vmul.f32 %v1263_v10, %v461_v16  ;;  %v463_v22 = vmul.f32 %v1264_v11, %v461_v16  ;;  %s1663_s11 = sld [smem:[#allocation4 + %s516_s7]]  ;;  %s534_s13 = sadd.s32 1, %s1617_s9  ;;  %v542_v10 = vld [vmem:[#allocation2 + $0x58] sm:$0xf]  ;;  %v550_v16 = vld [vmem:[#allocation2 + $0x60] sm:$0xff] }
  0xf0   : >> { %v471_v23 = vstv %s1636_s23  ;;  %s1670_s19 = sld [smem:[#allocation4 + %s525_s10]]  ;;  %s543_s23 = sadd.s32 1, %s1626_s14 }
  0xf1   : >> { %v454_v26 = vadd.f32 %v452_v14, %v444_v19  ;;  %v455_v27 = vadd.f32 %v453_v15, %v445_v20  ;;  %v472_v28 = vmul.f32 %v1265_v17, %v471_v23  ;;  %v473_v29 = vmul.f32 %v1266_v18, %v471_v23  ;;  %s1674_s29 = sld [smem:[#allocation4 + %s534_s13]]  ;;  %s561_s30 = sadd.s32 1, %s1638_s25  ;;  %v551_v17 = vld [vmem:[#allocation2 + $0x68] sm:$0xf]  ;;  %v559_v23 = vld [vmem:[#allocation2 + $0x70] sm:$0xff] }
  0xf2   : >> { %v481_v30 = vstv %s1641_s26  ;;  %v491_v33 = vstv %s1648_s22  ;;  %s552_s26 = sadd.s32 1, %s1630_s15  ;;  %s1678_s22 = sld [smem:[#allocation4 + %s543_s23]] }
  0xf3   : >> { %v464_v34 = vadd.f32 %v462_v21, %v454_v26  ;;  %v465_v35 = vadd.f32 %v463_v22, %v455_v27  ;;  %v482_v36 = vmul.f32 %v1267_v24, %v481_v30  ;;  %v483_v37 = vmul.f32 %v1268_v25, %v481_v30  ;;  %s570_s7 = sadd.s32 2, %s1594_s21  ;;  %s579_s10 = sadd.s32 2, %s1602_s27  ;;  %v560_v24 = vld [vmem:[#allocation2 + $0x78] sm:$0xf]  ;;  %v568_v30 = vld [vmem:[#allocation2 + $0x80] sm:$0xff] }
  0xf4   : >> { %v500_v40 = vstv %s1651_s6  ;;  %v492_v43 = vmul.f32 %v1269_v31, %v491_v33  ;;  %v493_v44 = vmul.f32 %v1270_v32, %v491_v33  ;;  %v509_v47 = vstv %s1657_s8  ;;  %s1682_s6 = sld [smem:[#allocation4 + %s552_s26]]  ;;  %s588_s13 = sadd.s32 2, %s1604_s28  ;;  %v569_v31 = vld [vmem:[#allocation2 + $0x88] sm:$0xf] }
  0xf5   : >> { %v474_v41 = vadd.f32 %v472_v28, %v464_v34  ;;  %v475_v42 = vadd.f32 %v473_v29, %v465_v35  ;;  %v501_v50 = vmul.f32 %v500_v40, %v496_v38  ;;  %v502_v51 = vmul.f32 %v500_v40, %v497_v39  ;;  %s1686_s8 = sld [smem:[#allocation4 + %s561_s30]]  ;;  %s597_s23 = sadd.s32 2, %s1608_s5  ;;  %v578_v38 = vld [vmem:[#allocation2 + $0x98] sm:$0xf] }
  0xf6   : >> { %v518_v54 = vstv %s1663_s11  ;;  %v510_v57 = vmul.f32 %v509_v47, %v505_v45  ;;  %v511_v58 = vmul.f32 %v509_v47, %v506_v46  ;;  %v527_v61 = vstv %s1670_s19  ;;  %s1690_s11 = sld [smem:[#allocation4 + %s570_s7]]  ;;  %s606_s26 = sadd.s32 2, %s1617_s9  ;;  %v587_v45 = vld [vmem:[#allocation2 + $0xa8] sm:$0xf] }
  0xf7   : >> { %v484_v48 = vadd.f32 %v482_v36, %v474_v41  ;;  %v485_v49 = vadd.f32 %v483_v37, %v475_v42  ;;  %v519_v0 = vmul.f32 %v518_v54, %v514_v52  ;;  %v520_v1 = vmul.f32 %v518_v54, %v515_v53  ;;  %s1694_s19 = sld [smem:[#allocation4 + %s579_s10]]  ;;  %s615_s30 = sadd.s32 2, %s1626_s14  ;;  %v577_v37 = vld [vmem:[#allocation2 + $0x90] sm:$0xff]  ;;  %v596_v52 = vld [vmem:[#allocation2 + $0xb8] sm:$0xf] }
  0xf8   : >> { %v536_v4 = vstv %s1674_s29  ;;  %v528_v7 = vmul.f32 %v527_v61, %v523_v59  ;;  %v529_v8 = vmul.f32 %v527_v61, %v524_v60  ;;  %v545_v11 = vstv %s1678_s22  ;;  %s1698_s29 = sld [smem:[#allocation4 + %s588_s13]]  ;;  %s624_s7 = sadd.s32 2, %s1630_s15  ;;  %v605_v59 = vld [vmem:[#allocation2 + $0xc8] sm:$0xf] }
  0xf9   : >> { %v494_v55 = vadd.f32 %v492_v43, %v484_v48  ;;  %v495_v56 = vadd.f32 %v493_v44, %v485_v49  ;;  %v537_v14 = vmul.f32 %v536_v4, %v532_v2  ;;  %v538_v15 = vmul.f32 %v536_v4, %v533_v3  ;;  %s1702_s22 = sld [smem:[#allocation4 + %s597_s23]]  ;;  %s633_s10 = sadd.s32 2, %s1638_s25  ;;  %v586_v44 = vld [vmem:[#allocation2 + $0xa0] sm:$0xff]  ;;  %v614_v2 = vld [vmem:[#allocation2 + $0xd8] sm:$0xf] }
  0xfa   : >> { %v554_v18 = vstv %s1682_s6  ;;  %v546_v21 = vmul.f32 %v545_v11, %v541_v9  ;;  %v547_v22 = vmul.f32 %v545_v11, %v542_v10  ;;  %s1706_s6 = sld [smem:[#allocation4 + %s606_s26]]  ;;  %s642_s13 = sadd.s32 3, %s1594_s21  ;;  %v623_v9 = vld [vmem:[#allocation2 + $0xe8] sm:$0xf] }
  0xfb   : >> { %v503_v62 = vadd.f32 %v501_v50, %v494_v55  ;;  %v504_v63 = vadd.f32 %v502_v51, %v495_v56  ;;  %v563_v25 = vstv %s1686_s8  ;;  %v555_v28 = vmul.f32 %v554_v18, %v550_v16  ;;  %s1710_s8 = sld [smem:[#allocation4 + %s615_s30]]  ;;  %v595_v51 = vld [vmem:[#allocation2 + $0xb0] sm:$0xff]  ;;  %s651_s23 = sadd.s32 3, %s1602_s27  ;;  %v632_v16 = vld [vmem:[#allocation2 + $0xf8] sm:$0xf] }
  0xfc   : >> { %v556_v29 = vmul.f32 %v554_v18, %v551_v17  ;;  %v572_v32 = vstv %s1690_s11  ;;  %v564_v35 = vmul.f32 %v563_v25, %v559_v23  ;;  %v565_v36 = vmul.f32 %v563_v25, %v560_v24  ;;  %s1714_s11 = sld [smem:[#allocation4 + %s624_s7]]  ;;  %s660_s26 = sadd.s32 3, %s1604_s28  ;;  %v641_v23 = vld [vmem:[%s1541_s12 + $0x9] sm:$0xf] }
  0xfd   : >> { %v512_v5 = vadd.f32 %v510_v57, %v503_v62  ;;  %v513_v6 = vadd.f32 %v511_v58, %v504_v63  ;;  %v581_v39 = vstv %s1694_s19  ;;  %v573_v42 = vmul.f32 %v572_v32, %v568_v30  ;;  %s1718_s19 = sld [smem:[#allocation4 + %s633_s10]]  ;;  %v604_v58 = vld [vmem:[#allocation2 + $0xc0] sm:$0xff]  ;;  %s669_s30 = sadd.s32 3, %s1608_s5  ;;  %v1272_v30 = vld [vmem:[%s1541_s12 + $0x19] sm:$0xf] }
  0xfe   : >> { %v574_v43 = vmul.f32 %v572_v32, %v569_v31  ;;  %v590_v46 = vstv %s1698_s29  ;;  %v582_v49 = vmul.f32 %v581_v39, %v577_v37  ;;  %v583_v50 = vmul.f32 %v581_v39, %v578_v38  ;;  %s1722_s29 = sld [smem:[#allocation4 + %s642_s13]]  ;;  %s678_s7 = sadd.s32 3, %s1617_s9  ;;  %v1274_v37 = vld [vmem:[%s1541_s12 + $0x29] sm:$0xf] }
  0xff   : >> { %v521_v12 = vadd.f32 %v519_v0, %v512_v5  ;;  %v522_v13 = vadd.f32 %v520_v1, %v513_v6  ;;  %v599_v53 = vstv %s1702_s22  ;;  %v591_v56 = vmul.f32 %v590_v46, %v586_v44  ;;  %v613_v1 = vld [vmem:[#allocation2 + $0xd0] sm:$0xff]  ;;  %s1726_s22 = sld [smem:[#allocation4 + %s651_s23]]  ;;  %s687_s10 = sadd.s32 3, %s1626_s14  ;;  %v1276_v44 = vld [vmem:[%s1541_s12 + $0x39] sm:$0xf] }
 0x100   : >> { %v592_v57 = vmul.f32 %v590_v46, %v587_v45  ;;  %v608_v60 = vstv %s1706_s6  ;;  %v600_v63 = vmul.f32 %v599_v53, %v595_v51  ;;  %v601_v0 = vmul.f32 %v599_v53, %v596_v52  ;;  %s1730_s6 = sld [smem:[#allocation4 + %s660_s26]]  ;;  %s696_s13 = sadd.s32 3, %s1630_s15  ;;  %v1278_v51 = vld [vmem:[%s1541_s12 + $0x49] sm:$0xf] }
 0x101   : >> { %v530_v19 = vadd.f32 %v528_v7, %v521_v12  ;;  %v531_v20 = vadd.f32 %v529_v8, %v522_v13  ;;  %v617_v3 = vstv %s1710_s8  ;;  %v609_v6 = vmul.f32 %v608_v60, %v604_v58  ;;  %v622_v8 = vld [vmem:[#allocation2 + $0xe0] sm:$0xff]  ;;  %s1734_s8 = sld [smem:[#allocation4 + %s669_s30]]  ;;  %s705_s23 = sadd.s32 3, %s1638_s25  ;;  %v1280_v58 = vld [vmem:[%s1541_s12 + $0x59] sm:$0xf] }
 0x102   : >> { %v610_v7 = vmul.f32 %v608_v60, %v605_v59  ;;  %v626_v10 = vstv %s1714_s11  ;;  %v618_v13 = vmul.f32 %v617_v3, %v613_v1  ;;  %s1740_s11 = sld [smem:[#allocation4 + %s678_s7]]  ;;  %s714_s26 = sadd.s32 4, %s1594_s21  ;;  %v1282_v1 = vld [vmem:[%s1541_s12 + $0x69] sm:$0xf] }
 0x103   : >> { %v539_v26 = vadd.f32 %v537_v14, %v530_v19  ;;  %v540_v27 = vadd.f32 %v538_v15, %v531_v20  ;;  %v619_v14 = vmul.f32 %v617_v3, %v614_v2  ;;  %v631_v15 = vld [vmem:[#allocation2 + $0xf0] sm:$0xff]  ;;  %v635_v17 = vstv %s1718_s19  ;;  %s1746_s19 = sld [smem:[#allocation4 + %s687_s10]]  ;;  %s723_s30 = sadd.s32 4, %s1602_s27 }
 0x104   : >> { %v627_v20 = vmul.f32 %v626_v10, %v622_v8  ;;  %v644_v24 = vstv %s1722_s29  ;;  %s1752_s29 = sld [smem:[#allocation4 + %s696_s13]]  ;;  %s732_s7 = sadd.s32 4, %s1604_s28  ;;  %v1284_v8 = vld [vmem:[%s1541_s12 + $0x79] sm:$0xf] }
 0x105   : >> { %v548_v33 = vadd.f32 %v546_v21, %v539_v26  ;;  %v549_v34 = vadd.f32 %v547_v22, %v540_v27  ;;  %v628_v21 = vmul.f32 %v626_v10, %v623_v9  ;;  %v640_v22 = vld [vmem:[%s1541_s12 + $0x1] sm:$0xff]  ;;  %v636_v27 = vmul.f32 %v635_v17, %v631_v15  ;;  %s741_s10 = sadd.s32 4, %s1608_s5  ;;  %s750_s13 = sadd.s32 4, %s1617_s9  ;;  %v713_v15 = vld [vmem:[#allocation2 + $0x9] sm:$0xf] }
 0x106   : >> { %v653_v31 = vstv %s1726_s22  ;;  %v662_v38 = vstv %s1730_s6  ;;  %s1758_s22 = sld [smem:[#allocation4 + %s705_s23]]  ;;  %s759_s23 = sadd.s32 4, %s1626_s14 }
 0x107   : >> { %v557_v40 = vadd.f32 %v555_v28, %v548_v33  ;;  %v558_v41 = vadd.f32 %v556_v29, %v549_v34  ;;  %v637_v28 = vmul.f32 %v635_v17, %v632_v16  ;;  %v1271_v29 = vld [vmem:[%s1541_s12 + $0x11] sm:$0xff]  ;;  %v645_v34 = vmul.f32 %v644_v24, %v640_v22  ;;  %s1764_s6 = sld [smem:[#allocation4 + %s714_s26]]  ;;  %s768_s26 = sadd.s32 4, %s1630_s15  ;;  %v722_v22 = vld [vmem:[#allocation2 + $0x19] sm:$0xf] }
 0x108   : >> { %v671_v45 = vstv %s1734_s8  ;;  %v680_v52 = vstv %s1740_s11  ;;  %s1770_s8 = sld [smem:[#allocation4 + %s723_s30]]  ;;  %s777_s30 = sadd.s32 4, %s1638_s25 }
 0x109   : >> { %v566_v47 = vadd.f32 %v564_v35, %v557_v40  ;;  %v567_v48 = vadd.f32 %v565_v36, %v558_v41  ;;  %v646_v35 = vmul.f32 %v644_v24, %v641_v23  ;;  %v1273_v36 = vld [vmem:[%s1541_s12 + $0x21] sm:$0xff]  ;;  %v654_v41 = vmul.f32 %v1271_v29, %v653_v31  ;;  %s1776_s11 = sld [smem:[#allocation4 + %s732_s7]]  ;;  %v731_v29 = vld [vmem:[#allocation2 + $0x29] sm:$0xf]  ;;  %s786_s7 = sadd.s32 5, %s1594_s21 }
 0x10a   : >> { %v689_v59 = vstv %s1746_s19  ;;  %v698_v2 = vstv %s1752_s29  ;;  %s1782_s19 = sld [smem:[#allocation4 + %s741_s10]]  ;;  %s795_s10 = sadd.s32 5, %s1602_s27 }
 0x10b   : >> { %v575_v54 = vadd.f32 %v573_v42, %v566_v47  ;;  %v576_v55 = vadd.f32 %v574_v43, %v567_v48  ;;  %v655_v42 = vmul.f32 %v1272_v30, %v653_v31  ;;  %v1275_v43 = vld [vmem:[%s1541_s12 + $0x31] sm:$0xff]  ;;  %v663_v48 = vmul.f32 %v1273_v36, %v662_v38  ;;  %s1786_s29 = sld [smem:[#allocation4 + %s750_s13]]  ;;  %v740_v36 = vld [vmem:[#allocation2 + $0x39] sm:$0xf]  ;;  %s804_s13 = sadd.s32 5, %s1604_s28 }
 0x10c   : >> { %v707_v9 = vstv %s1758_s22  ;;  %s1790_s22 = sld [smem:[#allocation4 + %s759_s23]]  ;;  %s813_s23 = sadd.s32 5, %s1608_s5 }
 0x10d   : >> { %v584_v61 = vadd.f32 %v582_v49, %v575_v54  ;;  %v585_v62 = vadd.f32 %v583_v50, %v576_v55  ;;  %v664_v49 = vmul.f32 %v1274_v37, %v662_v38  ;;  %v1277_v50 = vld [vmem:[%s1541_s12 + $0x41] sm:$0xff]  ;;  %v672_v55 = vmul.f32 %v1275_v43, %v671_v45  ;;  %v749_v43 = vld [vmem:[#allocation2 + $0x49] sm:$0xf] }
 0x10e   : >> { %v716_v16 = vstv %s1764_s6  ;;  %v725_v23 = vstv %s1770_s8  ;;  %s1794_s6 = sld [smem:[#allocation4 + %s768_s26]]  ;;  %s822_s26 = sadd.s32 5, %s1617_s9 }
 0x10f   : >> { %v593_v4 = vadd.f32 %v591_v56, %v584_v61  ;;  %v594_v5 = vadd.f32 %v592_v57, %v585_v62  ;;  %v673_v56 = vmul.f32 %v1276_v44, %v671_v45  ;;  %v1279_v57 = vld [vmem:[%s1541_s12 + $0x51] sm:$0xff]  ;;  %v681_v62 = vmul.f32 %v1277_v50, %v680_v52  ;;  %s1798_s8 = sld [smem:[#allocation4 + %s777_s30]]  ;;  %v758_v50 = vld [vmem:[#allocation2 + $0x59] sm:$0xf]  ;;  %s831_s30 = sadd.s32 5, %s1626_s14 }
 0x110   : >> { %v734_v30 = vstv %s1776_s11  ;;  %v743_v37 = vstv %s1782_s19  ;;  %s1802_s11 = sld [smem:[#allocation4 + %s786_s7]]  ;;  %s840_s7 = sadd.s32 5, %s1630_s15 }
 0x111   : >> { %v602_v11 = vadd.f32 %v600_v63, %v593_v4  ;;  %v603_v12 = vadd.f32 %v601_v0, %v594_v5  ;;  %v682_v63 = vmul.f32 %v1278_v51, %v680_v52  ;;  %v1281_v0 = vld [vmem:[%s1541_s12 + $0x61] sm:$0xff]  ;;  %v690_v5 = vmul.f32 %v1279_v57, %v689_v59  ;;  %s1806_s19 = sld [smem:[#allocation4 + %s795_s10]]  ;;  %v767_v57 = vld [vmem:[#allocation2 + $0x69] sm:$0xf]  ;;  %s849_s10 = sadd.s32 5, %s1638_s25 }
 0x112   : >> { %v752_v44 = vstv %s1786_s29  ;;  %v761_v51 = vstv %s1790_s22  ;;  %s1810_s29 = sld [smem:[#allocation4 + %s804_s13]]  ;;  %s858_s13 = sadd.s32 6, %s1594_s21 }
 0x113   : >> { %v611_v18 = vadd.f32 %v609_v6, %v602_v11  ;;  %v612_v19 = vadd.f32 %v610_v7, %v603_v12  ;;  %v691_v6 = vmul.f32 %v1280_v58, %v689_v59  ;;  %v1283_v7 = vld [vmem:[%s1541_s12 + $0x71] sm:$0xff]  ;;  %v699_v12 = vmul.f32 %v1281_v0, %v698_v2  ;;  %v776_v0 = vld [vmem:[#allocation2 + $0x79] sm:$0xf]  ;;  %s1814_s22 = sld [smem:[#allocation4 + %s813_s23]]  ;;  %s867_s23 = sadd.s32 6, %s1602_s27 }
 0x114   : >> { %v770_v58 = vstv %s1794_s6  ;;  %s1818_s6 = sld [smem:[#allocation4 + %s822_s26]]  ;;  %s876_s26 = sadd.s32 6, %s1604_s28 }
 0x115   : >> { %v620_v25 = vadd.f32 %v618_v13, %v611_v18  ;;  %v621_v26 = vadd.f32 %v619_v14, %v612_v19  ;;  %v700_v13 = vmul.f32 %v1282_v1, %v698_v2  ;;  %v712_v14 = vld [vmem:[#allocation2 + $0x1] sm:$0xff]  ;;  %v708_v19 = vmul.f32 %v1283_v7, %v707_v9  ;;  %v785_v7 = vld [vmem:[#allocation2 + $0x89] sm:$0xf] }
 0x116   : >> { %v779_v1 = vstv %s1798_s8  ;;  %s1822_s8 = sld [smem:[#allocation4 + %s831_s30]]  ;;  %s885_s30 = sadd.s32 6, %s1608_s5 }
 0x117   : >> { %v629_v32 = vadd.f32 %v627_v20, %v620_v25  ;;  %v630_v33 = vadd.f32 %v628_v21, %v621_v26  ;;  %v709_v20 = vmul.f32 %v1284_v8, %v707_v9  ;;  %v721_v21 = vld [vmem:[#allocation2 + $0x11] sm:$0xff]  ;;  %v717_v26 = vmul.f32 %v716_v16, %v712_v14  ;;  %v794_v14 = vld [vmem:[#allocation2 + $0x99] sm:$0xf] }
 0x118   : >> { %v788_v8 = vstv %s1802_s11  ;;  %s1826_s11 = sld [smem:[#allocation4 + %s840_s7]]  ;;  %s894_s7 = sadd.s32 6, %s1617_s9 }
 0x119   : >> { %v638_v39 = vadd.f32 %v636_v27, %v629_v32  ;;  %v639_v40 = vadd.f32 %v637_v28, %v630_v33  ;;  %v718_v27 = vmul.f32 %v716_v16, %v713_v15  ;;  %v730_v28 = vld [vmem:[#allocation2 + $0x21] sm:$0xff]  ;;  %v726_v33 = vmul.f32 %v725_v23, %v721_v21  ;;  %v803_v21 = vld [vmem:[#allocation2 + $0xa9] sm:$0xf] }
 0x11a   : >> { %v797_v15 = vstv %s1806_s19  ;;  %s1830_s19 = sld [smem:[#allocation4 + %s849_s10]]  ;;  %s903_s10 = sadd.s32 6, %s1626_s14 }
 0x11b   : >> { %v647_v46 = vadd.f32 %v645_v34, %v638_v39  ;;  %v648_v47 = vadd.f32 %v646_v35, %v639_v40  ;;  %v727_v34 = vmul.f32 %v725_v23, %v722_v22  ;;  %v739_v35 = vld [vmem:[#allocation2 + $0x31] sm:$0xff]  ;;  %v735_v40 = vmul.f32 %v734_v30, %v730_v28  ;;  %v812_v28 = vld [vmem:[#allocation2 + $0xb9] sm:$0xf] }
 0x11c   : >> { %v806_v22 = vstv %s1810_s29  ;;  %s1834_s29 = sld [smem:[#allocation4 + %s858_s13]]  ;;  %s912_s13 = sadd.s32 6, %s1630_s15 }
 0x11d   : >> { %v656_v53 = vadd.f32 %v654_v41, %v647_v46  ;;  %v657_v54 = vadd.f32 %v655_v42, %v648_v47  ;;  %v736_v41 = vmul.f32 %v734_v30, %v731_v29  ;;  %v748_v42 = vld [vmem:[#allocation2 + $0x41] sm:$0xff]  ;;  %v744_v47 = vmul.f32 %v743_v37, %v739_v35  ;;  %v821_v35 = vld [vmem:[#allocation2 + $0xc9] sm:$0xf] }
 0x11e   : >> { %v815_v29 = vstv %s1814_s22  ;;  %s1838_s22 = sld [smem:[#allocation4 + %s867_s23]]  ;;  %s921_s23 = sadd.s32 6, %s1638_s25 }
 0x11f   : >> { %v665_v60 = vadd.f32 %v663_v48, %v656_v53  ;;  %v666_v61 = vadd.f32 %v664_v49, %v657_v54  ;;  %v745_v48 = vmul.f32 %v743_v37, %v740_v36  ;;  %v757_v49 = vld [vmem:[#allocation2 + $0x51] sm:$0xff]  ;;  %v753_v54 = vmul.f32 %v752_v44, %v748_v42  ;;  %v830_v42 = vld [vmem:[#allocation2 + $0xd9] sm:$0xf] }
 0x120   : >> { %v824_v36 = vstv %s1818_s6  ;;  %s1842_s6 = sld [smem:[#allocation4 + %s876_s26]]  ;;  %s930_s26 = sadd.s32 7, %s1594_s21 }
 0x121   : >> { %v674_v3 = vadd.f32 %v672_v55, %v665_v60  ;;  %v675_v4 = vadd.f32 %v673_v56, %v666_v61  ;;  %v754_v55 = vmul.f32 %v752_v44, %v749_v43  ;;  %v766_v56 = vld [vmem:[#allocation2 + $0x61] sm:$0xff]  ;;  %v762_v61 = vmul.f32 %v761_v51, %v757_v49  ;;  %v839_v49 = vld [vmem:[#allocation2 + $0xe9] sm:$0xf] }
 0x122   : >> { %v833_v43 = vstv %s1822_s8  ;;  %s1846_s8 = sld [smem:[#allocation4 + %s885_s30]]  ;;  %s939_s30 = sadd.s32 7, %s1602_s27 }
 0x123   : >> { %v683_v10 = vadd.f32 %v681_v62, %v674_v3  ;;  %v684_v11 = vadd.f32 %v682_v63, %v675_v4  ;;  %v763_v62 = vmul.f32 %v761_v51, %v758_v50  ;;  %v775_v63 = vld [vmem:[#allocation2 + $0x71] sm:$0xff]  ;;  %v771_v4 = vmul.f32 %v770_v58, %v766_v56  ;;  %v848_v56 = vld [vmem:[#allocation2 + $0xf9] sm:$0xf] }
 0x124   : >> { %v842_v50 = vstv %s1826_s11  ;;  %s1852_s11 = sld [smem:[#allocation4 + %s894_s7]]  ;;  %s948_s7 = sadd.s32 7, %s1604_s28 }
 0x125   : >> { %v692_v17 = vadd.f32 %v690_v5, %v683_v10  ;;  %v693_v18 = vadd.f32 %v691_v6, %v684_v11  ;;  %v772_v5 = vmul.f32 %v770_v58, %v767_v57  ;;  %v784_v6 = vld [vmem:[#allocation2 + $0x81] sm:$0xff]  ;;  %v780_v11 = vmul.f32 %v779_v1, %v775_v63  ;;  %v857_v63 = vld [vmem:[%s1541_s12 + $0xa] sm:$0xf] }
 0x126   : >> { %v851_v57 = vstv %s1830_s19  ;;  %s1858_s19 = sld [smem:[#allocation4 + %s903_s10]]  ;;  %s957_s10 = sadd.s32 7, %s1608_s5 }
 0x127   : >> { %v701_v24 = vadd.f32 %v699_v12, %v692_v17  ;;  %v702_v25 = vadd.f32 %v700_v13, %v693_v18  ;;  %v781_v12 = vmul.f32 %v779_v1, %v776_v0  ;;  %v793_v13 = vld [vmem:[#allocation2 + $0x91] sm:$0xff]  ;;  %v789_v18 = vmul.f32 %v788_v8, %v784_v6  ;;  %v1286_v6 = vld [vmem:[%s1541_s12 + $0x1a] sm:$0xf] }
 0x128   : >> { %v860_v0 = vstv %s1834_s29  ;;  %s1864_s29 = sld [smem:[#allocation4 + %s912_s13]]  ;;  %s966_s13 = sadd.s32 7, %s1617_s9 }
 0x129   : >> { %v710_v31 = vadd.f32 %v708_v19, %v701_v24  ;;  %v711_v32 = vadd.f32 %v709_v20, %v702_v25  ;;  %v790_v19 = vmul.f32 %v788_v8, %v785_v7  ;;  %v802_v20 = vld [vmem:[#allocation2 + $0xa1] sm:$0xff]  ;;  %v798_v25 = vmul.f32 %v797_v15, %v793_v13  ;;  %v1288_v13 = vld [vmem:[%s1541_s12 + $0x2a] sm:$0xf] }
 0x12a   : >> { %v869_v7 = vstv %s1838_s22  ;;  %s1870_s22 = sld [smem:[#allocation4 + %s921_s23]]  ;;  %s975_s23 = sadd.s32 7, %s1626_s14 }
 0x12b   : >> { %v719_v38 = vadd.f32 %v717_v26, %v710_v31  ;;  %v720_v39 = vadd.f32 %v718_v27, %v711_v32  ;;  %v799_v26 = vmul.f32 %v797_v15, %v794_v14  ;;  %v811_v27 = vld [vmem:[#allocation2 + $0xb1] sm:$0xff]  ;;  %v807_v32 = vmul.f32 %v806_v22, %v802_v20  ;;  %v1290_v20 = vld [vmem:[%s1541_s12 + $0x3a] sm:$0xf] }
 0x12c   : >> { %v878_v14 = vstv %s1842_s6  ;;  %s1876_s6 = sld [smem:[#allocation4 + %s930_s26]]  ;;  %s984_s26 = sadd.s32 7, %s1630_s15 }
 0x12d   : >> { %v728_v45 = vadd.f32 %v726_v33, %v719_v38  ;;  %v729_v46 = vadd.f32 %v727_v34, %v720_v39  ;;  %v808_v33 = vmul.f32 %v806_v22, %v803_v21  ;;  %v820_v34 = vld [vmem:[#allocation2 + $0xc1] sm:$0xff]  ;;  %v816_v39 = vmul.f32 %v815_v29, %v811_v27  ;;  %v1292_v27 = vld [vmem:[%s1541_s12 + $0x4a] sm:$0xf] }
 0x12e   : >> { %v887_v21 = vstv %s1846_s8  ;;  %s1882_s8 = sld [smem:[#allocation4 + %s939_s30]]  ;;  %s993_s30 = sadd.s32 7, %s1638_s25 }
 0x12f   : >> { %v737_v52 = vadd.f32 %v735_v40, %v728_v45  ;;  %v738_v53 = vadd.f32 %v736_v41, %v729_v46  ;;  %v817_v40 = vmul.f32 %v815_v29, %v812_v28  ;;  %v829_v41 = vld [vmem:[#allocation2 + $0xd1] sm:$0xff]  ;;  %v825_v46 = vmul.f32 %v824_v36, %v820_v34  ;;  %v1294_v34 = vld [vmem:[%s1541_s12 + $0x5a] sm:$0xf] }
 0x130   : >> { %v896_v28 = vstv %s1852_s11  ;;  %s1888_s11 = sld [smem:[#allocation4 + %s948_s7]]  ;;  %s1002_s7 = sadd.s32 8, %s1594_s21 }
 0x131   : >> { %v746_v59 = vadd.f32 %v744_v47, %v737_v52  ;;  %v747_v60 = vadd.f32 %v745_v48, %v738_v53  ;;  %v826_v47 = vmul.f32 %v824_v36, %v821_v35  ;;  %v838_v48 = vld [vmem:[#allocation2 + $0xe1] sm:$0xff]  ;;  %v834_v53 = vmul.f32 %v833_v43, %v829_v41  ;;  %v1296_v41 = vld [vmem:[%s1541_s12 + $0x6a] sm:$0xf]  ;;  %s1020_s21 = sadd.s32 8, %s1604_s28  ;;  %s1038_s28 = sadd.s32 8, %s1617_s9 }
 0x132   : >> { %v905_v35 = vstv %s1858_s19  ;;  %s1894_s19 = sld [smem:[#allocation4 + %s957_s10]]  ;;  %s1011_s10 = sadd.s32 8, %s1602_s27 }
 0x133   : >> { %v755_v2 = vadd.f32 %v753_v54, %v746_v59  ;;  %v756_v3 = vadd.f32 %v754_v55, %v747_v60  ;;  %v835_v54 = vmul.f32 %v833_v43, %v830_v42  ;;  %v847_v55 = vld [vmem:[#allocation2 + $0xf1] sm:$0xff]  ;;  %v843_v60 = vmul.f32 %v842_v50, %v838_v48  ;;  %v1298_v48 = vld [vmem:[%s1541_s12 + $0x7a] sm:$0xf]  ;;  %s1029_s27 = sadd.s32 8, %s1608_s5  ;;  %s1047_s5 = sadd.s32 8, %s1626_s14 }
 0x134   : >> { %v914_v42 = vstv %s1864_s29  ;;  %s1898_s29 = sld [smem:[#allocation4 + %s966_s13]]  ;;  %s1056_s9 = sadd.s32 8, %s1630_s15 }
 0x135   : >> { %v764_v9 = vadd.f32 %v762_v61, %v755_v2  ;;  %v765_v10 = vadd.f32 %v763_v62, %v756_v3  ;;  %v844_v61 = vmul.f32 %v842_v50, %v839_v49  ;;  %v856_v62 = vld [vmem:[%s1541_s12 + $0x2] sm:$0xff]  ;;  %v852_v3 = vmul.f32 %v851_v57, %v847_v55  ;;  %v929_v55 = vld [vmem:[#allocation2 + $0xa] sm:$0xf]  ;;  %s1918_s13 = sld [smem:[#allocation4 + %s1011_s10]]  ;;  %s1065_s14 = sadd.s32 8, %s1638_s25 }
 0x136   : >> { %v923_v49 = vstv %s1870_s22  ;;  %s1902_s22 = sld [smem:[#allocation4 + %s975_s23]] }
 0x137   : >> { %v773_v16 = vadd.f32 %v771_v4, %v764_v9  ;;  %v774_v17 = vadd.f32 %v772_v5, %v765_v10  ;;  %v853_v4 = vmul.f32 %v851_v57, %v848_v56  ;;  %v1285_v5 = vld [vmem:[%s1541_s12 + $0x12] sm:$0xff]  ;;  %v861_v10 = vmul.f32 %v860_v0, %v856_v62  ;;  %v938_v62 = vld [vmem:[#allocation2 + $0x1a] sm:$0xf]  ;;  %s1926_s23 = sld [smem:[#allocation4 + %s1029_s27]] }
 0x138   : >> { %v932_v56 = vstv %s1876_s6  ;;  %s1906_s6 = sld [smem:[#allocation4 + %s984_s26]] }
 0x139   : >> { %v782_v23 = vadd.f32 %v780_v11, %v773_v16  ;;  %v783_v24 = vadd.f32 %v781_v12, %v774_v17  ;;  %v862_v11 = vmul.f32 %v860_v0, %v857_v63  ;;  %v1287_v12 = vld [vmem:[%s1541_s12 + $0x22] sm:$0xff]  ;;  %v870_v17 = vmul.f32 %v1285_v5, %v869_v7  ;;  %v947_v5 = vld [vmem:[#allocation2 + $0x2a] sm:$0xf]  ;;  %s1934_s26 = sld [smem:[#allocation4 + %s1047_s5]] }
 0x13a   : >> { %v941_v63 = vstv %s1882_s8  ;;  %s1910_s8 = sld [smem:[#allocation4 + %s993_s30]] }
 0x13b   : >> { %v791_v30 = vadd.f32 %v789_v18, %v782_v23  ;;  %v792_v31 = vadd.f32 %v790_v19, %v783_v24  ;;  %v871_v18 = vmul.f32 %v1286_v6, %v869_v7  ;;  %v1289_v19 = vld [vmem:[%s1541_s12 + $0x32] sm:$0xff]  ;;  %v879_v24 = vmul.f32 %v1287_v12, %v878_v14  ;;  %v956_v12 = vld [vmem:[#allocation2 + $0x3a] sm:$0xf]  ;;  %s1941_s15 = sld [smem:[#allocation4 + %s1065_s14]] }
 0x13c   : >> { %v950_v6 = vstv %s1888_s11  ;;  %s1914_s11 = sld [smem:[#allocation4 + %s1002_s7]] }
 0x13d   : >> { %v800_v37 = vadd.f32 %v798_v25, %v791_v30  ;;  %v801_v38 = vadd.f32 %v799_v26, %v792_v31  ;;  %v880_v25 = vmul.f32 %v1288_v13, %v878_v14  ;;  %v1291_v26 = vld [vmem:[%s1541_s12 + $0x42] sm:$0xff]  ;;  %v888_v31 = vmul.f32 %v1289_v19, %v887_v21  ;;  %v965_v19 = vld [vmem:[#allocation2 + $0x4a] sm:$0xf]  ;;  %s1072_s25 = sld [smem:[#allocation6 + %s1452_s20]] }
 0x13e   : >> { %v959_v13 = vstv %s1894_s19  ;;  %s1922_s19 = sld [smem:[#allocation4 + %s1020_s21]] }
 0x13f   : >> { %v809_v44 = vadd.f32 %v807_v32, %v800_v37  ;;  %v810_v45 = vadd.f32 %v808_v33, %v801_v38  ;;  %v889_v32 = vmul.f32 %v1290_v20, %v887_v21  ;;  %v1293_v33 = vld [vmem:[%s1541_s12 + $0x52] sm:$0xff]  ;;  %v897_v38 = vmul.f32 %v1291_v26, %v896_v28  ;;  %v974_v26 = vld [vmem:[#allocation2 + $0x5a] sm:$0xf]  ;;  %s1076_s30 = sld [smem:[#allocation8 + %s1452_s20]] }
 0x140   : >> { %v968_v20 = vstv %s1898_s29  ;;  %s1930_s29 = sld [smem:[#allocation4 + %s1038_s28]] }
 0x141   : >> { %v818_v51 = vadd.f32 %v816_v39, %v809_v44  ;;  %v819_v52 = vadd.f32 %v817_v40, %v810_v45  ;;  %v898_v39 = vmul.f32 %v1292_v27, %v896_v28  ;;  %v1295_v40 = vld [vmem:[%s1541_s12 + $0x62] sm:$0xff]  ;;  %v906_v45 = vmul.f32 %v1293_v33, %v905_v35  ;;  %v983_v33 = vld [vmem:[#allocation2 + $0x6a] sm:$0xf] }
 0x142   : >> { %v977_v27 = vstv %s1902_s22  ;;  %s1938_s22 = sld [smem:[#allocation4 + %s1056_s9]] }
 0x143   : >> { %v827_v58 = vadd.f32 %v825_v46, %v818_v51  ;;  %v828_v59 = vadd.f32 %v826_v47, %v819_v52  ;;  %v907_v46 = vmul.f32 %v1294_v34, %v905_v35  ;;  %v1297_v47 = vld [vmem:[%s1541_s12 + $0x72] sm:$0xff]  ;;  %v915_v52 = vmul.f32 %v1295_v40, %v914_v42  ;;  %v992_v40 = vld [vmem:[#allocation2 + $0x7a] sm:$0xf] }
 0x144   : >> { %v986_v34 = vstv %s1906_s6  ;;  %s1299_s6 = sshll.u32 %s1452_s20, 2  ;;  %s415_s20 = sadd.s32 1, %s1452_s20  }
 0x145   : >> { %v836_v1 = vadd.f32 %v834_v53, %v827_v58  ;;  %v837_v2 = vadd.f32 %v835_v54, %v828_v59  ;;  %v916_v53 = vmul.f32 %v1296_v41, %v914_v42  ;;  %v928_v54 = vld [vmem:[#allocation2 + $0x2] sm:$0xff]  ;;  %v924_v59 = vmul.f32 %v1297_v47, %v923_v49  ;;  %v1001_v47 = vld [vmem:[#allocation2 + $0x8a] sm:$0xf]  ;;  %s1092_s7 = scalar_lea.vmem %s1546_s18, %s1299_s6  ;;  %p412_p8 = scmp.ge.s32.totalorder %s415_s20, 16  }
 0x146   : >> { %v995_v41 = vstv %s1910_s8 }
 0x147   : >> { %v845_v8 = vadd.f32 %v843_v60, %v836_v1  ;;  %v846_v9 = vadd.f32 %v844_v61, %v837_v2  ;;  %v925_v60 = vmul.f32 %v1298_v48, %v923_v49  ;;  %v937_v61 = vld [vmem:[#allocation2 + $0x12] sm:$0xff]  ;;  %v933_v2 = vmul.f32 %v932_v56, %v928_v54  ;;  %v1010_v54 = vld [vmem:[#allocation2 + $0x9a] sm:$0xf] }
 0x148   : >> { %v1004_v48 = vstv %s1914_s11 }
 0x149   : >> { %v854_v15 = vadd.f32 %v852_v3, %v845_v8  ;;  %v855_v16 = vadd.f32 %v853_v4, %v846_v9  ;;  %v934_v3 = vmul.f32 %v932_v56, %v929_v55  ;;  %v946_v4 = vld [vmem:[#allocation2 + $0x22] sm:$0xff]  ;;  %v942_v9 = vmul.f32 %v941_v63, %v937_v61  ;;  %v1019_v61 = vld [vmem:[#allocation2 + $0xaa] sm:$0xf] }
 0x14a   : >> { %v1013_v55 = vstv %s1918_s13 }
 0x14b   : >> { %v863_v22 = vadd.f32 %v861_v10, %v854_v15  ;;  %v864_v23 = vadd.f32 %v862_v11, %v855_v16  ;;  %v943_v10 = vmul.f32 %v941_v63, %v938_v62  ;;  %v955_v11 = vld [vmem:[#allocation2 + $0x32] sm:$0xff]  ;;  %v951_v16 = vmul.f32 %v950_v6, %v946_v4  ;;  %v1028_v4 = vld [vmem:[#allocation2 + $0xba] sm:$0xf] }
 0x14c   : >> { %v1022_v62 = vstv %s1922_s19 }
 0x14d   : >> { %v872_v29 = vadd.f32 %v870_v17, %v863_v22  ;;  %v873_v30 = vadd.f32 %v871_v18, %v864_v23  ;;  %v952_v17 = vmul.f32 %v950_v6, %v947_v5  ;;  %v964_v18 = vld [vmem:[#allocation2 + $0x42] sm:$0xff]  ;;  %v960_v23 = vmul.f32 %v959_v13, %v955_v11  ;;  %v1037_v11 = vld [vmem:[#allocation2 + $0xca] sm:$0xf] }
 0x14e   : >> { %v1031_v5 = vstv %s1926_s23 }
 0x14f   : >> { %v881_v36 = vadd.f32 %v879_v24, %v872_v29  ;;  %v882_v37 = vadd.f32 %v880_v25, %v873_v30  ;;  %v961_v24 = vmul.f32 %v959_v13, %v956_v12  ;;  %v973_v25 = vld [vmem:[#allocation2 + $0x52] sm:$0xff]  ;;  %v969_v30 = vmul.f32 %v968_v20, %v964_v18  ;;  %v1046_v18 = vld [vmem:[#allocation2 + $0xda] sm:$0xf] }
 0x150   : >> { %v1040_v12 = vstv %s1930_s29 }
 0x151   : >> { %v890_v43 = vadd.f32 %v888_v31, %v881_v36  ;;  %v891_v44 = vadd.f32 %v889_v32, %v882_v37  ;;  %v970_v31 = vmul.f32 %v968_v20, %v965_v19  ;;  %v982_v32 = vld [vmem:[#allocation2 + $0x62] sm:$0xff]  ;;  %v978_v37 = vmul.f32 %v977_v27, %v973_v25  ;;  %v1055_v25 = vld [vmem:[#allocation2 + $0xea] sm:$0xf] }
 0x152   : >> { %v1049_v19 = vstv %s1934_s26 }
 0x153   : >> { %v899_v50 = vadd.f32 %v897_v38, %v890_v43  ;;  %v900_v51 = vadd.f32 %v898_v39, %v891_v44  ;;  %v979_v38 = vmul.f32 %v977_v27, %v974_v26  ;;  %v991_v39 = vld [vmem:[#allocation2 + $0x72] sm:$0xff]  ;;  %v987_v44 = vmul.f32 %v986_v34, %v982_v32  ;;  %v1064_v32 = vld [vmem:[#allocation2 + $0xfa] sm:$0xf] }
 0x154   : >> { %v1058_v26 = vstv %s1938_s22 }
 0x155   : >> { %v908_v57 = vadd.f32 %v906_v45, %v899_v50  ;;  %v909_v58 = vadd.f32 %v907_v46, %v900_v51  ;;  %v988_v45 = vmul.f32 %v986_v34, %v983_v33  ;;  %v1000_v46 = vld [vmem:[#allocation2 + $0x82] sm:$0xff]  ;;  %v996_v51 = vmul.f32 %v995_v41, %v991_v39 }
 0x156   : >> { %v1067_v33 = vstv %s1941_s15 }
 0x157   : >> { %v917_v0 = vadd.f32 %v915_v52, %v908_v57  ;;  %v918_v1 = vadd.f32 %v916_v53, %v909_v58  ;;  %v997_v52 = vmul.f32 %v995_v41, %v992_v40  ;;  %v1009_v53 = vld [vmem:[#allocation2 + $0x92] sm:$0xff]  ;;  %v1005_v58 = vmul.f32 %v1004_v48, %v1000_v46 }
 0x158   : >> { %v1069_v41 = vmul.f32 %v1067_v33, %v1064_v32 }
 0x159   : >> { %v926_v7 = vadd.f32 %v924_v59, %v917_v0  ;;  %v927_v8 = vadd.f32 %v925_v60, %v918_v1  ;;  %v1006_v59 = vmul.f32 %v1004_v48, %v1001_v47  ;;  %v1018_v60 = vld [vmem:[#allocation2 + $0xa2] sm:$0xff]  ;;  %v1014_v1 = vmul.f32 %v1013_v55, %v1009_v53 }
 0x15a   : >> { %v1077_v47 = vstv %s1076_s30 }
 0x15b   : >> { %v935_v14 = vadd.f32 %v933_v2, %v926_v7  ;;  %v936_v15 = vadd.f32 %v934_v3, %v927_v8  ;;  %v1015_v2 = vmul.f32 %v1013_v55, %v1010_v54  ;;  %v1027_v3 = vld [vmem:[#allocation2 + $0xb2] sm:$0xff]  ;;  %v1023_v8 = vmul.f32 %v1022_v62, %v1018_v60 }
 0x15d   : >> { %v944_v21 = vadd.f32 %v942_v9, %v935_v14  ;;  %v945_v22 = vadd.f32 %v943_v10, %v936_v15  ;;  %v1024_v9 = vmul.f32 %v1022_v62, %v1019_v61  ;;  %v1036_v10 = vld [vmem:[#allocation2 + $0xc2] sm:$0xff]  ;;  %v1032_v15 = vmul.f32 %v1031_v5, %v1027_v3 }
 0x15f   : >> { %v953_v28 = vadd.f32 %v951_v16, %v944_v21  ;;  %v954_v29 = vadd.f32 %v952_v17, %v945_v22  ;;  %v1033_v16 = vmul.f32 %v1031_v5, %v1028_v4  ;;  %v1045_v17 = vld [vmem:[#allocation2 + $0xd2] sm:$0xff]  ;;  %v1041_v22 = vmul.f32 %v1040_v12, %v1036_v10 }
 0x161   : >> { %v962_v35 = vadd.f32 %v960_v23, %v953_v28  ;;  %v963_v36 = vadd.f32 %v961_v24, %v954_v29  ;;  %v1042_v23 = vmul.f32 %v1040_v12, %v1037_v11  ;;  %v1054_v24 = vld [vmem:[#allocation2 + $0xe2] sm:$0xff]  ;;  %v1050_v29 = vmul.f32 %v1049_v19, %v1045_v17 }
 0x163   : >> { %v971_v42 = vadd.f32 %v969_v30, %v962_v35  ;;  %v972_v43 = vadd.f32 %v970_v31, %v963_v36  ;;  %v1051_v30 = vmul.f32 %v1049_v19, %v1046_v18  ;;  %v1063_v31 = vld [vmem:[#allocation2 + $0xf2] sm:$0xff]  ;;  %v1059_v36 = vmul.f32 %v1058_v26, %v1054_v24 }
 0x164   : >> { %v1068_v40 = vmul.f32 %v1067_v33, %v1063_v31 }
 0x165   : >> { %v980_v49 = vadd.f32 %v978_v37, %v971_v42  ;;  %v981_v50 = vadd.f32 %v979_v38, %v972_v43  ;;  %v1060_v37 = vmul.f32 %v1058_v26, %v1055_v25 }
 0x167   : >> { %v989_v56 = vadd.f32 %v987_v44, %v980_v49  ;;  %v990_v57 = vadd.f32 %v988_v45, %v981_v50  ;;  %v1073_v44 = vstv %s1072_s25 }
 0x169   : >> { %v998_v63 = vadd.f32 %v996_v51, %v989_v56  ;;  %v999_v0 = vadd.f32 %v997_v52, %v990_v57 }
 0x16b   : >> { %v1007_v6 = vadd.f32 %v1005_v58, %v998_v63  ;;  %v1008_v7 = vadd.f32 %v1006_v59, %v999_v0 }
 0x16d   : >> { %v1016_v13 = vadd.f32 %v1014_v1, %v1007_v6  ;;  %v1017_v14 = vadd.f32 %v1015_v2, %v1008_v7 }
 0x16f   : >> { %v1025_v20 = vadd.f32 %v1023_v8, %v1016_v13  ;;  %v1026_v21 = vadd.f32 %v1024_v9, %v1017_v14 }
 0x171   : >> { %v1034_v27 = vadd.f32 %v1032_v15, %v1025_v20  ;;  %v1035_v28 = vadd.f32 %v1033_v16, %v1026_v21 }
 0x173   : >> { %v1043_v34 = vadd.f32 %v1041_v22, %v1034_v27  ;;  %v1044_v35 = vadd.f32 %v1042_v23, %v1035_v28 }
 0x175   : >> { %v1052_v38 = vadd.f32 %v1050_v29, %v1043_v34  ;;  %v1053_v39 = vadd.f32 %v1051_v30, %v1044_v35 }
 0x177   : >> { %v1061_v42 = vadd.f32 %v1059_v36, %v1052_v38  ;;  %v1062_v43 = vadd.f32 %v1060_v37, %v1053_v39 }
 0x179   : >> { %v1070_v45 = vadd.f32 %v1068_v40, %v1061_v42  ;;  %v1071_v46 = vadd.f32 %v1069_v41, %v1062_v43 }
 0x17b   : >> { %v1074_v48 = vmul.f32 %v1073_v44, %v1070_v45  ;;  %v1075_v49 = vmul.f32 %v1073_v44, %v1071_v46 }
 0x17d   : >> { %v1078_v50 = vadd.f32 %v1077_v47, %v1074_v48  ;;  %v1079_v51 = vadd.f32 %v1077_v47, %v1075_v49 }
 0x17f   : >> { %v1080_v52 = vmax.f32 %v1078_v50, 0.0  ;;  %v1081_v53 = vmax.f32 %v1079_v51, 0.0 }
 0x181   : >> { %1082 = vst [vmem:[#allocation3] sm:$0xff] %v1080_v52 }
 0x182   : >> { %1083 = vst [vmem:[#allocation3 + $0x8] sm:$0xf] %v1081_v53 }
 0x189   : >> { %v1084_v54 = vld [vmem:[#allocation3] ss:$3 sm:$0xf]  ;;  %v1086_v55 = vld [vmem:[#allocation3 + $0x1] ss:$3 sm:$0xf] }
 0x18a   : >> { %v1089_v56 = vmax.f32 %v1084_v54, %v1086_v55  ;;  %v1088_v57 = vld [vmem:[#allocation3 + $0x2] ss:$3 sm:$0xf]  ;;  %414 = sbr.rel (!%p412_p8) target bundleno = 224 (0xe0), region = 111 }
 0x18c   : >> { %v1090_v58 = vmax.f32 %v1089_v56, %v1088_v57 }
 0x18e   : >> { %1093 = vst [vmem:[%s1092_s7] sm:$0xf] %v1090_v58 }
 0x18f PF: > { %s16_s17 = sadd.s32 1, %s1448_s17   ;;  %s1970_s15 = smov %s1444_s16 }
 0x190   : > { %p13_p9 = scmp.ge.s32.totalorder %s16_s17, 4   ;;  %s1971_s16 = smov %s1973_s24 }
 0x192   :  { %15 = sbr.rel (!%p13_p9) target bundleno = 3 (0x3), region = 122 }
 0x197   :  { %1124 = vsyncpa [#allocation5], 1 }
 0x198   :  { %1126 = vsyncpa [#allocation5 + $0x1], 1 }
 0x199   :  { %1127 = vsyncpa [#allocation7], 1 }

</bundles_post_ra>
